<compile_context>
chip_gen: v7x
topology: tpu7x:2x2x1
jax: 0.10.0
libtpu: 0.0.40
codegen_flags: <defaults>
</compile_context>

<pallas_src>
import math

import jax
import jax.numpy as jnp
from jax import lax
from jax.experimental import pallas as pl
from jax.experimental.pallas import tpu as pltpu


_W_KEYS = frozenset({
    "sa_wq", "sa_wk", "sa_wv", "sa_wo",
    "ca_wq", "ca_wk", "ca_wv", "ca_wo",
    "ffn_w1", "ffn_w2",
})


def _param_order(tie_self_kq):
    order = ["sa_wq", "sa_bq"]
    if not tie_self_kq:
        order += ["sa_wk", "sa_bk"]
    order += [
        "sa_wv", "sa_bv", "sa_wo", "sa_bo", "ln0_g", "ln0_b",
        "ca_wq", "ca_bq", "ca_wk", "ca_bk", "ca_wv", "ca_bv",
        "ca_wo", "ca_bo", "ln1_g", "ln1_b",
        "ffn_w1", "ffn_b1", "ffn_w2", "ffn_b2", "ln2_g", "ln2_b",
    ]
    return order


def _make_decoder_kernel(BC, Tt, Ts, C, n_heads, tie_self_kq, param_order):
    """Fused kernel: one grid step == one decoder layer over one batch chunk."""
    H = n_heads
    D = C // H
    assert H * D == C
    scale = 1.0 / math.sqrt(D)
    NP = len(param_order)
    NEG = -10000.0

    def layer_norm(v, g, b):
        mu = jnp.mean(v, axis=-1, keepdims=True)
        var = jnp.mean(jnp.square(v - mu), axis=-1, keepdims=True)
        return (v - mu) * lax.rsqrt(var + 1e-5) * g + b

    def softmax_lastdim(s):
        s = s - jnp.max(s, axis=-1, keepdims=True)
        e = jnp.exp(s)
        return e * pl.reciprocal(jnp.sum(e, axis=-1, keepdims=True), approx=True)

    def kernel(*refs):
        x_ref, h_ref, xm_ref, hm_ref = refs[:4]
        p = dict(zip(param_order, refs[4:4 + NP]))
        out_ref = refs[4 + NP]                         # carried activation (VMEM-resident)
        causal_scr = refs[4 + NP + 1]                  # [Tt, Tt]  f32 {0,1}
        encdec_scr = refs[4 + NP + 2]                  # [BC, Tt, Ts] f32 {0,1}
        ctx_scr = refs[4 + NP + 3]                     # [BC*Tt, C] f32 attention context

        layer = pl.program_id(1)
        n_layers = pl.num_programs(1)
        xm = xm_ref[...]                               # [BC*Tt, 1] f32

        @pl.when(layer == 0)
        def _init():
            # Module entry: x = x * x_mask.  Masks built once per chunk.
            out_ref[...] = x_ref[...] * xm
            row = lax.broadcasted_iota(jnp.int32, (Tt, Tt), 0)
            col = lax.broadcasted_iota(jnp.int32, (Tt, Tt), 1)
            causal_scr[...] = (row >= col).astype(jnp.float32)         # subsequent_mask
            encdec_scr[...] = xm.reshape(BC, Tt, 1) * hm_ref[...]      # [BC,Tt,Ts]

        x = out_ref[...]                               # [BC*Tt, C] f32
        causal_ok = causal_scr[...] > 0.5              # [Tt, Tt] bool
        encdec_ok = encdec_scr[...] > 0.5              # [BC, Tt, Ts] bool

        def mha(q_scaled, kfull, vfull, Tq, Tk, ok_mask):
            # q_scaled: [BC*Tq, C] f32, kfull/vfull: [BC*Tk, C] f32
            # ok_mask broadcastable to [BC, Tq, Tk]
            for hh in range(H):                        # small static head loop
                cs = slice(hh * D, (hh + 1) * D)
                qh = q_scaled[:, cs].reshape(BC, Tq, D).astype(jnp.bfloat16)
                kh = kfull[:, cs].reshape(BC, Tk, D).astype(jnp.bfloat16)
                vh = vfull[:, cs].reshape(BC, Tk, D).astype(jnp.bfloat16)
                s = jnp.einsum("btd,bsd->bts", qh, kh,
                               preferred_element_type=jnp.float32)     # [BC,Tq,Tk]
                s = jnp.where(ok_mask, s, NEG)                          # masked_fill
                a = softmax_lastdim(s)
                oh = jnp.einsum("bts,bsd->btd", a.astype(jnp.bfloat16), vh,
                                preferred_element_type=jnp.float32)    # [BC,Tq,D]
                ctx_scr[:, cs] = oh.reshape(BC * Tq, D)
            return ctx_scr[...]                        # [BC*Tq, C]

        # ---------------- causal self-attention ----------------
        xb = x.astype(jnp.bfloat16)
        q = jnp.dot(xb, p["sa_wq"][...],
                    preferred_element_type=jnp.float32) + p["sa_bq"][...]
        if tie_self_kq:
            k = q                                      # conv_k weights tied to conv_q
        else:
            k = jnp.dot(xb, p["sa_wk"][...],
                        preferred_element_type=jnp.float32) + p["sa_bk"][...]
        v = jnp.dot(xb, p["sa_wv"][...],
                    preferred_element_type=jnp.float32) + p["sa_bv"][...]
        o = mha(q * scale, k, v, Tt, Tt, causal_ok[None])
        y = jnp.dot(o.astype(jnp.bfloat16), p["sa_wo"][...],
                    preferred_element_type=jnp.float32) + p["sa_bo"][...]
        x = layer_norm(x + y, p["ln0_g"][...], p["ln0_b"][...])

        # ---------------- encoder-decoder attention ----------------
        xb = x.astype(jnp.bfloat16)
        h2 = h_ref[...].reshape(BC * Ts, C)            # bf16, one flat slab per chunk
        q = jnp.dot(xb, p["ca_wq"][...],
                    preferred_element_type=jnp.float32) + p["ca_bq"][...]
        k = jnp.dot(h2, p["ca_wk"][...],
                    preferred_element_type=jnp.float32) + p["ca_bk"][...]
        v = jnp.dot(h2, p["ca_wv"][...],
                    preferred_element_type=jnp.float32) + p["ca_bv"][...]
        o = mha(q * scale, k, v, Tt, Ts, encdec_ok)
        y = jnp.dot(o.astype(jnp.bfloat16), p["ca_wo"][...],
                    preferred_element_type=jnp.float32) + p["ca_bo"][...]
        x = layer_norm(x + y, p["ln1_g"][...], p["ln1_b"][...])

        # ---------------- FFN (kernel_size=1 -> causal pad is identity) ----------------
        f = jnp.dot((x * xm).astype(jnp.bfloat16), p["ffn_w1"][...],
                    preferred_element_type=jnp.float32) + p["ffn_b1"][...]
        f = jnp.maximum(f, 0.0)
        f = jnp.dot((f * xm).astype(jnp.bfloat16), p["ffn_w2"][...],
                    preferred_element_type=jnp.float32) + p["ffn_b2"][...]
        f = f * xm
        x = layer_norm(x + f, p["ln2_g"][...], p["ln2_b"][...])

        out_ref[...] = x                               # carried to next layer (stays in VMEM)

        @pl.when(layer == n_layers - 1)
        def _finish():                                 # final x * x_mask, one writeback/chunk
            out_ref[...] = x * xm

    return kernel


def decoder_forward(x, x_mask, h, h_mask, layer_params, n_heads,
                    tie_self_kq=False, batch_chunk=None):
    """x: [B,Tt,C], x_mask: [B,Tt], h: [B,Ts,C], h_mask: [B,Ts] -> [B,Tt,C].

    tie_self_kq: set True only if conv_k weights are verifiably identical to
    conv_q (VITS proximal_init at initialization); skips the K projection and
    drops sa_wk/sa_bk from the per-layer weight DMA entirely.
    batch_chunk: rows per grid chunk; chunks form a 'parallel' grid axis
    (feeds both v7x TensorCores; plain loop on v5e/v6e).
    """
    B, Tt, C = x.shape
    _, Ts, _ = h.shape
    L = len(layer_params)
    if batch_chunk is None:
        batch_chunk = B
    assert B % batch_chunk == 0
    BC = batch_chunk
    n_chunks = B // BC

    x2d = x.astype(jnp.float32).reshape(B * Tt, C)
    xm2d = x_mask.astype(jnp.float32).reshape(B * Tt, 1)
    hm3 = h_mask.astype(jnp.float32).reshape(B, 1, Ts)
    h3 = h.astype(jnp.bfloat16)

    order = _param_order(tie_self_kq)
    # Stack per-layer params along a leading layer axis -> layer-indexed BlockSpecs.
    # Weight matrices are stored bf16 (MXU-native, half the DMA); biases / LN stay f32.
    stacked = []
    for kname in order:
        arr = jnp.stack([jnp.asarray(lp[kname]) for lp in layer_params], axis=0)
        arr = arr.astype(jnp.bfloat16 if kname in _W_KEYS else jnp.float32)
        stacked.append(arr)

    kernel = _make_decoder_kernel(BC, Tt, Ts, C, n_heads, tie_self_kq, order)

    def layer_spec(shape):                 # (L, a, b) -> layer-indexed, layer dim squeezed
        rest = tuple(int(s) for s in shape[1:])
        nz = len(rest)
        return pl.BlockSpec((pl.Squeezed(),) + rest,
                            lambda c, l, _n=nz: (l,) + (0,) * _n)

    in_specs = [
        pl.BlockSpec((BC * Tt, C), lambda c, l: (c, 0)),     # x (flat rows)
        pl.BlockSpec((BC, Ts, C), lambda c, l: (c, 0, 0)),   # h (encoder output)
        pl.BlockSpec((BC * Tt, 1), lambda c, l: (c, 0)),     # x_mask
        pl.BlockSpec((BC, 1, Ts), lambda c, l: (c, 0, 0)),   # h_mask
    ] + [layer_spec(s.shape) for s in stacked]

    out2d = pl.pallas_call(
        kernel,
        out_shape=jax.ShapeDtypeStruct((B * Tt, C), jnp.float32),
        grid_spec=pltpu.PrefetchScalarGridSpec(
            num_scalar_prefetch=0,
            grid=(n_chunks, L),                      # (batch chunks, layers)
            in_specs=in_specs,
            out_specs=pl.BlockSpec((BC * Tt, C), lambda c, l: (c, 0)),
            scratch_shapes=[
                pltpu.VMEM((Tt, Tt), jnp.float32),        # causal mask (built once/chunk)
                pltpu.VMEM((BC, Tt, Ts), jnp.float32),    # enc-dec mask (built once/chunk)
                pltpu.VMEM((BC * Tt, C), jnp.float32),    # per-layer attention context
            ],
        ),
        compiler_params=pltpu.CompilerParams(
            dimension_semantics=("parallel", "arbitrary")),
    )(x2d, h3, xm2d, hm3, *stacked)

    return out2d.reshape(B, Tt, C)


def init_decoder_params(key, hidden, filter_channels, n_layers, proximal_init=True):
    def xavier(k, fi, fo):
        lim = math.sqrt(6.0 / (fi + fo))
        return jax.random.uniform(k, (fi, fo), jnp.float32, -lim, lim)

    def conv_w(k, fi, fo):
        lim = 1.0 / math.sqrt(fi)
        return jax.random.uniform(k, (fi, fo), jnp.float32, -lim, lim)

    def conv_b(k, fi, n):
        lim = 1.0 / math.sqrt(fi)
        return jax.random.uniform(k, (1, n), jnp.float32, -lim, lim)

    layers = []
    for _ in range(n_layers):
        key, *ks = jax.random.split(key, 25)
        ks = iter(ks)
        p = {}
        # self-attention (proximal_init=True -> conv_k copies conv_q at init)
        p["sa_wq"] = xavier(next(ks), hidden, hidden)
        p["sa_bq"] = conv_b(next(ks), hidden, hidden)
        if proximal_init:
            p["sa_wk"], p["sa_bk"] = p["sa_wq"], p["sa_bq"]
            next(ks); next(ks)
        else:
            p["sa_wk"] = xavier(next(ks), hidden, hidden)
            p["sa_bk"] = conv_b(next(ks), hidden, hidden)
        p["sa_wv"] = xavier(next(ks), hidden, hidden)
        p["sa_bv"] = conv_b(next(ks), hidden, hidden)
        p["sa_wo"] = conv_w(next(ks), hidden, hidden)
        p["sa_bo"] = conv_b(next(ks), hidden, hidden)
        p["ln0_g"] = jnp.ones((1, hidden), jnp.float32)
        p["ln0_b"] = jnp.zeros((1, hidden), jnp.float32)
        # enc-dec attention
        p["ca_wq"] = xavier(next(ks), hidden, hidden)
        p["ca_bq"] = conv_b(next(ks), hidden, hidden)
        p["ca_wk"] = xavier(next(ks), hidden, hidden)
        p["ca_bk"] = conv_b(next(ks), hidden, hidden)
        p["ca_wv"] = xavier(next(ks), hidden, hidden)
        p["ca_bv"] = conv_b(next(ks), hidden, hidden)
        p["ca_wo"] = conv_w(next(ks), hidden, hidden)
        p["ca_bo"] = conv_b(next(ks), hidden, hidden)
        p["ln1_g"] = jnp.ones((1, hidden), jnp.float32)
        p["ln1_b"] = jnp.zeros((1, hidden), jnp.float32)
        # FFN (kernel_size = 1)
        p["ffn_w1"] = conv_w(next(ks), hidden, filter_channels)
        p["ffn_b1"] = conv_b(next(ks), hidden, filter_channels)
        p["ffn_w2"] = conv_w(next(ks), filter_channels, hidden)
        p["ffn_b2"] = conv_b(next(ks), filter_channels, hidden)
        p["ln2_g"] = jnp.ones((1, hidden), jnp.float32)
        p["ln2_b"] = jnp.zeros((1, hidden), jnp.float32)
        layers.append(p)
    return layers


if __name__ == "__main__":
    B, Tt, Ts = 4, 16, 12
    hidden, filt, n_heads, n_layers = 32, 64, 4, 2

    key = jax.random.PRNGKey(0)
    k1, k2, k3 = jax.random.split(key, 3)
    x = jax.random.normal(k1, (B, Tt, hidden), jnp.float32)   # decoder input (NTC)
    h = jax.random.normal(k2, (B, Ts, hidden), jnp.float32)   # encoder output (NTC)

    x_len = jnp.array([Tt, Tt - 4, Tt - 7, Tt])
    h_len = jnp.array([Ts, Ts - 3, Ts - 5, Ts - 1])
    x_mask = (jnp.arange(Tt)[None, :] < x_len[:, None]).astype(jnp.float32)
    h_mask = (jnp.arange(Ts)[None, :] < h_len[:, None]).astype(jnp.float32)

    params = init_decoder_params(k3, hidden, filt, n_layers, proximal_init=True)

    out = decoder_forward(
        x, x_mask, h, h_mask, params, n_heads,
        tie_self_kq=True,     # init above ties conv_k == conv_q (proximal_init)
        batch_chunk=2,        # 2 chunks -> 'parallel' axis feeds both v7x TensorCores
    )
    out = jax.block_until_ready(out)
    assert out.shape == (B, Tt, hidden)
    assert bool(jnp.all(jnp.isfinite(out)))
    print("KERNEL_OK")
</pallas_src>

<mosaic_0001>
module attributes {stable_mosaic.version = 11 : i64} {
  func.func @kernel(%arg0: i32, %arg1: i32, %arg2: memref<32x32xf32, #tpu.memory_space<vmem>>, %arg3: memref<2x12x32xbf16, #tpu.memory_space<vmem>>, %arg4: memref<32x1xf32, #tpu.memory_space<vmem>>, %arg5: memref<2x1x12xf32, #tpu.memory_space<vmem>>, %arg6: memref<1x32x32xbf16, #tpu.memory_space<vmem>>, %arg7: memref<1x1x32xf32, #tpu.memory_space<vmem>>, %arg8: memref<1x32x32xbf16, #tpu.memory_space<vmem>>, %arg9: memref<1x1x32xf32, #tpu.memory_space<vmem>>, %arg10: memref<1x32x32xbf16, #tpu.memory_space<vmem>>, %arg11: memref<1x1x32xf32, #tpu.memory_space<vmem>>, %arg12: memref<1x1x32xf32, #tpu.memory_space<vmem>>, %arg13: memref<1x1x32xf32, #tpu.memory_space<vmem>>, %arg14: memref<1x32x32xbf16, #tpu.memory_space<vmem>>, %arg15: memref<1x1x32xf32, #tpu.memory_space<vmem>>, %arg16: memref<1x32x32xbf16, #tpu.memory_space<vmem>>, %arg17: memref<1x1x32xf32, #tpu.memory_space<vmem>>, %arg18: memref<1x32x32xbf16, #tpu.memory_space<vmem>>, %arg19: memref<1x1x32xf32, #tpu.memory_space<vmem>>, %arg20: memref<1x32x32xbf16, #tpu.memory_space<vmem>>, %arg21: memref<1x1x32xf32, #tpu.memory_space<vmem>>, %arg22: memref<1x1x32xf32, #tpu.memory_space<vmem>>, %arg23: memref<1x1x32xf32, #tpu.memory_space<vmem>>, %arg24: memref<1x32x64xbf16, #tpu.memory_space<vmem>>, %arg25: memref<1x1x64xf32, #tpu.memory_space<vmem>>, %arg26: memref<1x64x32xbf16, #tpu.memory_space<vmem>>, %arg27: memref<1x1x32xf32, #tpu.memory_space<vmem>>, %arg28: memref<1x1x32xf32, #tpu.memory_space<vmem>>, %arg29: memref<1x1x32xf32, #tpu.memory_space<vmem>>, %arg30: memref<32x32xf32, #tpu.memory_space<vmem>>, %arg31: memref<16x16xf32, #tpu.memory_space<vmem>>, %arg32: memref<2x16x12xf32, #tpu.memory_space<vmem>>, %arg33: memref<32x32xf32, #tpu.memory_space<vmem>>) attributes {dimension_semantics = [#tpu.dimension_semantics<parallel>, #tpu.dimension_semantics<arbitrary>], iteration_bounds = array<i64: 2, 2>, scalar_prefetch = 0 : i64, scratch_operands = 3 : i64, tpu.core_type = #tpu.core_type<tc>, window_params = [{transform_indices = @transform_0, window_bounds = array<i64: 32, 32>}, {transform_indices = @transform_1, window_bounds = array<i64: 2, 12, 32>}, {transform_indices = @transform_2, window_bounds = array<i64: 32, 1>}, {transform_indices = @transform_3, window_bounds = array<i64: 2, 1, 12>}, {transform_indices = @transform_4, window_bounds = array<i64: 1, 32, 32>}, {transform_indices = @transform_5, window_bounds = array<i64: 1, 1, 32>}, {transform_indices = @transform_6, window_bounds = array<i64: 1, 32, 32>}, {transform_indices = @transform_7, window_bounds = array<i64: 1, 1, 32>}, {transform_indices = @transform_8, window_bounds = array<i64: 1, 32, 32>}, {transform_indices = @transform_9, window_bounds = array<i64: 1, 1, 32>}, {transform_indices = @transform_10, window_bounds = array<i64: 1, 1, 32>}, {transform_indices = @transform_11, window_bounds = array<i64: 1, 1, 32>}, {transform_indices = @transform_12, window_bounds = array<i64: 1, 32, 32>}, {transform_indices = @transform_13, window_bounds = array<i64: 1, 1, 32>}, {transform_indices = @transform_14, window_bounds = array<i64: 1, 32, 32>}, {transform_indices = @transform_15, window_bounds = array<i64: 1, 1, 32>}, {transform_indices = @transform_16, window_bounds = array<i64: 1, 32, 32>}, {transform_indices = @transform_17, window_bounds = array<i64: 1, 1, 32>}, {transform_indices = @transform_18, window_bounds = array<i64: 1, 32, 32>}, {transform_indices = @transform_19, window_bounds = array<i64: 1, 1, 32>}, {transform_indices = @transform_20, window_bounds = array<i64: 1, 1, 32>}, {transform_indices = @transform_21, window_bounds = array<i64: 1, 1, 32>}, {transform_indices = @transform_22, window_bounds = array<i64: 1, 32, 64>}, {transform_indices = @transform_23, window_bounds = array<i64: 1, 1, 64>}, {transform_indices = @transform_24, window_bounds = array<i64: 1, 64, 32>}, {transform_indices = @transform_25, window_bounds = array<i64: 1, 1, 32>}, {transform_indices = @transform_26, window_bounds = array<i64: 1, 1, 32>}, {transform_indices = @transform_27, window_bounds = array<i64: 1, 1, 32>}, {transform_indices = @transform_28, window_bounds = array<i64: 32, 32>}]} {
    %c0 = arith.constant 0 : index
    %c0_0 = arith.constant 0 : index
    %0 = vector.load %arg4[%c0, %c0_0] : memref<32x1xf32, #tpu.memory_space<vmem>>, vector<32x1xf32>
    %c0_i32 = arith.constant 0 : i32
    %1 = arith.cmpi eq, %arg1, %c0_i32 : i32
    %2 = arith.extui %1 : i1 to i32
    %c0_i32_1 = arith.constant 0 : i32
    %3 = arith.cmpi ne, %2, %c0_i32_1 : i32
    scf.if %3 {
      %c0_172 = arith.constant 0 : index
      %c0_173 = arith.constant 0 : index
      %398 = vector.load %arg2[%c0_172, %c0_173] : memref<32x32xf32, #tpu.memory_space<vmem>>, vector<32x32xf32>
      %399 = vector.broadcast %0 : vector<32x1xf32> to vector<32x32xf32>
      %400 = arith.mulf %398, %399 : vector<32x32xf32>
      %c0_174 = arith.constant 0 : index
      %c0_175 = arith.constant 0 : index
      %401 = vector.load %arg30[%c0_174, %c0_175] : memref<32x32xf32, #tpu.memory_space<vmem>>, vector<32x32xf32>
      tpu.vector_store %arg30[%c0_174, %c0_175], %400 {strides = array<i32>} : memref<32x32xf32, #tpu.memory_space<vmem>>, vector<32x32xf32>,
      %402 = tpu.iota {dimensions = array<i32: 0>} : vector<16x16xi32>
      %403 = tpu.iota {dimensions = array<i32: 1>} : vector<16x16xi32>
      %404 = arith.cmpi sge, %402, %403 : vector<16x16xi32>
      %405 = arith.extui %404 : vector<16x16xi1> to vector<16x16xi32>
      %406 = arith.sitofp %405 : vector<16x16xi32> to vector<16x16xf32>
      %c0_176 = arith.constant 0 : index
      %c0_177 = arith.constant 0 : index
      %407 = vector.load %arg31[%c0_176, %c0_177] : memref<16x16xf32, #tpu.memory_space<vmem>>, vector<16x16xf32>
      tpu.vector_store %arg31[%c0_176, %c0_177], %406 {strides = array<i32>} : memref<16x16xf32, #tpu.memory_space<vmem>>, vector<16x16xf32>,
      %408 = vector.shape_cast %0 : vector<32x1xf32> to vector<2x16x1xf32>
      %c0_178 = arith.constant 0 : index
      %c0_179 = arith.constant 0 : index
      %c0_180 = arith.constant 0 : index
      %409 = vector.load %arg5[%c0_178, %c0_179, %c0_180] : memref<2x1x12xf32, #tpu.memory_space<vmem>>, vector<2x1x12xf32>
      %410 = vector.broadcast %408 : vector<2x16x1xf32> to vector<2x16x12xf32>
      %411 = vector.broadcast %409 : vector<2x1x12xf32> to vector<2x16x12xf32>
      %412 = arith.mulf %410, %411 : vector<2x16x12xf32>
      %c0_181 = arith.constant 0 : index
      %c0_182 = arith.constant 0 : index
      %c0_183 = arith.constant 0 : index
      %413 = vector.load %arg32[%c0_181, %c0_182, %c0_183] : memref<2x16x12xf32, #tpu.memory_space<vmem>>, vector<2x16x12xf32>
      tpu.vector_store %arg32[%c0_181, %c0_182, %c0_183], %412 {strides = array<i32>} : memref<2x16x12xf32, #tpu.memory_space<vmem>>, vector<2x16x12xf32>,
    } else {
    }
    %c0_2 = arith.constant 0 : index
    %c0_3 = arith.constant 0 : index
    %4 = vector.load %arg30[%c0_2, %c0_3] : memref<32x32xf32, #tpu.memory_space<vmem>>, vector<32x32xf32>
    %c0_4 = arith.constant 0 : index
    %c0_5 = arith.constant 0 : index
    %5 = vector.load %arg31[%c0_4, %c0_5] : memref<16x16xf32, #tpu.memory_space<vmem>>, vector<16x16xf32>
    %cst = arith.constant 5.000000e-01 : f32
    %6 = vector.broadcast %cst : f32 to vector<16x16xf32>
    %7 = arith.cmpf ogt, %5, %6 : vector<16x16xf32>
    %c0_6 = arith.constant 0 : index
    %c0_7 = arith.constant 0 : index
    %c0_8 = arith.constant 0 : index
    %8 = vector.load %arg32[%c0_6, %c0_7, %c0_8] : memref<2x16x12xf32, #tpu.memory_space<vmem>>, vector<2x16x12xf32>
    %cst_9 = arith.constant 5.000000e-01 : f32
    %9 = vector.broadcast %cst_9 : f32 to vector<2x16x12xf32>
    %10 = arith.cmpf ogt, %8, %9 : vector<2x16x12xf32>
    %11 = arith.truncf %4 : vector<32x32xf32> to vector<32x32xbf16>
    %c0_10 = arith.constant 0 : index
    %c0_11 = arith.constant 0 : index
    %c0_12 = arith.constant 0 : index
    %12 = vector.load %arg6[%c0_10, %c0_11, %c0_12] : memref<1x32x32xbf16, #tpu.memory_space<vmem>>, vector<1x32x32xbf16>
    %13 = vector.shape_cast %12 : vector<1x32x32xbf16> to vector<32x32xbf16>
    %cst_13 = arith.constant dense<0.000000e+00> : vector<32x32xf32>
    %14 = tpu.matmul %11, %13, %cst_13 {dimension_numbers = #tpu.dot_dimension_numbers<[1], [0], [0], [1], [0, 0, 1, 1], [], []>} : vector<32x32xbf16>, vector<32x32xbf16>, vector<32x32xf32> -> vector<32x32xf32>
    %c0_14 = arith.constant 0 : index
    %c0_15 = arith.constant 0 : index
    %c0_16 = arith.constant 0 : index
    %15 = vector.load %arg7[%c0_14, %c0_15, %c0_16] : memref<1x1x32xf32, #tpu.memory_space<vmem>>, vector<1x1x32xf32>
    %16 = vector.shape_cast %15 : vector<1x1x32xf32> to vector<1x32xf32>
    %17 = vector.broadcast %16 : vector<1x32xf32> to vector<32x32xf32>
    %18 = arith.addf %14, %17 : vector<32x32xf32>
    %c0_17 = arith.constant 0 : index
    %c0_18 = arith.constant 0 : index
    %c0_19 = arith.constant 0 : index
    %19 = vector.load %arg8[%c0_17, %c0_18, %c0_19] : memref<1x32x32xbf16, #tpu.memory_space<vmem>>, vector<1x32x32xbf16>
    %20 = vector.shape_cast %19 : vector<1x32x32xbf16> to vector<32x32xbf16>
    %cst_20 = arith.constant dense<0.000000e+00> : vector<32x32xf32>
    %21 = tpu.matmul %11, %20, %cst_20 {dimension_numbers = #tpu.dot_dimension_numbers<[1], [0], [0], [1], [0, 0, 1, 1], [], []>} : vector<32x32xbf16>, vector<32x32xbf16>, vector<32x32xf32> -> vector<32x32xf32>
    %c0_21 = arith.constant 0 : index
    %c0_22 = arith.constant 0 : index
    %c0_23 = arith.constant 0 : index
    %22 = vector.load %arg9[%c0_21, %c0_22, %c0_23] : memref<1x1x32xf32, #tpu.memory_space<vmem>>, vector<1x1x32xf32>
    %23 = vector.shape_cast %22 : vector<1x1x32xf32> to vector<1x32xf32>
    %24 = vector.broadcast %23 : vector<1x32xf32> to vector<32x32xf32>
    %25 = arith.addf %21, %24 : vector<32x32xf32>
    %cst_24 = arith.constant 0.353553385 : f32
    %26 = vector.broadcast %cst_24 : f32 to vector<32x32xf32>
    %27 = arith.mulf %18, %26 : vector<32x32xf32>
    %28 = vector.shape_cast %7 : vector<16x16xi1> to vector<1x16x16xi1>
    %29 = vector.extract_strided_slice %27 {offsets = [0, 0], sizes = [32, 8], strides = [1, 1]} : vector<32x32xf32> to vector<32x8xf32>
    %30 = vector.shape_cast %29 : vector<32x8xf32> to vector<2x16x8xf32>
    %31 = arith.truncf %30 : vector<2x16x8xf32> to vector<2x16x8xbf16>
    %32 = vector.extract_strided_slice %18 {offsets = [0, 0], sizes = [32, 8], strides = [1, 1]} : vector<32x32xf32> to vector<32x8xf32>
    %33 = vector.shape_cast %32 : vector<32x8xf32> to vector<2x16x8xf32>
    %34 = arith.truncf %33 : vector<2x16x8xf32> to vector<2x16x8xbf16>
    %35 = vector.extract_strided_slice %25 {offsets = [0, 0], sizes = [32, 8], strides = [1, 1]} : vector<32x32xf32> to vector<32x8xf32>
    %36 = vector.shape_cast %35 : vector<32x8xf32> to vector<2x16x8xf32>
    %37 = arith.truncf %36 : vector<2x16x8xf32> to vector<2x16x8xbf16>
    "tpu.trace_start"() <{level = 10 : i32, message = "btd,bsd->bts"}> : () -> ()
    %cst_25 = arith.constant dense<0.000000e+00> : vector<2x16x16xf32>
    %38 = tpu.matmul %31, %34, %cst_25 {dimension_numbers = #tpu.dot_dimension_numbers<[2], [2], [1], [1], [0, 0, 0, 1, 1, 1], [0], [0]>} : vector<2x16x8xbf16>, vector<2x16x8xbf16>, vector<2x16x16xf32> -> vector<2x16x16xf32>
    %cst_26 = arith.constant -1.000000e+04 : f32
    "tpu.trace_stop"() : () -> ()
    %39 = vector.shape_cast %28 : vector<1x16x16xi1> to vector<1x16x16xi1>
    %40 = vector.broadcast %39 : vector<1x16x16xi1> to vector<2x16x16xi1>
    %41 = vector.broadcast %cst_26 : f32 to vector<2x16x16xf32>
    %42 = arith.select %40, %38, %41 : vector<2x16x16xi1>, vector<2x16x16xf32>
    %cst_27 = arith.constant dense<0xFF800000> : vector<2x16xf32>
    %43 = vector.multi_reduction <maximumf>, %42, %cst_27 [2] : vector<2x16x16xf32> to vector<2x16xf32>
    %44 = vector.shape_cast %43 : vector<2x16xf32> to vector<2x16x1xf32>
    %45 = vector.broadcast %44 : vector<2x16x1xf32> to vector<2x16x16xf32>
    %46 = arith.subf %42, %45 : vector<2x16x16xf32>
    %47 = math.exp %46 : vector<2x16x16xf32>
    %cst_28 = arith.constant dense<0.000000e+00> : vector<2x16xf32>
    %48 = vector.multi_reduction <add>, %47, %cst_28 [2] : vector<2x16x16xf32> to vector<2x16xf32>
    %49 = vector.shape_cast %48 : vector<2x16xf32> to vector<2x16x1xf32>
    %50 = tpu.reciprocal %49 {approx = true} : vector<2x16x1xf32> -> vector<2x16x1xf32>
    %51 = vector.broadcast %50 : vector<2x16x1xf32> to vector<2x16x16xf32>
    %52 = arith.mulf %47, %51 : vector<2x16x16xf32>
    %53 = arith.truncf %52 : vector<2x16x16xf32> to vector<2x16x16xbf16>
    "tpu.trace_start"() <{level = 10 : i32, message = "bts,bsd->btd"}> : () -> ()
    %cst_29 = arith.constant dense<0.000000e+00> : vector<2x16x8xf32>
    %54 = tpu.matmul %53, %37, %cst_29 {dimension_numbers = #tpu.dot_dimension_numbers<[2], [1], [1], [2], [0, 0, 0, 1, 1, 2], [0], [0]>} : vector<2x16x16xbf16>, vector<2x16x8xbf16>, vector<2x16x8xf32> -> vector<2x16x8xf32>
    "tpu.trace_stop"() : () -> ()
    %55 = vector.shape_cast %54 : vector<2x16x8xf32> to vector<32x8xf32>
    %c0_30 = arith.constant 0 : index
    %c0_31 = arith.constant 0 : index
    %56 = vector.load %arg33[%c0_30, %c0_31] : memref<32x32xf32, #tpu.memory_space<vmem>>, vector<32x8xf32>
    tpu.vector_store %arg33[%c0_30, %c0_31], %55 {strides = array<i32>} : memref<32x32xf32, #tpu.memory_space<vmem>>, vector<32x8xf32>,
    %57 = vector.extract_strided_slice %27 {offsets = [0, 8], sizes = [32, 8], strides = [1, 1]} : vector<32x32xf32> to vector<32x8xf32>
    %58 = vector.shape_cast %57 : vector<32x8xf32> to vector<2x16x8xf32>
    %59 = arith.truncf %58 : vector<2x16x8xf32> to vector<2x16x8xbf16>
    %60 = vector.extract_strided_slice %18 {offsets = [0, 8], sizes = [32, 8], strides = [1, 1]} : vector<32x32xf32> to vector<32x8xf32>
    %61 = vector.shape_cast %60 : vector<32x8xf32> to vector<2x16x8xf32>
    %62 = arith.truncf %61 : vector<2x16x8xf32> to vector<2x16x8xbf16>
    %63 = vector.extract_strided_slice %25 {offsets = [0, 8], sizes = [32, 8], strides = [1, 1]} : vector<32x32xf32> to vector<32x8xf32>
    %64 = vector.shape_cast %63 : vector<32x8xf32> to vector<2x16x8xf32>
    %65 = arith.truncf %64 : vector<2x16x8xf32> to vector<2x16x8xbf16>
    "tpu.trace_start"() <{level = 10 : i32, message = "btd,bsd->bts"}> : () -> ()
    %cst_32 = arith.constant dense<0.000000e+00> : vector<2x16x16xf32>
    %66 = tpu.matmul %59, %62, %cst_32 {dimension_numbers = #tpu.dot_dimension_numbers<[2], [2], [1], [1], [0, 0, 0, 1, 1, 1], [0], [0]>} : vector<2x16x8xbf16>, vector<2x16x8xbf16>, vector<2x16x16xf32> -> vector<2x16x16xf32>
    %cst_33 = arith.constant -1.000000e+04 : f32
    "tpu.trace_stop"() : () -> ()
    %67 = vector.shape_cast %28 : vector<1x16x16xi1> to vector<1x16x16xi1>
    %68 = vector.broadcast %67 : vector<1x16x16xi1> to vector<2x16x16xi1>
    %69 = vector.broadcast %cst_33 : f32 to vector<2x16x16xf32>
    %70 = arith.select %68, %66, %69 : vector<2x16x16xi1>, vector<2x16x16xf32>
    %cst_34 = arith.constant dense<0xFF800000> : vector<2x16xf32>
    %71 = vector.multi_reduction <maximumf>, %70, %cst_34 [2] : vector<2x16x16xf32> to vector<2x16xf32>
    %72 = vector.shape_cast %71 : vector<2x16xf32> to vector<2x16x1xf32>
    %73 = vector.broadcast %72 : vector<2x16x1xf32> to vector<2x16x16xf32>
    %74 = arith.subf %70, %73 : vector<2x16x16xf32>
    %75 = math.exp %74 : vector<2x16x16xf32>
    %cst_35 = arith.constant dense<0.000000e+00> : vector<2x16xf32>
    %76 = vector.multi_reduction <add>, %75, %cst_35 [2] : vector<2x16x16xf32> to vector<2x16xf32>
    %77 = vector.shape_cast %76 : vector<2x16xf32> to vector<2x16x1xf32>
    %78 = tpu.reciprocal %77 {approx = true} : vector<2x16x1xf32> -> vector<2x16x1xf32>
    %79 = vector.broadcast %78 : vector<2x16x1xf32> to vector<2x16x16xf32>
    %80 = arith.mulf %75, %79 : vector<2x16x16xf32>
    %81 = arith.truncf %80 : vector<2x16x16xf32> to vector<2x16x16xbf16>
    "tpu.trace_start"() <{level = 10 : i32, message = "bts,bsd->btd"}> : () -> ()
    %cst_36 = arith.constant dense<0.000000e+00> : vector<2x16x8xf32>
    %82 = tpu.matmul %81, %65, %cst_36 {dimension_numbers = #tpu.dot_dimension_numbers<[2], [1], [1], [2], [0, 0, 0, 1, 1, 2], [0], [0]>} : vector<2x16x16xbf16>, vector<2x16x8xbf16>, vector<2x16x8xf32> -> vector<2x16x8xf32>
    "tpu.trace_stop"() : () -> ()
    %83 = vector.shape_cast %82 : vector<2x16x8xf32> to vector<32x8xf32>
    %c0_37 = arith.constant 0 : index
    %c8 = arith.constant 8 : index
    %84 = vector.load %arg33[%c0_37, %c8] : memref<32x32xf32, #tpu.memory_space<vmem>>, vector<32x8xf32>
    tpu.vector_store %arg33[%c0_37, %c8], %83 {strides = array<i32>} : memref<32x32xf32, #tpu.memory_space<vmem>>, vector<32x8xf32>,
    %85 = vector.extract_strided_slice %27 {offsets = [0, 16], sizes = [32, 8], strides = [1, 1]} : vector<32x32xf32> to vector<32x8xf32>
    %86 = vector.shape_cast %85 : vector<32x8xf32> to vector<2x16x8xf32>
    %87 = arith.truncf %86 : vector<2x16x8xf32> to vector<2x16x8xbf16>
    %88 = vector.extract_strided_slice %18 {offsets = [0, 16], sizes = [32, 8], strides = [1, 1]} : vector<32x32xf32> to vector<32x8xf32>
    %89 = vector.shape_cast %88 : vector<32x8xf32> to vector<2x16x8xf32>
    %90 = arith.truncf %89 : vector<2x16x8xf32> to vector<2x16x8xbf16>
    %91 = vector.extract_strided_slice %25 {offsets = [0, 16], sizes = [32, 8], strides = [1, 1]} : vector<32x32xf32> to vector<32x8xf32>
    %92 = vector.shape_cast %91 : vector<32x8xf32> to vector<2x16x8xf32>
    %93 = arith.truncf %92 : vector<2x16x8xf32> to vector<2x16x8xbf16>
    "tpu.trace_start"() <{level = 10 : i32, message = "btd,bsd->bts"}> : () -> ()
    %cst_38 = arith.constant dense<0.000000e+00> : vector<2x16x16xf32>
    %94 = tpu.matmul %87, %90, %cst_38 {dimension_numbers = #tpu.dot_dimension_numbers<[2], [2], [1], [1], [0, 0, 0, 1, 1, 1], [0], [0]>} : vector<2x16x8xbf16>, vector<2x16x8xbf16>, vector<2x16x16xf32> -> vector<2x16x16xf32>
    %cst_39 = arith.constant -1.000000e+04 : f32
    "tpu.trace_stop"() : () -> ()
    %95 = vector.shape_cast %28 : vector<1x16x16xi1> to vector<1x16x16xi1>
    %96 = vector.broadcast %95 : vector<1x16x16xi1> to vector<2x16x16xi1>
    %97 = vector.broadcast %cst_39 : f32 to vector<2x16x16xf32>
    %98 = arith.select %96, %94, %97 : vector<2x16x16xi1>, vector<2x16x16xf32>
    %cst_40 = arith.constant dense<0xFF800000> : vector<2x16xf32>
    %99 = vector.multi_reduction <maximumf>, %98, %cst_40 [2] : vector<2x16x16xf32> to vector<2x16xf32>
    %100 = vector.shape_cast %99 : vector<2x16xf32> to vector<2x16x1xf32>
    %101 = vector.broadcast %100 : vector<2x16x1xf32> to vector<2x16x16xf32>
    %102 = arith.subf %98, %101 : vector<2x16x16xf32>
    %103 = math.exp %102 : vector<2x16x16xf32>
    %cst_41 = arith.constant dense<0.000000e+00> : vector<2x16xf32>
    %104 = vector.multi_reduction <add>, %103, %cst_41 [2] : vector<2x16x16xf32> to vector<2x16xf32>
    %105 = vector.shape_cast %104 : vector<2x16xf32> to vector<2x16x1xf32>
    %106 = tpu.reciprocal %105 {approx = true} : vector<2x16x1xf32> -> vector<2x16x1xf32>
    %107 = vector.broadcast %106 : vector<2x16x1xf32> to vector<2x16x16xf32>
    %108 = arith.mulf %103, %107 : vector<2x16x16xf32>
    %109 = arith.truncf %108 : vector<2x16x16xf32> to vector<2x16x16xbf16>
    "tpu.trace_start"() <{level = 10 : i32, message = "bts,bsd->btd"}> : () -> ()
    %cst_42 = arith.constant dense<0.000000e+00> : vector<2x16x8xf32>
    %110 = tpu.matmul %109, %93, %cst_42 {dimension_numbers = #tpu.dot_dimension_numbers<[2], [1], [1], [2], [0, 0, 0, 1, 1, 2], [0], [0]>} : vector<2x16x16xbf16>, vector<2x16x8xbf16>, vector<2x16x8xf32> -> vector<2x16x8xf32>
    "tpu.trace_stop"() : () -> ()
    %111 = vector.shape_cast %110 : vector<2x16x8xf32> to vector<32x8xf32>
    %c0_43 = arith.constant 0 : index
    %c16 = arith.constant 16 : index
    %112 = vector.load %arg33[%c0_43, %c16] : memref<32x32xf32, #tpu.memory_space<vmem>>, vector<32x8xf32>
    tpu.vector_store %arg33[%c0_43, %c16], %111 {strides = array<i32>} : memref<32x32xf32, #tpu.memory_space<vmem>>, vector<32x8xf32>,
    %113 = vector.extract_strided_slice %27 {offsets = [0, 24], sizes = [32, 8], strides = [1, 1]} : vector<32x32xf32> to vector<32x8xf32>
    %114 = vector.shape_cast %113 : vector<32x8xf32> to vector<2x16x8xf32>
    %115 = arith.truncf %114 : vector<2x16x8xf32> to vector<2x16x8xbf16>
    %116 = vector.extract_strided_slice %18 {offsets = [0, 24], sizes = [32, 8], strides = [1, 1]} : vector<32x32xf32> to vector<32x8xf32>
    %117 = vector.shape_cast %116 : vector<32x8xf32> to vector<2x16x8xf32>
    %118 = arith.truncf %117 : vector<2x16x8xf32> to vector<2x16x8xbf16>
    %119 = vector.extract_strided_slice %25 {offsets = [0, 24], sizes = [32, 8], strides = [1, 1]} : vector<32x32xf32> to vector<32x8xf32>
    %120 = vector.shape_cast %119 : vector<32x8xf32> to vector<2x16x8xf32>
    %121 = arith.truncf %120 : vector<2x16x8xf32> to vector<2x16x8xbf16>
    "tpu.trace_start"() <{level = 10 : i32, message = "btd,bsd->bts"}> : () -> ()
    %cst_44 = arith.constant dense<0.000000e+00> : vector<2x16x16xf32>
    %122 = tpu.matmul %115, %118, %cst_44 {dimension_numbers = #tpu.dot_dimension_numbers<[2], [2], [1], [1], [0, 0, 0, 1, 1, 1], [0], [0]>} : vector<2x16x8xbf16>, vector<2x16x8xbf16>, vector<2x16x16xf32> -> vector<2x16x16xf32>
    %cst_45 = arith.constant -1.000000e+04 : f32
    "tpu.trace_stop"() : () -> ()
    %123 = vector.shape_cast %28 : vector<1x16x16xi1> to vector<1x16x16xi1>
    %124 = vector.broadcast %123 : vector<1x16x16xi1> to vector<2x16x16xi1>
    %125 = vector.broadcast %cst_45 : f32 to vector<2x16x16xf32>
    %126 = arith.select %124, %122, %125 : vector<2x16x16xi1>, vector<2x16x16xf32>
    %cst_46 = arith.constant dense<0xFF800000> : vector<2x16xf32>
    %127 = vector.multi_reduction <maximumf>, %126, %cst_46 [2] : vector<2x16x16xf32> to vector<2x16xf32>
    %128 = vector.shape_cast %127 : vector<2x16xf32> to vector<2x16x1xf32>
    %129 = vector.broadcast %128 : vector<2x16x1xf32> to vector<2x16x16xf32>
    %130 = arith.subf %126, %129 : vector<2x16x16xf32>
    %131 = math.exp %130 : vector<2x16x16xf32>
    %cst_47 = arith.constant dense<0.000000e+00> : vector<2x16xf32>
    %132 = vector.multi_reduction <add>, %131, %cst_47 [2] : vector<2x16x16xf32> to vector<2x16xf32>
    %133 = vector.shape_cast %132 : vector<2x16xf32> to vector<2x16x1xf32>
    %134 = tpu.reciprocal %133 {approx = true} : vector<2x16x1xf32> -> vector<2x16x1xf32>
    %135 = vector.broadcast %134 : vector<2x16x1xf32> to vector<2x16x16xf32>
    %136 = arith.mulf %131, %135 : vector<2x16x16xf32>
    %137 = arith.truncf %136 : vector<2x16x16xf32> to vector<2x16x16xbf16>
    "tpu.trace_start"() <{level = 10 : i32, message = "bts,bsd->btd"}> : () -> ()
    %cst_48 = arith.constant dense<0.000000e+00> : vector<2x16x8xf32>
    %138 = tpu.matmul %137, %121, %cst_48 {dimension_numbers = #tpu.dot_dimension_numbers<[2], [1], [1], [2], [0, 0, 0, 1, 1, 2], [0], [0]>} : vector<2x16x16xbf16>, vector<2x16x8xbf16>, vector<2x16x8xf32> -> vector<2x16x8xf32>
    "tpu.trace_stop"() : () -> ()
    %139 = vector.shape_cast %138 : vector<2x16x8xf32> to vector<32x8xf32>
    %c0_49 = arith.constant 0 : index
    %c24 = arith.constant 24 : index
    %140 = vector.load %arg33[%c0_49, %c24] : memref<32x32xf32, #tpu.memory_space<vmem>>, vector<32x8xf32>
    tpu.vector_store %arg33[%c0_49, %c24], %139 {strides = array<i32>} : memref<32x32xf32, #tpu.memory_space<vmem>>, vector<32x8xf32>,
    %c0_50 = arith.constant 0 : index
    %c0_51 = arith.constant 0 : index
    %141 = vector.load %arg33[%c0_50, %c0_51] : memref<32x32xf32, #tpu.memory_space<vmem>>, vector<32x32xf32>
    %142 = arith.truncf %141 : vector<32x32xf32> to vector<32x32xbf16>
    %c0_52 = arith.constant 0 : index
    %c0_53 = arith.constant 0 : index
    %c0_54 = arith.constant 0 : index
    %143 = vector.load %arg10[%c0_52, %c0_53, %c0_54] : memref<1x32x32xbf16, #tpu.memory_space<vmem>>, vector<1x32x32xbf16>
    %144 = vector.shape_cast %143 : vector<1x32x32xbf16> to vector<32x32xbf16>
    %cst_55 = arith.constant dense<0.000000e+00> : vector<32x32xf32>
    %145 = tpu.matmul %142, %144, %cst_55 {dimension_numbers = #tpu.dot_dimension_numbers<[1], [0], [0], [1], [0, 0, 1, 1], [], []>} : vector<32x32xbf16>, vector<32x32xbf16>, vector<32x32xf32> -> vector<32x32xf32>
    %c0_56 = arith.constant 0 : index
    %c0_57 = arith.constant 0 : index
    %c0_58 = arith.constant 0 : index
    %146 = vector.load %arg11[%c0_56, %c0_57, %c0_58] : memref<1x1x32xf32, #tpu.memory_space<vmem>>, vector<1x1x32xf32>
    %147 = vector.shape_cast %146 : vector<1x1x32xf32> to vector<1x32xf32>
    %148 = vector.broadcast %147 : vector<1x32xf32> to vector<32x32xf32>
    %149 = arith.addf %145, %148 : vector<32x32xf32>
    %150 = arith.addf %4, %149 : vector<32x32xf32>
    %c0_59 = arith.constant 0 : index
    %c0_60 = arith.constant 0 : index
    %c0_61 = arith.constant 0 : index
    %151 = vector.load %arg12[%c0_59, %c0_60, %c0_61] : memref<1x1x32xf32, #tpu.memory_space<vmem>>, vector<1x1x32xf32>
    %152 = vector.shape_cast %151 : vector<1x1x32xf32> to vector<1x32xf32>
    %c0_62 = arith.constant 0 : index
    %c0_63 = arith.constant 0 : index
    %c0_64 = arith.constant 0 : index
    %153 = vector.load %arg13[%c0_62, %c0_63, %c0_64] : memref<1x1x32xf32, #tpu.memory_space<vmem>>, vector<1x1x32xf32>
    %154 = vector.shape_cast %153 : vector<1x1x32xf32> to vector<1x32xf32>
    %cst_65 = arith.constant dense<0.000000e+00> : vector<32xf32>
    %155 = vector.multi_reduction <add>, %150, %cst_65 [1] : vector<32x32xf32> to vector<32xf32>
    %156 = vector.shape_cast %155 : vector<32xf32> to vector<32x1xf32>
    %cst_66 = arith.constant 3.200000e+01 : f32
    %157 = vector.broadcast %cst_66 : f32 to vector<32x1xf32>
    %158 = arith.divf %156, %157 : vector<32x1xf32>
    %159 = vector.broadcast %158 : vector<32x1xf32> to vector<32x32xf32>
    %160 = arith.subf %150, %159 : vector<32x32xf32>
    %161 = arith.mulf %160, %160 : vector<32x32xf32>
    %cst_67 = arith.constant dense<0.000000e+00> : vector<32xf32>
    %162 = vector.multi_reduction <add>, %161, %cst_67 [1] : vector<32x32xf32> to vector<32xf32>
    %163 = vector.shape_cast %162 : vector<32xf32> to vector<32x1xf32>
    %cst_68 = arith.constant 3.200000e+01 : f32
    %164 = vector.broadcast %cst_68 : f32 to vector<32x1xf32>
    %165 = arith.divf %163, %164 : vector<32x1xf32>
    %166 = vector.broadcast %158 : vector<32x1xf32> to vector<32x32xf32>
    %167 = arith.subf %150, %166 : vector<32x32xf32>
    %cst_69 = arith.constant 9.99999974E-6 : f32
    %168 = vector.broadcast %cst_69 : f32 to vector<32x1xf32>
    %169 = arith.addf %165, %168 : vector<32x1xf32>
    %170 = math.rsqrt %169 : vector<32x1xf32>
    %171 = vector.broadcast %170 : vector<32x1xf32> to vector<32x32xf32>
    %172 = arith.mulf %167, %171 : vector<32x32xf32>
    %173 = vector.broadcast %152 : vector<1x32xf32> to vector<32x32xf32>
    %174 = arith.mulf %172, %173 : vector<32x32xf32>
    %175 = vector.broadcast %154 : vector<1x32xf32> to vector<32x32xf32>
    %176 = arith.addf %174, %175 : vector<32x32xf32>
    %177 = arith.truncf %176 : vector<32x32xf32> to vector<32x32xbf16>
    %c0_70 = arith.constant 0 : index
    %c0_71 = arith.constant 0 : index
    %c0_72 = arith.constant 0 : index
    %178 = vector.load %arg3[%c0_70, %c0_71, %c0_72] : memref<2x12x32xbf16, #tpu.memory_space<vmem>>, vector<2x12x32xbf16>
    %179 = vector.shape_cast %178 : vector<2x12x32xbf16> to vector<24x32xbf16>
    %c0_73 = arith.constant 0 : index
    %c0_74 = arith.constant 0 : index
    %c0_75 = arith.constant 0 : index
    %180 = vector.load %arg14[%c0_73, %c0_74, %c0_75] : memref<1x32x32xbf16, #tpu.memory_space<vmem>>, vector<1x32x32xbf16>
    %181 = vector.shape_cast %180 : vector<1x32x32xbf16> to vector<32x32xbf16>
    %cst_76 = arith.constant dense<0.000000e+00> : vector<32x32xf32>
    %182 = tpu.matmul %177, %181, %cst_76 {dimension_numbers = #tpu.dot_dimension_numbers<[1], [0], [0], [1], [0, 0, 1, 1], [], []>} : vector<32x32xbf16>, vector<32x32xbf16>, vector<32x32xf32> -> vector<32x32xf32>
    %c0_77 = arith.constant 0 : index
    %c0_78 = arith.constant 0 : index
    %c0_79 = arith.constant 0 : index
    %183 = vector.load %arg15[%c0_77, %c0_78, %c0_79] : memref<1x1x32xf32, #tpu.memory_space<vmem>>, vector<1x1x32xf32>
    %184 = vector.shape_cast %183 : vector<1x1x32xf32> to vector<1x32xf32>
    %185 = vector.broadcast %184 : vector<1x32xf32> to vector<32x32xf32>
    %186 = arith.addf %182, %185 : vector<32x32xf32>
    %c0_80 = arith.constant 0 : index
    %c0_81 = arith.constant 0 : index
    %c0_82 = arith.constant 0 : index
    %187 = vector.load %arg16[%c0_80, %c0_81, %c0_82] : memref<1x32x32xbf16, #tpu.memory_space<vmem>>, vector<1x32x32xbf16>
    %188 = vector.shape_cast %187 : vector<1x32x32xbf16> to vector<32x32xbf16>
    %cst_83 = arith.constant dense<0.000000e+00> : vector<24x32xf32>
    %189 = tpu.matmul %179, %188, %cst_83 {dimension_numbers = #tpu.dot_dimension_numbers<[1], [0], [0], [1], [0, 0, 1, 1], [], []>} : vector<24x32xbf16>, vector<32x32xbf16>, vector<24x32xf32> -> vector<24x32xf32>
    %c0_84 = arith.constant 0 : index
    %c0_85 = arith.constant 0 : index
    %c0_86 = arith.constant 0 : index
    %190 = vector.load %arg17[%c0_84, %c0_85, %c0_86] : memref<1x1x32xf32, #tpu.memory_space<vmem>>, vector<1x1x32xf32>
    %191 = vector.shape_cast %190 : vector<1x1x32xf32> to vector<1x32xf32>
    %192 = vector.broadcast %191 : vector<1x32xf32> to vector<24x32xf32>
    %193 = arith.addf %189, %192 : vector<24x32xf32>
    %c0_87 = arith.constant 0 : index
    %c0_88 = arith.constant 0 : index
    %c0_89 = arith.constant 0 : index
    %194 = vector.load %arg18[%c0_87, %c0_88, %c0_89] : memref<1x32x32xbf16, #tpu.memory_space<vmem>>, vector<1x32x32xbf16>
    %195 = vector.shape_cast %194 : vector<1x32x32xbf16> to vector<32x32xbf16>
    %cst_90 = arith.constant dense<0.000000e+00> : vector<24x32xf32>
    %196 = tpu.matmul %179, %195, %cst_90 {dimension_numbers = #tpu.dot_dimension_numbers<[1], [0], [0], [1], [0, 0, 1, 1], [], []>} : vector<24x32xbf16>, vector<32x32xbf16>, vector<24x32xf32> -> vector<24x32xf32>
    %c0_91 = arith.constant 0 : index
    %c0_92 = arith.constant 0 : index
    %c0_93 = arith.constant 0 : index
    %197 = vector.load %arg19[%c0_91, %c0_92, %c0_93] : memref<1x1x32xf32, #tpu.memory_space<vmem>>, vector<1x1x32xf32>
    %198 = vector.shape_cast %197 : vector<1x1x32xf32> to vector<1x32xf32>
    %199 = vector.broadcast %198 : vector<1x32xf32> to vector<24x32xf32>
    %200 = arith.addf %196, %199 : vector<24x32xf32>
    %cst_94 = arith.constant 0.353553385 : f32
    %201 = vector.broadcast %cst_94 : f32 to vector<32x32xf32>
    %202 = arith.mulf %186, %201 : vector<32x32xf32>
    %203 = vector.extract_strided_slice %202 {offsets = [0, 0], sizes = [32, 8], strides = [1, 1]} : vector<32x32xf32> to vector<32x8xf32>
    %204 = vector.shape_cast %203 : vector<32x8xf32> to vector<2x16x8xf32>
    %205 = arith.truncf %204 : vector<2x16x8xf32> to vector<2x16x8xbf16>
    %206 = vector.extract_strided_slice %193 {offsets = [0, 0], sizes = [24, 8], strides = [1, 1]} : vector<24x32xf32> to vector<24x8xf32>
    %207 = vector.shape_cast %206 : vector<24x8xf32> to vector<2x12x8xf32>
    %208 = arith.truncf %207 : vector<2x12x8xf32> to vector<2x12x8xbf16>
    %209 = vector.extract_strided_slice %200 {offsets = [0, 0], sizes = [24, 8], strides = [1, 1]} : vector<24x32xf32> to vector<24x8xf32>
    %210 = vector.shape_cast %209 : vector<24x8xf32> to vector<2x12x8xf32>
    %211 = arith.truncf %210 : vector<2x12x8xf32> to vector<2x12x8xbf16>
    "tpu.trace_start"() <{level = 10 : i32, message = "btd,bsd->bts"}> : () -> ()
    %cst_95 = arith.constant dense<0.000000e+00> : vector<2x16x12xf32>
    %212 = tpu.matmul %205, %208, %cst_95 {dimension_numbers = #tpu.dot_dimension_numbers<[2], [2], [1], [1], [0, 0, 0, 1, 1, 1], [0], [0]>} : vector<2x16x8xbf16>, vector<2x12x8xbf16>, vector<2x16x12xf32> -> vector<2x16x12xf32>
    %cst_96 = arith.constant -1.000000e+04 : f32
    "tpu.trace_stop"() : () -> ()
    %213 = vector.broadcast %cst_96 : f32 to vector<2x16x12xf32>
    %214 = arith.select %10, %212, %213 : vector<2x16x12xi1>, vector<2x16x12xf32>
    %cst_97 = arith.constant dense<0xFF800000> : vector<2x16xf32>
    %215 = vector.multi_reduction <maximumf>, %214, %cst_97 [2] : vector<2x16x12xf32> to vector<2x16xf32>
    %216 = vector.shape_cast %215 : vector<2x16xf32> to vector<2x16x1xf32>
    %217 = vector.broadcast %216 : vector<2x16x1xf32> to vector<2x16x12xf32>
    %218 = arith.subf %214, %217 : vector<2x16x12xf32>
    %219 = math.exp %218 : vector<2x16x12xf32>
    %cst_98 = arith.constant dense<0.000000e+00> : vector<2x16xf32>
    %220 = vector.multi_reduction <add>, %219, %cst_98 [2] : vector<2x16x12xf32> to vector<2x16xf32>
    %221 = vector.shape_cast %220 : vector<2x16xf32> to vector<2x16x1xf32>
    %222 = tpu.reciprocal %221 {approx = true} : vector<2x16x1xf32> -> vector<2x16x1xf32>
    %223 = vector.broadcast %222 : vector<2x16x1xf32> to vector<2x16x12xf32>
    %224 = arith.mulf %219, %223 : vector<2x16x12xf32>
    %225 = arith.truncf %224 : vector<2x16x12xf32> to vector<2x16x12xbf16>
    "tpu.trace_start"() <{level = 10 : i32, message = "bts,bsd->btd"}> : () -> ()
    %cst_99 = arith.constant dense<0.000000e+00> : vector<2x16x8xf32>
    %226 = tpu.matmul %225, %211, %cst_99 {dimension_numbers = #tpu.dot_dimension_numbers<[2], [1], [1], [2], [0, 0, 0, 1, 1, 2], [0], [0]>} : vector<2x16x12xbf16>, vector<2x12x8xbf16>, vector<2x16x8xf32> -> vector<2x16x8xf32>
    "tpu.trace_stop"() : () -> ()
    %227 = vector.shape_cast %226 : vector<2x16x8xf32> to vector<32x8xf32>
    %c0_100 = arith.constant 0 : index
    %c0_101 = arith.constant 0 : index
    %228 = vector.load %arg33[%c0_100, %c0_101] : memref<32x32xf32, #tpu.memory_space<vmem>>, vector<32x8xf32>
    tpu.vector_store %arg33[%c0_100, %c0_101], %227 {strides = array<i32>} : memref<32x32xf32, #tpu.memory_space<vmem>>, vector<32x8xf32>,
    %229 = vector.extract_strided_slice %202 {offsets = [0, 8], sizes = [32, 8], strides = [1, 1]} : vector<32x32xf32> to vector<32x8xf32>
    %230 = vector.shape_cast %229 : vector<32x8xf32> to vector<2x16x8xf32>
    %231 = arith.truncf %230 : vector<2x16x8xf32> to vector<2x16x8xbf16>
    %232 = vector.extract_strided_slice %193 {offsets = [0, 8], sizes = [24, 8], strides = [1, 1]} : vector<24x32xf32> to vector<24x8xf32>
    %233 = vector.shape_cast %232 : vector<24x8xf32> to vector<2x12x8xf32>
    %234 = arith.truncf %233 : vector<2x12x8xf32> to vector<2x12x8xbf16>
    %235 = vector.extract_strided_slice %200 {offsets = [0, 8], sizes = [24, 8], strides = [1, 1]} : vector<24x32xf32> to vector<24x8xf32>
    %236 = vector.shape_cast %235 : vector<24x8xf32> to vector<2x12x8xf32>
    %237 = arith.truncf %236 : vector<2x12x8xf32> to vector<2x12x8xbf16>
    "tpu.trace_start"() <{level = 10 : i32, message = "btd,bsd->bts"}> : () -> ()
    %cst_102 = arith.constant dense<0.000000e+00> : vector<2x16x12xf32>
    %238 = tpu.matmul %231, %234, %cst_102 {dimension_numbers = #tpu.dot_dimension_numbers<[2], [2], [1], [1], [0, 0, 0, 1, 1, 1], [0], [0]>} : vector<2x16x8xbf16>, vector<2x12x8xbf16>, vector<2x16x12xf32> -> vector<2x16x12xf32>
    %cst_103 = arith.constant -1.000000e+04 : f32
    "tpu.trace_stop"() : () -> ()
    %239 = vector.broadcast %cst_103 : f32 to vector<2x16x12xf32>
    %240 = arith.select %10, %238, %239 : vector<2x16x12xi1>, vector<2x16x12xf32>
    %cst_104 = arith.constant dense<0xFF800000> : vector<2x16xf32>
    %241 = vector.multi_reduction <maximumf>, %240, %cst_104 [2] : vector<2x16x12xf32> to vector<2x16xf32>
    %242 = vector.shape_cast %241 : vector<2x16xf32> to vector<2x16x1xf32>
    %243 = vector.broadcast %242 : vector<2x16x1xf32> to vector<2x16x12xf32>
    %244 = arith.subf %240, %243 : vector<2x16x12xf32>
    %245 = math.exp %244 : vector<2x16x12xf32>
    %cst_105 = arith.constant dense<0.000000e+00> : vector<2x16xf32>
    %246 = vector.multi_reduction <add>, %245, %cst_105 [2] : vector<2x16x12xf32> to vector<2x16xf32>
    %247 = vector.shape_cast %246 : vector<2x16xf32> to vector<2x16x1xf32>
    %248 = tpu.reciprocal %247 {approx = true} : vector<2x16x1xf32> -> vector<2x16x1xf32>
    %249 = vector.broadcast %248 : vector<2x16x1xf32> to vector<2x16x12xf32>
    %250 = arith.mulf %245, %249 : vector<2x16x12xf32>
    %251 = arith.truncf %250 : vector<2x16x12xf32> to vector<2x16x12xbf16>
    "tpu.trace_start"() <{level = 10 : i32, message = "bts,bsd->btd"}> : () -> ()
    %cst_106 = arith.constant dense<0.000000e+00> : vector<2x16x8xf32>
    %252 = tpu.matmul %251, %237, %cst_106 {dimension_numbers = #tpu.dot_dimension_numbers<[2], [1], [1], [2], [0, 0, 0, 1, 1, 2], [0], [0]>} : vector<2x16x12xbf16>, vector<2x12x8xbf16>, vector<2x16x8xf32> -> vector<2x16x8xf32>
    "tpu.trace_stop"() : () -> ()
    %253 = vector.shape_cast %252 : vector<2x16x8xf32> to vector<32x8xf32>
    %c0_107 = arith.constant 0 : index
    %c8_108 = arith.constant 8 : index
    %254 = vector.load %arg33[%c0_107, %c8_108] : memref<32x32xf32, #tpu.memory_space<vmem>>, vector<32x8xf32>
    tpu.vector_store %arg33[%c0_107, %c8_108], %253 {strides = array<i32>} : memref<32x32xf32, #tpu.memory_space<vmem>>, vector<32x8xf32>,
    %255 = vector.extract_strided_slice %202 {offsets = [0, 16], sizes = [32, 8], strides = [1, 1]} : vector<32x32xf32> to vector<32x8xf32>
    %256 = vector.shape_cast %255 : vector<32x8xf32> to vector<2x16x8xf32>
    %257 = arith.truncf %256 : vector<2x16x8xf32> to vector<2x16x8xbf16>
    %258 = vector.extract_strided_slice %193 {offsets = [0, 16], sizes = [24, 8], strides = [1, 1]} : vector<24x32xf32> to vector<24x8xf32>
    %259 = vector.shape_cast %258 : vector<24x8xf32> to vector<2x12x8xf32>
    %260 = arith.truncf %259 : vector<2x12x8xf32> to vector<2x12x8xbf16>
    %261 = vector.extract_strided_slice %200 {offsets = [0, 16], sizes = [24, 8], strides = [1, 1]} : vector<24x32xf32> to vector<24x8xf32>
    %262 = vector.shape_cast %261 : vector<24x8xf32> to vector<2x12x8xf32>
    %263 = arith.truncf %262 : vector<2x12x8xf32> to vector<2x12x8xbf16>
    "tpu.trace_start"() <{level = 10 : i32, message = "btd,bsd->bts"}> : () -> ()
    %cst_109 = arith.constant dense<0.000000e+00> : vector<2x16x12xf32>
    %264 = tpu.matmul %257, %260, %cst_109 {dimension_numbers = #tpu.dot_dimension_numbers<[2], [2], [1], [1], [0, 0, 0, 1, 1, 1], [0], [0]>} : vector<2x16x8xbf16>, vector<2x12x8xbf16>, vector<2x16x12xf32> -> vector<2x16x12xf32>
    %cst_110 = arith.constant -1.000000e+04 : f32
    "tpu.trace_stop"() : () -> ()
    %265 = vector.broadcast %cst_110 : f32 to vector<2x16x12xf32>
    %266 = arith.select %10, %264, %265 : vector<2x16x12xi1>, vector<2x16x12xf32>
    %cst_111 = arith.constant dense<0xFF800000> : vector<2x16xf32>
    %267 = vector.multi_reduction <maximumf>, %266, %cst_111 [2] : vector<2x16x12xf32> to vector<2x16xf32>
    %268 = vector.shape_cast %267 : vector<2x16xf32> to vector<2x16x1xf32>
    %269 = vector.broadcast %268 : vector<2x16x1xf32> to vector<2x16x12xf32>
    %270 = arith.subf %266, %269 : vector<2x16x12xf32>
    %271 = math.exp %270 : vector<2x16x12xf32>
    %cst_112 = arith.constant dense<0.000000e+00> : vector<2x16xf32>
    %272 = vector.multi_reduction <add>, %271, %cst_112 [2] : vector<2x16x12xf32> to vector<2x16xf32>
    %273 = vector.shape_cast %272 : vector<2x16xf32> to vector<2x16x1xf32>
    %274 = tpu.reciprocal %273 {approx = true} : vector<2x16x1xf32> -> vector<2x16x1xf32>
    %275 = vector.broadcast %274 : vector<2x16x1xf32> to vector<2x16x12xf32>
    %276 = arith.mulf %271, %275 : vector<2x16x12xf32>
    %277 = arith.truncf %276 : vector<2x16x12xf32> to vector<2x16x12xbf16>
    "tpu.trace_start"() <{level = 10 : i32, message = "bts,bsd->btd"}> : () -> ()
    %cst_113 = arith.constant dense<0.000000e+00> : vector<2x16x8xf32>
    %278 = tpu.matmul %277, %263, %cst_113 {dimension_numbers = #tpu.dot_dimension_numbers<[2], [1], [1], [2], [0, 0, 0, 1, 1, 2], [0], [0]>} : vector<2x16x12xbf16>, vector<2x12x8xbf16>, vector<2x16x8xf32> -> vector<2x16x8xf32>
    "tpu.trace_stop"() : () -> ()
    %279 = vector.shape_cast %278 : vector<2x16x8xf32> to vector<32x8xf32>
    %c0_114 = arith.constant 0 : index
    %c16_115 = arith.constant 16 : index
    %280 = vector.load %arg33[%c0_114, %c16_115] : memref<32x32xf32, #tpu.memory_space<vmem>>, vector<32x8xf32>
    tpu.vector_store %arg33[%c0_114, %c16_115], %279 {strides = array<i32>} : memref<32x32xf32, #tpu.memory_space<vmem>>, vector<32x8xf32>,
    %281 = vector.extract_strided_slice %202 {offsets = [0, 24], sizes = [32, 8], strides = [1, 1]} : vector<32x32xf32> to vector<32x8xf32>
    %282 = vector.shape_cast %281 : vector<32x8xf32> to vector<2x16x8xf32>
    %283 = arith.truncf %282 : vector<2x16x8xf32> to vector<2x16x8xbf16>
    %284 = vector.extract_strided_slice %193 {offsets = [0, 24], sizes = [24, 8], strides = [1, 1]} : vector<24x32xf32> to vector<24x8xf32>
    %285 = vector.shape_cast %284 : vector<24x8xf32> to vector<2x12x8xf32>
    %286 = arith.truncf %285 : vector<2x12x8xf32> to vector<2x12x8xbf16>
    %287 = vector.extract_strided_slice %200 {offsets = [0, 24], sizes = [24, 8], strides = [1, 1]} : vector<24x32xf32> to vector<24x8xf32>
    %288 = vector.shape_cast %287 : vector<24x8xf32> to vector<2x12x8xf32>
    %289 = arith.truncf %288 : vector<2x12x8xf32> to vector<2x12x8xbf16>
    "tpu.trace_start"() <{level = 10 : i32, message = "btd,bsd->bts"}> : () -> ()
    %cst_116 = arith.constant dense<0.000000e+00> : vector<2x16x12xf32>
    %290 = tpu.matmul %283, %286, %cst_116 {dimension_numbers = #tpu.dot_dimension_numbers<[2], [2], [1], [1], [0, 0, 0, 1, 1, 1], [0], [0]>} : vector<2x16x8xbf16>, vector<2x12x8xbf16>, vector<2x16x12xf32> -> vector<2x16x12xf32>
    %cst_117 = arith.constant -1.000000e+04 : f32
    "tpu.trace_stop"() : () -> ()
    %291 = vector.broadcast %cst_117 : f32 to vector<2x16x12xf32>
    %292 = arith.select %10, %290, %291 : vector<2x16x12xi1>, vector<2x16x12xf32>
    %cst_118 = arith.constant dense<0xFF800000> : vector<2x16xf32>
    %293 = vector.multi_reduction <maximumf>, %292, %cst_118 [2] : vector<2x16x12xf32> to vector<2x16xf32>
    %294 = vector.shape_cast %293 : vector<2x16xf32> to vector<2x16x1xf32>
    %295 = vector.broadcast %294 : vector<2x16x1xf32> to vector<2x16x12xf32>
    %296 = arith.subf %292, %295 : vector<2x16x12xf32>
    %297 = math.exp %296 : vector<2x16x12xf32>
    %cst_119 = arith.constant dense<0.000000e+00> : vector<2x16xf32>
    %298 = vector.multi_reduction <add>, %297, %cst_119 [2] : vector<2x16x12xf32> to vector<2x16xf32>
    %299 = vector.shape_cast %298 : vector<2x16xf32> to vector<2x16x1xf32>
    %300 = tpu.reciprocal %299 {approx = true} : vector<2x16x1xf32> -> vector<2x16x1xf32>
    %301 = vector.broadcast %300 : vector<2x16x1xf32> to vector<2x16x12xf32>
    %302 = arith.mulf %297, %301 : vector<2x16x12xf32>
    %303 = arith.truncf %302 : vector<2x16x12xf32> to vector<2x16x12xbf16>
    "tpu.trace_start"() <{level = 10 : i32, message = "bts,bsd->btd"}> : () -> ()
    %cst_120 = arith.constant dense<0.000000e+00> : vector<2x16x8xf32>
    %304 = tpu.matmul %303, %289, %cst_120 {dimension_numbers = #tpu.dot_dimension_numbers<[2], [1], [1], [2], [0, 0, 0, 1, 1, 2], [0], [0]>} : vector<2x16x12xbf16>, vector<2x12x8xbf16>, vector<2x16x8xf32> -> vector<2x16x8xf32>
    "tpu.trace_stop"() : () -> ()
    %305 = vector.shape_cast %304 : vector<2x16x8xf32> to vector<32x8xf32>
    %c0_121 = arith.constant 0 : index
    %c24_122 = arith.constant 24 : index
    %306 = vector.load %arg33[%c0_121, %c24_122] : memref<32x32xf32, #tpu.memory_space<vmem>>, vector<32x8xf32>
    tpu.vector_store %arg33[%c0_121, %c24_122], %305 {strides = array<i32>} : memref<32x32xf32, #tpu.memory_space<vmem>>, vector<32x8xf32>,
    %c0_123 = arith.constant 0 : index
    %c0_124 = arith.constant 0 : index
    %307 = vector.load %arg33[%c0_123, %c0_124] : memref<32x32xf32, #tpu.memory_space<vmem>>, vector<32x32xf32>
    %308 = arith.truncf %307 : vector<32x32xf32> to vector<32x32xbf16>
    %c0_125 = arith.constant 0 : index
    %c0_126 = arith.constant 0 : index
    %c0_127 = arith.constant 0 : index
    %309 = vector.load %arg20[%c0_125, %c0_126, %c0_127] : memref<1x32x32xbf16, #tpu.memory_space<vmem>>, vector<1x32x32xbf16>
    %310 = vector.shape_cast %309 : vector<1x32x32xbf16> to vector<32x32xbf16>
    %cst_128 = arith.constant dense<0.000000e+00> : vector<32x32xf32>
    %311 = tpu.matmul %308, %310, %cst_128 {dimension_numbers = #tpu.dot_dimension_numbers<[1], [0], [0], [1], [0, 0, 1, 1], [], []>} : vector<32x32xbf16>, vector<32x32xbf16>, vector<32x32xf32> -> vector<32x32xf32>
    %c0_129 = arith.constant 0 : index
    %c0_130 = arith.constant 0 : index
    %c0_131 = arith.constant 0 : index
    %312 = vector.load %arg21[%c0_129, %c0_130, %c0_131] : memref<1x1x32xf32, #tpu.memory_space<vmem>>, vector<1x1x32xf32>
    %313 = vector.shape_cast %312 : vector<1x1x32xf32> to vector<1x32xf32>
    %314 = vector.broadcast %313 : vector<1x32xf32> to vector<32x32xf32>
    %315 = arith.addf %311, %314 : vector<32x32xf32>
    %316 = arith.addf %176, %315 : vector<32x32xf32>
    %c0_132 = arith.constant 0 : index
    %c0_133 = arith.constant 0 : index
    %c0_134 = arith.constant 0 : index
    %317 = vector.load %arg22[%c0_132, %c0_133, %c0_134] : memref<1x1x32xf32, #tpu.memory_space<vmem>>, vector<1x1x32xf32>
    %318 = vector.shape_cast %317 : vector<1x1x32xf32> to vector<1x32xf32>
    %c0_135 = arith.constant 0 : index
    %c0_136 = arith.constant 0 : index
    %c0_137 = arith.constant 0 : index
    %319 = vector.load %arg23[%c0_135, %c0_136, %c0_137] : memref<1x1x32xf32, #tpu.memory_space<vmem>>, vector<1x1x32xf32>
    %320 = vector.shape_cast %319 : vector<1x1x32xf32> to vector<1x32xf32>
    %cst_138 = arith.constant dense<0.000000e+00> : vector<32xf32>
    %321 = vector.multi_reduction <add>, %316, %cst_138 [1] : vector<32x32xf32> to vector<32xf32>
    %322 = vector.shape_cast %321 : vector<32xf32> to vector<32x1xf32>
    %cst_139 = arith.constant 3.200000e+01 : f32
    %323 = vector.broadcast %cst_139 : f32 to vector<32x1xf32>
    %324 = arith.divf %322, %323 : vector<32x1xf32>
    %325 = vector.broadcast %324 : vector<32x1xf32> to vector<32x32xf32>
    %326 = arith.subf %316, %325 : vector<32x32xf32>
    %327 = arith.mulf %326, %326 : vector<32x32xf32>
    %cst_140 = arith.constant dense<0.000000e+00> : vector<32xf32>
    %328 = vector.multi_reduction <add>, %327, %cst_140 [1] : vector<32x32xf32> to vector<32xf32>
    %329 = vector.shape_cast %328 : vector<32xf32> to vector<32x1xf32>
    %cst_141 = arith.constant 3.200000e+01 : f32
    %330 = vector.broadcast %cst_141 : f32 to vector<32x1xf32>
    %331 = arith.divf %329, %330 : vector<32x1xf32>
    %332 = vector.broadcast %324 : vector<32x1xf32> to vector<32x32xf32>
    %333 = arith.subf %316, %332 : vector<32x32xf32>
    %cst_142 = arith.constant 9.99999974E-6 : f32
    %334 = vector.broadcast %cst_142 : f32 to vector<32x1xf32>
    %335 = arith.addf %331, %334 : vector<32x1xf32>
    %336 = math.rsqrt %335 : vector<32x1xf32>
    %337 = vector.broadcast %336 : vector<32x1xf32> to vector<32x32xf32>
    %338 = arith.mulf %333, %337 : vector<32x32xf32>
    %339 = vector.broadcast %318 : vector<1x32xf32> to vector<32x32xf32>
    %340 = arith.mulf %338, %339 : vector<32x32xf32>
    %341 = vector.broadcast %320 : vector<1x32xf32> to vector<32x32xf32>
    %342 = arith.addf %340, %341 : vector<32x32xf32>
    %343 = vector.broadcast %0 : vector<32x1xf32> to vector<32x32xf32>
    %344 = arith.mulf %342, %343 : vector<32x32xf32>
    %345 = arith.truncf %344 : vector<32x32xf32> to vector<32x32xbf16>
    %c0_143 = arith.constant 0 : index
    %c0_144 = arith.constant 0 : index
    %c0_145 = arith.constant 0 : index
    %346 = vector.load %arg24[%c0_143, %c0_144, %c0_145] : memref<1x32x64xbf16, #tpu.memory_space<vmem>>, vector<1x32x64xbf16>
    %347 = vector.shape_cast %346 : vector<1x32x64xbf16> to vector<32x64xbf16>
    %cst_146 = arith.constant dense<0.000000e+00> : vector<32x64xf32>
    %348 = tpu.matmul %345, %347, %cst_146 {dimension_numbers = #tpu.dot_dimension_numbers<[1], [0], [0], [1], [0, 0, 1, 1], [], []>} : vector<32x32xbf16>, vector<32x64xbf16>, vector<32x64xf32> -> vector<32x64xf32>
    %c0_147 = arith.constant 0 : index
    %c0_148 = arith.constant 0 : index
    %c0_149 = arith.constant 0 : index
    %349 = vector.load %arg25[%c0_147, %c0_148, %c0_149] : memref<1x1x64xf32, #tpu.memory_space<vmem>>, vector<1x1x64xf32>
    %350 = vector.shape_cast %349 : vector<1x1x64xf32> to vector<1x64xf32>
    %351 = vector.broadcast %350 : vector<1x64xf32> to vector<32x64xf32>
    %352 = arith.addf %348, %351 : vector<32x64xf32>
    %cst_150 = arith.constant 0.000000e+00 : f32
    %353 = vector.broadcast %cst_150 : f32 to vector<32x64xf32>
    %354 = arith.maximumf %352, %353 : vector<32x64xf32>
    %355 = vector.broadcast %0 : vector<32x1xf32> to vector<32x64xf32>
    %356 = arith.mulf %354, %355 : vector<32x64xf32>
    %357 = arith.truncf %356 : vector<32x64xf32> to vector<32x64xbf16>
    %c0_151 = arith.constant 0 : index
    %c0_152 = arith.constant 0 : index
    %c0_153 = arith.constant 0 : index
    %358 = vector.load %arg26[%c0_151, %c0_152, %c0_153] : memref<1x64x32xbf16, #tpu.memory_space<vmem>>, vector<1x64x32xbf16>
    %359 = vector.shape_cast %358 : vector<1x64x32xbf16> to vector<64x32xbf16>
    %cst_154 = arith.constant dense<0.000000e+00> : vector<32x32xf32>
    %360 = tpu.matmul %357, %359, %cst_154 {dimension_numbers = #tpu.dot_dimension_numbers<[1], [0], [0], [1], [0, 0, 1, 1], [], []>} : vector<32x64xbf16>, vector<64x32xbf16>, vector<32x32xf32> -> vector<32x32xf32>
    %c0_155 = arith.constant 0 : index
    %c0_156 = arith.constant 0 : index
    %c0_157 = arith.constant 0 : index
    %361 = vector.load %arg27[%c0_155, %c0_156, %c0_157] : memref<1x1x32xf32, #tpu.memory_space<vmem>>, vector<1x1x32xf32>
    %362 = vector.shape_cast %361 : vector<1x1x32xf32> to vector<1x32xf32>
    %363 = vector.broadcast %362 : vector<1x32xf32> to vector<32x32xf32>
    %364 = arith.addf %360, %363 : vector<32x32xf32>
    %365 = vector.broadcast %0 : vector<32x1xf32> to vector<32x32xf32>
    %366 = arith.mulf %364, %365 : vector<32x32xf32>
    %367 = arith.addf %342, %366 : vector<32x32xf32>
    %c0_158 = arith.constant 0 : index
    %c0_159 = arith.constant 0 : index
    %c0_160 = arith.constant 0 : index
    %368 = vector.load %arg28[%c0_158, %c0_159, %c0_160] : memref<1x1x32xf32, #tpu.memory_space<vmem>>, vector<1x1x32xf32>
    %369 = vector.shape_cast %368 : vector<1x1x32xf32> to vector<1x32xf32>
    %c0_161 = arith.constant 0 : index
    %c0_162 = arith.constant 0 : index
    %c0_163 = arith.constant 0 : index
    %370 = vector.load %arg29[%c0_161, %c0_162, %c0_163] : memref<1x1x32xf32, #tpu.memory_space<vmem>>, vector<1x1x32xf32>
    %371 = vector.shape_cast %370 : vector<1x1x32xf32> to vector<1x32xf32>
    %cst_164 = arith.constant dense<0.000000e+00> : vector<32xf32>
    %372 = vector.multi_reduction <add>, %367, %cst_164 [1] : vector<32x32xf32> to vector<32xf32>
    %373 = vector.shape_cast %372 : vector<32xf32> to vector<32x1xf32>
    %cst_165 = arith.constant 3.200000e+01 : f32
    %374 = vector.broadcast %cst_165 : f32 to vector<32x1xf32>
    %375 = arith.divf %373, %374 : vector<32x1xf32>
    %376 = vector.broadcast %375 : vector<32x1xf32> to vector<32x32xf32>
    %377 = arith.subf %367, %376 : vector<32x32xf32>
    %378 = arith.mulf %377, %377 : vector<32x32xf32>
    %cst_166 = arith.constant dense<0.000000e+00> : vector<32xf32>
    %379 = vector.multi_reduction <add>, %378, %cst_166 [1] : vector<32x32xf32> to vector<32xf32>
    %380 = vector.shape_cast %379 : vector<32xf32> to vector<32x1xf32>
    %cst_167 = arith.constant 3.200000e+01 : f32
    %381 = vector.broadcast %cst_167 : f32 to vector<32x1xf32>
    %382 = arith.divf %380, %381 : vector<32x1xf32>
    %383 = vector.broadcast %375 : vector<32x1xf32> to vector<32x32xf32>
    %384 = arith.subf %367, %383 : vector<32x32xf32>
    %cst_168 = arith.constant 9.99999974E-6 : f32
    %385 = vector.broadcast %cst_168 : f32 to vector<32x1xf32>
    %386 = arith.addf %382, %385 : vector<32x1xf32>
    %387 = math.rsqrt %386 : vector<32x1xf32>
    %388 = vector.broadcast %387 : vector<32x1xf32> to vector<32x32xf32>
    %389 = arith.mulf %384, %388 : vector<32x32xf32>
    %390 = vector.broadcast %369 : vector<1x32xf32> to vector<32x32xf32>
    %391 = arith.mulf %389, %390 : vector<32x32xf32>
    %392 = vector.broadcast %371 : vector<1x32xf32> to vector<32x32xf32>
    %393 = arith.addf %391, %392 : vector<32x32xf32>
    %c0_169 = arith.constant 0 : index
    %c0_170 = arith.constant 0 : index
    %394 = vector.load %arg30[%c0_169, %c0_170] : memref<32x32xf32, #tpu.memory_space<vmem>>, vector<32x32xf32>
    tpu.vector_store %arg30[%c0_169, %c0_170], %393 {strides = array<i32>} : memref<32x32xf32, #tpu.memory_space<vmem>>, vector<32x32xf32>,
    %c1_i32 = arith.constant 1 : i32
    %395 = arith.cmpi eq, %arg1, %c1_i32 : i32
    %396 = arith.extui %395 : i1 to i32
    %c0_i32_171 = arith.constant 0 : i32
    %397 = arith.cmpi ne, %396, %c0_i32_171 : i32
    scf.if %397 {
      %398 = vector.broadcast %0 : vector<32x1xf32> to vector<32x32xf32>
      %399 = arith.mulf %393, %398 : vector<32x32xf32>
      %c0_172 = arith.constant 0 : index
      %c0_173 = arith.constant 0 : index
      %400 = vector.load %arg30[%c0_172, %c0_173] : memref<32x32xf32, #tpu.memory_space<vmem>>, vector<32x32xf32>
      tpu.vector_store %arg30[%c0_172, %c0_173], %399 {strides = array<i32>} : memref<32x32xf32, #tpu.memory_space<vmem>>, vector<32x32xf32>,
    } else {
    }
    return
  }
  func.func @transform_0(%arg0: i32, %arg1: i32) -> (i32, i32) {
    %c0_i32 = arith.constant 0 : i32
    %c0_i32_0 = arith.constant 0 : i32
    return %arg0, %c0_i32 : i32, i32
  }
  func.func @transform_1(%arg0: i32, %arg1: i32) -> (i32, i32, i32) {
    %c0_i32 = arith.constant 0 : i32
    %c0_i32_0 = arith.constant 0 : i32
    %c0_i32_1 = arith.constant 0 : i32
    return %arg0, %c0_i32, %c0_i32_0 : i32, i32, i32
  }
  func.func @transform_2(%arg0: i32, %arg1: i32) -> (i32, i32) {
    %c0_i32 = arith.constant 0 : i32
    %c0_i32_0 = arith.constant 0 : i32
    return %arg0, %c0_i32 : i32, i32
  }
  func.func @transform_3(%arg0: i32, %arg1: i32) -> (i32, i32, i32) {
    %c0_i32 = arith.constant 0 : i32
    %c0_i32_0 = arith.constant 0 : i32
    %c0_i32_1 = arith.constant 0 : i32
    return %arg0, %c0_i32, %c0_i32_0 : i32, i32, i32
  }
  func.func @transform_4(%arg0: i32, %arg1: i32) -> (i32, i32, i32) {
    %c0_i32 = arith.constant 0 : i32
    %c0_i32_0 = arith.constant 0 : i32
    %c0_i32_1 = arith.constant 0 : i32
    return %arg1, %c0_i32, %c0_i32_0 : i32, i32, i32
  }
  func.func @transform_5(%arg0: i32, %arg1: i32) -> (i32, i32, i32) {
    %c0_i32 = arith.constant 0 : i32
    %c0_i32_0 = arith.constant 0 : i32
    %c0_i32_1 = arith.constant 0 : i32
    return %arg1, %c0_i32, %c0_i32_0 : i32, i32, i32
  }
  func.func @transform_6(%arg0: i32, %arg1: i32) -> (i32, i32, i32) {
    %c0_i32 = arith.constant 0 : i32
    %c0_i32_0 = arith.constant 0 : i32
    %c0_i32_1 = arith.constant 0 : i32
    return %arg1, %c0_i32, %c0_i32_0 : i32, i32, i32
  }
  func.func @transform_7(%arg0: i32, %arg1: i32) -> (i32, i32, i32) {
    %c0_i32 = arith.constant 0 : i32
    %c0_i32_0 = arith.constant 0 : i32
    %c0_i32_1 = arith.constant 0 : i32
    return %arg1, %c0_i32, %c0_i32_0 : i32, i32, i32
  }
  func.func @transform_8(%arg0: i32, %arg1: i32) -> (i32, i32, i32) {
    %c0_i32 = arith.constant 0 : i32
    %c0_i32_0 = arith.constant 0 : i32
    %c0_i32_1 = arith.constant 0 : i32
    return %arg1, %c0_i32, %c0_i32_0 : i32, i32, i32
  }
  func.func @transform_9(%arg0: i32, %arg1: i32) -> (i32, i32, i32) {
    %c0_i32 = arith.constant 0 : i32
    %c0_i32_0 = arith.constant 0 : i32
    %c0_i32_1 = arith.constant 0 : i32
    return %arg1, %c0_i32, %c0_i32_0 : i32, i32, i32
  }
  func.func @transform_10(%arg0: i32, %arg1: i32) -> (i32, i32, i32) {
    %c0_i32 = arith.constant 0 : i32
    %c0_i32_0 = arith.constant 0 : i32
    %c0_i32_1 = arith.constant 0 : i32
    return %arg1, %c0_i32, %c0_i32_0 : i32, i32, i32
  }
  func.func @transform_11(%arg0: i32, %arg1: i32) -> (i32, i32, i32) {
    %c0_i32 = arith.constant 0 : i32
    %c0_i32_0 = arith.constant 0 : i32
    %c0_i32_1 = arith.constant 0 : i32
    return %arg1, %c0_i32, %c0_i32_0 : i32, i32, i32
  }
  func.func @transform_12(%arg0: i32, %arg1: i32) -> (i32, i32, i32) {
    %c0_i32 = arith.constant 0 : i32
    %c0_i32_0 = arith.constant 0 : i32
    %c0_i32_1 = arith.constant 0 : i32
    return %arg1, %c0_i32, %c0_i32_0 : i32, i32, i32
  }
  func.func @transform_13(%arg0: i32, %arg1: i32) -> (i32, i32, i32) {
    %c0_i32 = arith.constant 0 : i32
    %c0_i32_0 = arith.constant 0 : i32
    %c0_i32_1 = arith.constant 0 : i32
    return %arg1, %c0_i32, %c0_i32_0 : i32, i32, i32
  }
  func.func @transform_14(%arg0: i32, %arg1: i32) -> (i32, i32, i32) {
    %c0_i32 = arith.constant 0 : i32
    %c0_i32_0 = arith.constant 0 : i32
    %c0_i32_1 = arith.constant 0 : i32
    return %arg1, %c0_i32, %c0_i32_0 : i32, i32, i32
  }
  func.func @transform_15(%arg0: i32, %arg1: i32) -> (i32, i32, i32) {
    %c0_i32 = arith.constant 0 : i32
    %c0_i32_0 = arith.constant 0 : i32
    %c0_i32_1 = arith.constant 0 : i32
    return %arg1, %c0_i32, %c0_i32_0 : i32, i32, i32
  }
  func.func @transform_16(%arg0: i32, %arg1: i32) -> (i32, i32, i32) {
    %c0_i32 = arith.constant 0 : i32
    %c0_i32_0 = arith.constant 0 : i32
    %c0_i32_1 = arith.constant 0 : i32
    return %arg1, %c0_i32, %c0_i32_0 : i32, i32, i32
  }
  func.func @transform_17(%arg0: i32, %arg1: i32) -> (i32, i32, i32) {
    %c0_i32 = arith.constant 0 : i32
    %c0_i32_0 = arith.constant 0 : i32
    %c0_i32_1 = arith.constant 0 : i32
    return %arg1, %c0_i32, %c0_i32_0 : i32, i32, i32
  }
  func.func @transform_18(%arg0: i32, %arg1: i32) -> (i32, i32, i32) {
    %c0_i32 = arith.constant 0 : i32
    %c0_i32_0 = arith.constant 0 : i32
    %c0_i32_1 = arith.constant 0 : i32
    return %arg1, %c0_i32, %c0_i32_0 : i32, i32, i32
  }
  func.func @transform_19(%arg0: i32, %arg1: i32) -> (i32, i32, i32) {
    %c0_i32 = arith.constant 0 : i32
    %c0_i32_0 = arith.constant 0 : i32
    %c0_i32_1 = arith.constant 0 : i32
    return %arg1, %c0_i32, %c0_i32_0 : i32, i32, i32
  }
  func.func @transform_20(%arg0: i32, %arg1: i32) -> (i32, i32, i32) {
    %c0_i32 = arith.constant 0 : i32
    %c0_i32_0 = arith.constant 0 : i32
    %c0_i32_1 = arith.constant 0 : i32
    return %arg1, %c0_i32, %c0_i32_0 : i32, i32, i32
  }
  func.func @transform_21(%arg0: i32, %arg1: i32) -> (i32, i32, i32) {
    %c0_i32 = arith.constant 0 : i32
    %c0_i32_0 = arith.constant 0 : i32
    %c0_i32_1 = arith.constant 0 : i32
    return %arg1, %c0_i32, %c0_i32_0 : i32, i32, i32
  }
  func.func @transform_22(%arg0: i32, %arg1: i32) -> (i32, i32, i32) {
    %c0_i32 = arith.constant 0 : i32
    %c0_i32_0 = arith.constant 0 : i32
    %c0_i32_1 = arith.constant 0 : i32
    return %arg1, %c0_i32, %c0_i32_0 : i32, i32, i32
  }
  func.func @transform_23(%arg0: i32, %arg1: i32) -> (i32, i32, i32) {
    %c0_i32 = arith.constant 0 : i32
    %c0_i32_0 = arith.constant 0 : i32
    %c0_i32_1 = arith.constant 0 : i32
    return %arg1, %c0_i32, %c0_i32_0 : i32, i32, i32
  }
  func.func @transform_24(%arg0: i32, %arg1: i32) -> (i32, i32, i32) {
    %c0_i32 = arith.constant 0 : i32
    %c0_i32_0 = arith.constant 0 : i32
    %c0_i32_1 = arith.constant 0 : i32
    return %arg1, %c0_i32, %c0_i32_0 : i32, i32, i32
  }
  func.func @transform_25(%arg0: i32, %arg1: i32) -> (i32, i32, i32) {
    %c0_i32 = arith.constant 0 : i32
    %c0_i32_0 = arith.constant 0 : i32
    %c0_i32_1 = arith.constant 0 : i32
    return %arg1, %c0_i32, %c0_i32_0 : i32, i32, i32
  }
  func.func @transform_26(%arg0: i32, %arg1: i32) -> (i32, i32, i32) {
    %c0_i32 = arith.constant 0 : i32
    %c0_i32_0 = arith.constant 0 : i32
    %c0_i32_1 = arith.constant 0 : i32
    return %arg1, %c0_i32, %c0_i32_0 : i32, i32, i32
  }
  func.func @transform_27(%arg0: i32, %arg1: i32) -> (i32, i32, i32) {
    %c0_i32 = arith.constant 0 : i32
    %c0_i32_0 = arith.constant 0 : i32
    %c0_i32_1 = arith.constant 0 : i32
    return %arg1, %c0_i32, %c0_i32_0 : i32, i32, i32
  }
  func.func @transform_28(%arg0: i32, %arg1: i32) -> (i32, i32) {
    %c0_i32 = arith.constant 0 : i32
    %c0_i32_0 = arith.constant 0 : i32
    return %arg0, %c0_i32 : i32, i32
  }
}

</mosaic_0001>

<bundles_post_ra>
// kernel: tpu_custom_call.1
= control target key start
LH: loop header
LB: loop body
LE: loop exit
PB: predicated region body
PF: predicated region fallthrough
CT: control target
= control target key end

     0   :  { %s5928_s30 = smov 0   ;;  %s6858_s0 = inlined_call_operand.vmem [shape: f32[64,32], index: 0, kind: input, shape index: {}]   ;;  %s6859_s1 = inlined_call_operand.vmem [shape: bf16[4,12,32], index: 1, kind: input, shape index: {}]   ;;  %s6860_s2 = inlined_call_operand.vmem [shape: f32[64,1], index: 2, kind: input, shape index: {}]   ;;  %s6861_s3 = inlined_call_operand.vmem [shape: f32[4,1,12], index: 3, kind: input, shape index: {}]   ;;  %s6862_s4 = inlined_call_operand.vmem [shape: bf16[2,32,32], index: 4, kind: input, shape index: {}]   ;;  %s6863_s5 = inlined_call_operand.vmem [shape: f32[2,1,32], index: 5, kind: input, shape index: {}]   ;;  %s6864_s6 = inlined_call_operand.vmem [shape: bf16[2,32,32], index: 6, kind: input, shape index: {}]   ;;  %s6865_s7 = inlined_call_operand.vmem [shape: f32[2,1,32], index: 7, kind: input, shape index: {}]   ;;  %s6866_s8 = inlined_call_operand.vmem [shape: bf16[2,32,32], index: 8, kind: input, shape index: {}]   ;;  %s6867_s9 = inlined_call_operand.vmem [shape: f32[2,1,32], index: 9, kind: input, shape index: {}]   ;;  %s6868_s10 = inlined_call_operand.vmem [shape: f32[2,1,32], index: 10, kind: input, shape index: {}]   ;;  %s6869_s11 = inlined_call_operand.vmem [shape: f32[2,1,32], index: 11, kind: input, shape index: {}]   ;;  %s6870_s12 = inlined_call_operand.vmem [shape: bf16[2,32,32], index: 12, kind: input, shape index: {}]   ;;  %s6871_s13 = inlined_call_operand.vmem [shape: f32[2,1,32], index: 13, kind: input, shape index: {}]   ;;  %s6872_s14 = inlined_call_operand.vmem [shape: bf16[2,32,32], index: 14, kind: input, shape index: {}]   ;;  %s6873_s15 = inlined_call_operand.vmem [shape: f32[2,1,32], index: 15, kind: input, shape index: {}]   ;;  %s6874_s16 = inlined_call_operand.vmem [shape: bf16[2,32,32], index: 16, kind: input, shape index: {}]   ;;  %s6875_s17 = inlined_call_operand.vmem [shape: f32[2,1,32], index: 17, kind: input, shape index: {}]   ;;  %s6876_s18 = inlined_call_operand.vmem [shape: bf16[2,32,32], index: 18, kind: input, shape index: {}]   ;;  %s6877_s19 = inlined_call_operand.vmem [shape: f32[2,1,32], index: 19, kind: input, shape index: {}]   ;;  %s6878_s20 = inlined_call_operand.vmem [shape: f32[2,1,32], index: 20, kind: input, shape index: {}]   ;;  %s6879_s21 = inlined_call_operand.vmem [shape: f32[2,1,32], index: 21, kind: input, shape index: {}]   ;;  %s6880_s22 = inlined_call_operand.vmem [shape: bf16[2,32,64], index: 22, kind: input, shape index: {}]   ;;  %s6881_s23 = inlined_call_operand.vmem [shape: f32[2,1,64], index: 23, kind: input, shape index: {}]   ;;  %s6882_s24 = inlined_call_operand.vmem [shape: bf16[2,64,32], index: 24, kind: input, shape index: {}]   ;;  %s6883_s25 = inlined_call_operand.vmem [shape: f32[2,1,32], index: 25, kind: input, shape index: {}]   ;;  %s6884_s26 = inlined_call_operand.vmem [shape: f32[2,1,32], index: 26, kind: input, shape index: {}]   ;;  %s6885_s27 = inlined_call_operand.vmem [shape: f32[2,1,32], index: 27, kind: input, shape index: {}]   ;;  %s6886_s28 = inlined_call_operand.vmem [shape: f32[64,32], index: 28, kind: output, shape index: {}]  }
   0x1   :  { %6898 = sst [smem:[#allocation16_spill]] %s6858_s0 }
   0x2   :  { %6899 = sst [smem:[#allocation17_spill]] %s6859_s1 }
   0x3   :  { %6900 = sst [smem:[#allocation18_spill]] %s6860_s2 }
   0x4   :  { %6901 = sst [smem:[#allocation19_spill]] %s6861_s3  ;;  %s5930_s3 = smov 0  }
   0x5   :  { %6902 = sst [smem:[#allocation20_spill]] %s6862_s4 }
   0x6   :  { %6903 = sst [smem:[#allocation21_spill]] %s6863_s5  ;;  %s5924_s5 = smov 0  }
   0x7   :  { %6904 = sst [smem:[#allocation22_spill]] %s6864_s6 }
   0x8   :  { %6905 = sst [smem:[#allocation23_spill]] %s6865_s7 }
   0x9   :  { %6906 = sst [smem:[#allocation24_spill]] %s6866_s8  ;;  %s5922_s8 = smov 0  }
   0xa   :  { %6907 = sst [smem:[#allocation25_spill]] %s6867_s9  ;;  %s5926_s9 = smov 0  }
   0xb   :  { %6908 = sst [smem:[#allocation26_spill]] %s6868_s10 }
   0xc   :  { %6909 = sst [smem:[#allocation27_spill]] %s6869_s11 }
   0xd   :  { %6910 = sst [smem:[#allocation28_spill]] %s6870_s12 }
   0xe   :  { %6911 = sst [smem:[#allocation29_spill]] %s6872_s14 }
   0xf   :  { %6912 = sst [smem:[#allocation30_spill]] %s6874_s16 }
  0x10   :  { %6913 = sst [smem:[#allocation31_spill]] %s6875_s17 }
  0x11   :  { %6914 = sst [smem:[#allocation32_spill]] %s6876_s18 }
  0x12   :  { %6915 = sst [smem:[#allocation33_spill]] %s6877_s19 }
  0x13   :  { %6916 = sst [smem:[#allocation34_spill]] %s6878_s20 }
  0x14   :  { %6917 = sst [smem:[#allocation35_spill]] %s6879_s21 }
  0x15   :  { %6918 = sst [smem:[#allocation36_spill]] %s6880_s22 }
  0x16   :  { %6919 = sst [smem:[#allocation37_spill]] %s6881_s23 }
  0x17   :  { %6920 = sst [smem:[#allocation38_spill]] %s6882_s24 }
  0x18   :  { %6921 = sst [smem:[#allocation39_spill]] %s6883_s25 }
  0x19   :  { %6922 = sst [smem:[#allocation40_spill]] %s6884_s26 }
  0x1a   :  { %6923 = sst [smem:[#allocation41_spill]] %s6885_s27 }
  0x1b   :  { %6924 = sst [smem:[#allocation42_spill]] %s6886_s28 }
  0x1c LB: > { %6925 = sst [smem:[#allocation5_spill]] %s5755_s9  ;;  %s47_s6 = sadd.s32 1, %s5755_s9  ;;  %s5763_s3 = sphi %s5930_s3, %s38_s3   ;;  %s5759_s30 = sphi %s5928_s30, %s6999_s30   ;;  %s5755_s9 = sphi %s5926_s9, %s6998_s9   ;;  %s5751_s5 = sphi %s5924_s5, %s6997_s5   ;;  %s5747_s8 = sphi %s5922_s8, %s6996_s8  }
  0x1d   : > { %6926 = sst [smem:[#allocation6_spill]] %s5759_s30  ;;  %s50_s10 = sadd.s32 1, %s5759_s30 }
  0x1e   : > { %6927 = sst [smem:[#allocation7_spill]] %s5763_s3  ;;  %p48_p0 = scmp.ge.s32.totalorder %s47_s6, 2 }
  0x1f   : > { %p4987_p1 = scmp.ge.s32.totalorder %s5763_s3, 1  ;;  %p1018_p2 = scmp.lt.s32.totalorder %s5763_s3, 5 }
  0x20   : > { %s7001_s6 = smov (%p48_p0, %s47_s6), 0  ;;  %s7003_s10 = smov (!%p48_p0, %s50_s10), %s5759_s30 }
  0x21   : > { %6928 = sst [smem:[#allocation8_spill]] %s7001_s6  ;;  %p1019_p3 = pnand %p4987_p1, %p1018_p2 }
  0x22   : > { %p52_p4 = scmp.ge.s32.totalorder %s7003_s10, 2 }
  0x23   : > { %1022 = sbr.rel (%p1019_p3) target bundleno = 7574 (0x1d96), region = 132 }
  0x24   : > { %s7005_s10 = smov (%p52_p4, %s7003_s10), 0 }
  0x25   : > { %6929 = sst [smem:[#allocation9_spill]] %s7005_s10 }
  0x2a   : > { %s4988_s0 = sshll.u32 %s5751_s5, 2  ;;  %s4990_s11 = sshll.u32 %s5751_s5, 1 }
  0x2b   : > { %p1198_p5 = scmp.lt.s32.totalorder %s4988_s0, 7  ;;  %p1204_p6 = scmp.lt.s32.totalorder %s4990_s11, 3 }
  0x2c   : > { %p1221_p7 = scmp.lt.s32.totalorder %s5747_s8, 1  ;;  %s6930_s12 = sld [smem:[#allocation16_spill]] }
  0x2d   : > { %s7007_s0 = smov (!%p1198_p5, %s4988_s0), 7  ;;  %s7009_s11 = smov (!%p1204_p6, %s4990_s11), 3 }
  0x2e   : > { %s4989_s29 = sshll.u32 %s7007_s0, 3  ;;  %s5113_s4 = sshll.u32 %s7009_s11, 3 }
  0x2f   : > { %s6931_s10 = sld [smem:[#allocation17_spill]]  ;;  %s6933_s27 = sld [smem:[#allocation18_spill]] }
  0x30   : > { %s6934_s23 = sld [smem:[#allocation19_spill]]  ;;  %s6936_s28 = sld [smem:[#allocation42_spill]] }
  0x31   : > { %s5985_s30 = scalar_select %p1221_p7, %s5747_s8, 1 }
  0x32   : > { %s5958_s1 = scalar_lea.vmem %s6930_s12, %s4989_s29  ;;  %s6939_s6 = sld [smem:[#allocation20_spill]] }
  0x33   : > { %s5114_s21 = sshll.u32 %s5985_s30, 4  ;;  %s6941_s7 = sld [smem:[#allocation22_spill]] }
  0x34   : > { %s6949_s14 = sld [smem:[#allocation29_spill]]  ;;  %s6950_s16 = sld [smem:[#allocation30_spill]] }
  0x35   : > { %s5963_s9 = scalar_lea.vmem %s6931_s10, %s5113_s4  ;;  %s1214_s26 = scalar_lea.vmem %s6933_s27, %s4989_s29 }
  0x36   : > { %6932 = sst [smem:[#allocation10_spill]] %s5963_s9  ;;  %s5971_s0 = scalar_lea.vmem %s6934_s23, %s7009_s11  ;;  %v5978_v0 = vld [vmem:[%s1214_s26] sm:$0xff]  ;;  %v5980_v1 = vld [vmem:[%s1214_s26 + $0x8] sm:$0xff]  ;;  %v5982_v2 = vld [vmem:[%s1214_s26 + $0x10] sm:$0xff] }
  0x37   : > { %6935 = sst [smem:[#allocation11_spill]] %s5971_s0  ;;  %s5976_s2 = scalar_lea.vmem %s6936_s28, %s4989_s29  ;;  %v5987_v3 = vld [vmem:[%s1214_s26 + $0x18] sm:$0xff] }
  0x38   : > { %6937 = sst [smem:[#allocation12_spill]] %s5976_s2  ;;  %s5997_s10 = scalar_lea.vmem %s6939_s6, %s5114_s21 }
  0x39   : > { %6940 = sst [smem:[#allocation13_spill]] %s5997_s10  ;;  %s6002_s12 = scalar_lea.vmem %s6941_s7, %s5114_s21 }
  0x3a   : > { %6942 = sst [smem:[#allocation14_spill]] %s6002_s12  ;;  %s6944_s23 = sld [smem:[#allocation24_spill]] }
  0x3b   : > { %s6948_s9 = sld [smem:[#allocation28_spill]]  ;;  %s6037_s10 = scalar_lea.vmem %s6949_s14, %s5114_s21 }
  0x3c   : > { %s6046_s4 = scalar_lea.vmem %s6950_s16, %s5114_s21  ;;  %s6952_s18 = sld [smem:[#allocation32_spill]] }
  0x3d   : > { %s5122_s17 = sshll.u32 %s5985_s30, 5  ;;  %s6959_s7 = sld [smem:[#allocation38_spill]] }
  0x3e   : > { %s6960_s0 = sld [smem:[#allocation39_spill]]  ;;  %s6961_s14 = sld [smem:[#allocation40_spill]] }
  0x3f   : > { %p5016_p8 = scmp.ne.s32.totalorder %s5747_s8, 0 }
  0x40   : > { %s6011_s24 = scalar_lea.vmem %s6944_s23, %s5114_s21  ;;  %v5765_v4 = vmov (!%p5016_p8), 0   ;;  %v1359_v5 = vlaneseq (!%p5016_p8)  ;;  %v5766_v9 = vmov (!%p5016_p8), 0.0   ;;  %vm1370_vm2 = vcmask (!%p5016_p8), 130048   ;;  %v1326_v12 = vld [vmem:[%s5958_s1] sm:$0xff] (!%p5016_p8)  ;;  %v1327_v20 = vld [vmem:[%s5958_s1 + $0x8] sm:$0xff] (!%p5016_p8)  ;;  %v1328_v21 = vld [vmem:[%s5958_s1 + $0x10] sm:$0xff] (!%p5016_p8) }
  0x41   : > { %s6028_s22 = scalar_lea.vmem %s6948_s9, %s5114_s21  ;;  %s6957_s9 = sld [smem:[#allocation36_spill]]  ;;  %5546 = vset.pattern.permute.xlu1 (!%p5016_p8), %v5765_v4  ;;  %5545 = vset.pattern.permute.xlu0 (!%p5016_p8), %v5765_v4  ;;  %vm1354_vm3 = vcmask (!%p5016_p8), 261120   ;;  %vm1391_vm4 = vcmask (!%p5016_p8), 97280   ;;  %v1329_v23 = vld [vmem:[%s5958_s1 + $0x18] sm:$0xff] (!%p5016_p8) }
  0x42   : > { %s6055_s26 = scalar_lea.vmem %s6952_s18, %s5114_s21  ;;  %s6958_s18 = sld [smem:[#allocation37_spill]]  ;;  %1342 = vperm.xlu1 (!%p5016_p8), %5546, %v5982_v2   ;;  %1332 = vperm.xlu0 (!%p5016_p8), %5545, %v5978_v0   ;;  %v1360_v6 = vshrl.u32 (!%p5016_p8), %v1359_v5, 7  ;;  %v1363_v8 = vand.u32 (!%p5016_p8), 127, %v1359_v5 }
  0x43   : > { %6953 = sst [smem:[#allocation15_spill]] %s6055_s26  ;;  %s6082_s19 = scalar_lea.vmem %s6959_s7, %s5122_s17 }
  0x44   : > { %s1304_s12 = scalar_lea.vmem %s6960_s0, %s5985_s30  ;;  %s1307_s16 = scalar_lea.vmem %s6961_s14, %s5985_s30  ;;  %v1361_v7 = vadd.s32 (!%p5016_p8), 8, %v1360_v6  ;;  %vm1364_vm0 = vcmp.ge.s32.totalorder (!%p5016_p8), %v1360_v6, %v1363_v8 }
  0x45   : > { %s6963_s17 = sld [smem:[#allocation11_spill]] (!%p5016_p8)  ;;  %v5017_v10 = vsel (!%p5016_p8), %vm1364_vm0, 1.0, %v5766_v9  ;;  %s6964_s14 = sld [smem:[#allocation12_spill]] (!%p5016_p8) }
  0x46   : > { %1347 = vperm.xlu1 (!%p5016_p8), %5546, %v5987_v3   ;;  %1337 = vperm.xlu0 (!%p5016_p8), %5545, %v5980_v1   ;;  %vm1365_vm1 = vcmp.ge.s32.totalorder (!%p5016_p8), %v1361_v7, %v1363_v8  ;;  %1371 = vst.msk [vmem:[#allocation2] sm:$0xff] (!%p5016_p8), %vm1370_vm2, %v5017_v10 }
  0x47   : > { %s6072_s28 = scalar_lea.vmem %s6957_s9, %s5114_s21  ;;  %s6962_s9 = sld [smem:[#allocation41_spill]]  ;;  %v5018_v11 = vsel (!%p5016_p8), %vm1365_vm1, 1.0, %v5766_v9 }
  0x48   : > { %s1296_s26 = scalar_lea.vmem %s6958_s18, %s5985_s30  ;;  %1325 = sbr.rel (%p5016_p8) target bundleno = 202 (0xca), region = 136  ;;  %1372 = vst.msk [vmem:[#allocation2 + $0x8] sm:$0xff] (!%p5016_p8), %vm1370_vm2, %v5018_v11 }
  0x4b   : > { %v5020_v13 = vld [vmem:[%s6963_s17 + $0x1] ss:$0 sm:$0xff] (!%p5016_p8)  ;;  %v5019_v14 = vld [vmem:[%s6963_s17] ss:$0 sm:$0xff] (!%p5016_p8) }
  0x4d   : > { %s1310_s20 = scalar_lea.vmem %s6962_s9, %s5985_s30 }
  0xc1   : > { %v1343_v15 = vpop.permute.xlu1 %1342  ;;  %v1333_v16 = vpop.permute.xlu0 %1332 }
  0xc2   : > { %v1350_v17 = vmul.f32 %v1333_v16, %v1326_v12  ;;  %v1389_v18 = vmul.f32 %v5020_v13, %v1343_v15  ;;  %v1387_v19 = vmul.f32 %v5019_v14, %v1333_v16  ;;  %v1352_v28 = vmul.f32 %v1343_v15, %v1328_v21 }
  0xc4   : > { %1355 = vst.msk [vmem:[%s6964_s14] sm:$0xff] %vm1354_vm3, %v1350_v17  ;;  %1357 = vst.msk [vmem:[%s6964_s14 + $0x10] sm:$0xff] %vm1354_vm3, %v1352_v28 }
  0xc5   : > { %1394 = vst.msk [vmem:[#allocation3 + $0x10] sm:$0xff] %vm1391_vm4, %v1389_v18  ;;  %1392 = vst.msk [vmem:[#allocation3] sm:$0xff] %vm1391_vm4, %v1387_v19  ;;  %v1348_v22 = vpop.permute.xlu1 %1347  ;;  %v1338_v24 = vpop.permute.xlu0 %1337 }
  0xc6   : > { %v1390_v25 = vmul.f32 %v5020_v13, %v1348_v22  ;;  %v1351_v26 = vmul.f32 %v1338_v24, %v1327_v20  ;;  %v1388_v27 = vmul.f32 %v5019_v14, %v1338_v24  ;;  %v1353_v29 = vmul.f32 %v1348_v22, %v1329_v23 }
  0xc8   : > { %1395 = vst.msk [vmem:[#allocation3 + $0x18] sm:$0xff] %vm1391_vm4, %v1390_v25  ;;  %1393 = vst.msk [vmem:[#allocation3 + $0x8] sm:$0xff] %vm1391_vm4, %v1388_v27 }
  0xc9   : > { %1356 = vst.msk [vmem:[%s6964_s14 + $0x8] sm:$0xff] %vm1354_vm3, %v1351_v26  ;;  %1358 = vst.msk [vmem:[%s6964_s14 + $0x18] sm:$0xff] %vm1354_vm3, %v1353_v29 }
  0xca PF: > { %s6965_s18 = sld [smem:[#allocation13_spill]]  ;;  %s6966_s1 = sld [smem:[#allocation12_spill]]  ;;  %vm1437_vm5 = vcmask 261120   ;;  %v5767_v40 = vmov 0.0   ;;  %vm5768_vm6 = vmmov 0   ;;  %vm1575_vm7 = vcmask 64512  }
  0xcb   : > { %s6967_s7 = sld [smem:[#allocation14_spill]]  ;;  %5241 = vmatprep.subr.bf16.mxu0 %v5767_v40  ;;  %5243 = vmatprep.mubr.msk.bf16.mxu0 %vm5768_vm6, %v5767_v40  ;;  %s6968_s23 = sld [smem:[#allocation21_spill]]  ;;  %v6177_v11 = vld [vmem:[#allocation2] sm:$0xff]  ;;  %v6179_v12 = vld [vmem:[#allocation2 + $0x8] sm:$0xff]  ;;  %vm1678_vm9 = vcmask 130048   ;;  %vm2085_vm11 = vcmask 130112  }
  0xcc   : > { %s6970_s2 = sld [smem:[#allocation23_spill]]  ;;  %vm1402_vm8 = vcmp.gt.f32.partialorder %v6177_v11, 0.5  ;;  %vm1403_vm10 = vcmp.gt.f32.partialorder %v6179_v12, 0.5  ;;  %s5769_s29 = smov 120   ;;  %vm2352_vm12 = vcmask 195712   ;;  %vm2619_vm13 = vcmask 261312  }
  0xcd   : > { %s5770_s21 = smov 112   ;;  %s5771_s5 = smov 104   ;;  %vm3258_vm14 = vcmask 1045504   ;;  %vm3208_vm0 = vcmask 97280   ;;  %vm4485_vm4 = vcmask 523264  }
  0xce   : > { %s5772_s9 = smov 8   ;;  %s5773_s17 = smov 16  }
  0xcf   : > { %s5774_s14 = smov 24   ;;  %s6974_s27 = sld [smem:[#allocation10_spill]] }
  0xd0   : > { %v5549_v30 = vld [vmem:[%s6965_s18] sm:$0xff]   ;;  %v5550_v31 = vld [vmem:[%s6965_s18 + $0x8] sm:$0xff]   ;;  %v1398_v34 = vld [vmem:[%s6966_s1 + $0x10] sm:$0xff]  ;;  %s6986_s6 = sld [smem:[#allocation34_spill]]  ;;  %p5110_p9 = scmp.ne.s32.totalorder %s5747_s8, 1 }
  0xd1   : > { %5225 = vmatprep.subr.bf16.mxu1 %v5549_v30  ;;  %v1396_v32 = vld [vmem:[%s6966_s1] sm:$0xff]  ;;  %v1397_v33 = vld [vmem:[%s6966_s1 + $0x8] sm:$0xff]  ;;  %v1399_v36 = vld [vmem:[%s6966_s1 + $0x18] sm:$0xff]  ;;  %s6969_s3 = scalar_lea.vmem %s6968_s23, %s5985_s30  ;;  %s6975_s23 = sld [smem:[#allocation26_spill]] }
  0xd2   : > { %5226 = vmatpush3.bf16.msra.mxu1 %v5549_v30  ;;  %v1412_v35 = vpack.c.bf16 %v1397_v33, %v1396_v32  ;;  %v5551_v37 = vld [vmem:[%s6967_s7] sm:$0xff]   ;;  %v1413_v38 = vpack.c.bf16 %v1399_v36, %v1398_v34  ;;  %v5552_v39 = vld [vmem:[%s6967_s7 + $0x8] sm:$0xff]   ;;  %s6971_s25 = scalar_lea.vmem %s6970_s2, %s5985_s30  ;;  %s6972_s7 = sld [smem:[#allocation25_spill]] }
  0xd3   : > { %5227 = vmatprep.subr.bf16.mxu1 %v5550_v31  ;;  %v5021_v41 = vld [vmem:[%s6969_s3] ss:$0 sm:$0xff]  ;;  %s6977_s2 = sld [smem:[#allocation27_spill]] }
  0xd4   : > { %5229 = vmatprep.mubr.msk.bf16.mxu1 %vm1437_vm5, %v1412_v35  ;;  %v5026_v56 = vld [vmem:[%s6971_s25] ss:$0 sm:$0xff] }
  0xd6   : > { %5228 = vmatpush3.bf16.msra.mxu1 %v5550_v31  ;;  %s6987_s11 = scalar_lea.vmem %s6986_s6, %s5985_s30 }
  0xd7   : > { %5233 = vmatprep.subr.bf16.mxu1 %v5551_v37  ;;  %s6976_s3 = scalar_lea.vmem %s6975_s23, %s5985_s30  ;;  %s6981_s23 = sld [smem:[#allocation31_spill]] }
  0xd8   : > { %s6973_s0 = scalar_lea.vmem %s6972_s7, %s5985_s30  ;;  %s6979_s7 = scalar_lea.vmem %s6873_s15, %s5985_s30 }
  0xd9   : > { %5230 = vmatmul.mubr.msk.bf16.vlgmr.msra.gmra.mrb[0].mxu1 %vm1437_vm5, %v1413_v38  ;;  %s6978_s25 = scalar_lea.vmem %s6977_s2, %s5985_s30 }
  0xda   : > { %5234 = vmatpush3.bf16.msra.mxu1 %v5551_v37  ;;  %5237 = vmatprep.mubr.msk.bf16.mxu1 %vm1437_vm5, %v1412_v35 }
  0xdb   : > { %5235 = vmatprep.subr.bf16.mxu1 %v5552_v39 }
  0xde   : > { %5236 = vmatpush3.bf16.msra.mxu1 %v5552_v39 }
  0xdf   : > { %5247 = vmatprep.subr.bf16.mxu1 %v5767_v40 }
  0xe1   : > { %5238 = vmatmul.mubr.msk.bf16.vlgmr.msra.gmra.mrb[4].mxu1 %vm1437_vm5, %v1413_v38 }
  0xe2   : > { %5249 = vmatprep.mubr.msk.bf16.mxu1 %vm5768_vm6, %v5767_v40 }
 0x1ac   : > { %v5231_v42 = vpop.f32.mrb[0].mxu1 }
 0x1ad   : > { %v1487_v43 = vadd.f32 %v5231_v42, %v5021_v41  ;;  %v1478_v44 = vpop.f32.mrb[1].mxu1 }
 0x1ae   : > { %v1479_v45 = vadd.f32 %v5021_v41, %v1478_v44  ;;  %v5232_v46 = vpop.f32.mrb[2].mxu1 }
 0x1af   : > { %v1490_v47 = vadd.f32 %v5232_v46, %v5021_v41  ;;  %v1481_v48 = vpop.f32.mrb[3].mxu1  ;;  %v1567_v50 = vmul.f32 0.35355338, %v1487_v43 }
 0x1b0   : > { %v1482_v49 = vadd.f32 %v5021_v41, %v1481_v48  ;;  %v1565_v53 = vmul.f32 0.35355338, %v1479_v45 }
 0x1b1   : > { %v1568_v51 = vmul.f32 0.35355338, %v1490_v47  ;;  %v6142_v52 = vpack.c.bf16 %v1490_v47, %v1487_v43 }
 0x1b2   : > { %v1566_v54 = vmul.f32 0.35355338, %v1482_v49  ;;  %v6144_v55 = vpack.c.bf16 %v1482_v49, %v1479_v45 }
 0x1b3   : > { %v6151_v57 = vpack.c.bf16 %v1568_v51, %v1567_v50  ;;  %v1627_v58 = vsel %vm1575_vm7, %v6142_v52, 0 }
 0x1b4   : > { %v6155_v59 = vpack.c.bf16 %v1566_v54, %v1565_v53  ;;  %5248 = vmatpush3.bf16.xpose.msra.mxu1 %v1627_v58  ;;  %v1580_v60 = vsel %vm1575_vm7, %v6144_v55, 0  ;;  %v5239_v61 = vpop.f32.mrb[4].mxu1 }
 0x1b5   : > { %5242 = vmatpush3.bf16.xpose.msra.mxu0 %v1580_v60  ;;  %v1559_v62 = vadd.f32 %v5239_v61, %v5026_v56  ;;  %v1550_v63 = vpop.f32.mrb[5].mxu1  ;;  %5259 = vmatprep.subr.bf16.mxu1 %v5767_v40 }
 0x1b6   : > { %v1551_v4 = vadd.f32 %v5026_v56, %v1550_v63  ;;  %v5240_v5 = vpop.f32.mrb[6].mxu1  ;;  %5253 = vmatprep.subr.bf16.mxu0 %v5767_v40 }
 0x1b7   : > { %v1562_v6 = vadd.f32 %v5240_v5, %v5026_v56  ;;  %v1553_v7 = vpop.f32.mrb[7].mxu1 }
 0x1b8   : > { %v1554_v8 = vadd.f32 %v5026_v56, %v1553_v7 }
 0x1b9   : > { %v6161_v9 = vpack.c.bf16 %v1562_v6, %v1559_v62 }
 0x1ba   : > { %v6163_v10 = vpack.c.bf16 %v1554_v8, %v1551_v4 }
 0x1bb   : > { %5250 = vmatmul.mubr.msk.bf16.vlgmr.msra.gmra.mrb[8].mxu1 %vm1575_vm7, %v6151_v57 }
 0x1bc   : > { %5244 = vmatmul.mubr.msk.bf16.vlgmr.msra.gmra.mrb[0].mxu0 %vm1575_vm7, %v6155_v59  ;;  %5260 = vmatpush3.bf16.msra.mxu1 %v6161_v9 }
 0x1bd   : > { %5254 = vmatpush3.bf16.msra.mxu0 %v6163_v10  ;;  %5261 = vmatprep.mubr.msk.bf16.mxu1 %vm5768_vm6, %v5767_v40 }
 0x1be   : > { %5271 = vmatprep.subr.bf16.mxu1 %v5767_v40  ;;  %5255 = vmatprep.mubr.msk.bf16.mxu0 %vm5768_vm6, %v5767_v40 }
 0x1bf   : > { %5265 = vmatprep.subr.bf16.mxu0 %v5767_v40 }
 0x28e   : > { %v1663_v13 = vpop.f32.mrb[8].mxu1 }
 0x28f   : > { %v1676_v14 = vsel %vm1402_vm8, %v1663_v13, -10000.0  ;;  %v1616_v15 = vpop.f32.mrb[0].mxu0  ;;  %v5251_v16 = vpop.f32.mrb[9].mxu1 }
 0x290   : > { %v1674_v17 = vsel %vm1402_vm8, %v1616_v15, -10000.0  ;;  %v5245_v18 = vpop.f32.mrb[1].mxu0  ;;  %v1666_v19 = vpop.f32.mrb[10].mxu1  ;;  %v1685_v20 = vsel %vm1678_vm9, %v1676_v14, -inf }
 0x291   : > { %v1677_v21 = vsel %vm1403_vm10, %v1666_v19, -10000.0  ;;  %1686 = vmax.xlane.f32.xlu1 %v1685_v20  ;;  %v1619_v22 = vpop.f32.mrb[2].mxu0  ;;  %v5252_v23 = vpop.f32.mrb[11].mxu1  ;;  %v1679_v24 = vsel %vm1678_vm9, %v1674_v17, -inf }
 0x292   : > { %v1675_v25 = vsel %vm1403_vm10, %v1619_v22, -10000.0  ;;  %1680 = vmax.xlane.f32.xlu0 %v1679_v24  ;;  %v5246_v26 = vpop.f32.mrb[3].mxu0  ;;  %v1688_v27 = vsel %vm1678_vm9, %v1677_v21, -inf }
 0x293   : > { %v1682_v28 = vsel %vm1678_vm9, %v1675_v25, -inf }
 0x295   : > { %1689 = vmax.xlane.f32.xlu1 %v1688_v27 }
 0x296   : > { %1683 = vmax.xlane.f32.xlu0 %v1682_v28 }
 0x2a6   : > { %1874 = vrot.lane.b32.xlu1 %v6142_v52, %s5769_s29 }
 0x31e   : > { %v1687_v29 = vpop.xlane.xlu1 %1686 }
 0x31f   : > { %v1693_v30 = vsub.f32 %v1676_v14, %v1687_v29  ;;  %v1681_v31 = vpop.xlane.xlu0 %1680 }
 0x320   : > { %v1691_v32 = vsub.f32 %v1674_v17, %v1681_v31 }
 0x321   : > { %v1699_v33 = vmul.f32 1.442695, %v1693_v30 }
 0x322   : > { %v1695_v34 = vmul.f32 1.442695, %v1691_v32  ;;  %v1690_v35 = vpop.xlane.xlu1 %1689 }
 0x323   : > { %5569 = vpow2.f32 %v1699_v33  ;;  %v1694_v36 = vsub.f32 %v1677_v21, %v1690_v35  ;;  %v1684_v37 = vpop.xlane.xlu0 %1683 }
 0x324   : > { %v1692_v38 = vsub.f32 %v1675_v25, %v1684_v37  ;;  %5571 = vpow2.f32 %v1695_v34 }
 0x325   : > { %v1701_v39 = vmul.f32 1.442695, %v1694_v36 }
 0x326   : > { %v1697_v41 = vmul.f32 1.442695, %v1692_v38  ;;  %v1875_v50 = vpop.permute.xlu1 %1874 }
 0x327   : > { %5573 = vpow2.f32 %v1701_v39  ;;  %v1880_v6 = vsel %vm1575_vm7, %v1875_v50, 0 }
 0x328   : > { %5575 = vpow2.f32 %v1697_v41 }
 0x32d   : > { %v5570_v42 = vpop.eup %5569 }
 0x32e   : > { %v1709_v43 = vsel %vm1678_vm9, %v5570_v42, 0.0  ;;  %v5572_v44 = vpop.eup %5571 }
 0x32f   : > { %1710 = vadd.xlane.f32.xlu0 %v1709_v43  ;;  %v1703_v47 = vsel %vm1678_vm9, %v5572_v44, 0.0 }
 0x331   : > { %v5574_v45 = vpop.eup %5573 }
 0x332   : > { %v1712_v46 = vsel %vm1678_vm9, %v5574_v45, 0.0  ;;  %v5576_v48 = vpop.eup %5575 }
 0x333   : > { %1713 = vadd.xlane.f32.xlu1 %v1712_v46  ;;  %1704 = vadd.xlane.f32.xlu0 %v1703_v47  ;;  %v1706_v49 = vsel %vm1678_vm9, %v5576_v48, 0.0 }
 0x337   : > { %1707 = vadd.xlane.f32.xlu1 %v1706_v49 }
 0x348   : > { %1818 = vrot.lane.b32.xlu1 %v6155_v59, %s5769_s29 }
 0x349   : > { %1821 = vrot.lane.b32.xlu0 %v6144_v55, %s5769_s29 }
 0x34c   : > { %1871 = vrot.lane.b32.xlu1 %v6151_v57, %s5769_s29 }
 0x3bc   : > { %v1711_v51 = vpop.xlane.xlu0 %1710 }
 0x3bd   : > { %5577 = vrcp.f32 %v1711_v51 }
 0x3c0   : > { %v1714_v53 = vpop.xlane.xlu1 %1713  ;;  %v1705_v54 = vpop.xlane.xlu0 %1704 }
 0x3c1   : > { %5579 = vrcp.f32 %v1714_v53 }
 0x3c2   : > { %5581 = vrcp.f32 %v1705_v54 }
 0x3c4   : > { %v1708_v56 = vpop.xlane.xlu1 %1707  ;;  %v1822_v13 = vpop.permute.xlu0 %1821 }
 0x3c5   : > { %5583 = vrcp.f32 %v1708_v56  ;;  %v1827_v16 = vsel %vm1575_vm7, %v1822_v13, 0 }
 0x3c7   : > { %v5578_v58 = vpop.eup %5577 }
 0x3c8   : > { %v1721_v61 = vmul.f32 %v5578_v58, %v5570_v42  ;;  %v1819_v14 = vpop.permute.xlu1 %1818 }
 0x3cb   : > { %v5580_v60 = vpop.eup %5579 }
 0x3cc   : > { %v1722_v62 = vmul.f32 %v5580_v60, %v5574_v45  ;;  %v5582_v63 = vpop.eup %5581  ;;  %v1872_v17 = vpop.permute.xlu1 %1871 }
 0x3cd   : > { %v1719_v7 = vmul.f32 %v5582_v63, %v5572_v44 }
 0x3ce   : > { %v1724_v4 = vpack.c.bf16 %v1722_v62, %v1721_v61 }
 0x3cf   : > { %v5584_v5 = vpop.eup %5583 }
 0x3d0   : > { %v1720_v8 = vmul.f32 %v5584_v5, %v5576_v48  ;;  %5262 = vmatmul.mubr.msk.bf16.vlgmr.msra.gmra.mrb[12].mxu1 %vm1678_vm9, %v1724_v4 }
 0x3d1   : > { %5272 = vmatpush3.bf16.xpose.msra.mxu1 %v1880_v6  ;;  %5273 = vmatprep.mubr.msk.bf16.mxu1 %vm5768_vm6, %v5767_v40 }
 0x3d2   : > { %v1723_v15 = vpack.c.bf16 %v1720_v8, %v1719_v7  ;;  %5283 = vmatprep.subr.bf16.mxu1 %v5767_v40 }
 0x3d4   : > { %5256 = vmatmul.mubr.msk.bf16.vlgmr.msra.gmra.mrb[4].mxu0 %vm1678_vm9, %v1723_v15 }
 0x3d5   : > { %5266 = vmatpush3.bf16.xpose.msra.mxu0 %v1827_v16  ;;  %5267 = vmatprep.mubr.msk.bf16.mxu0 %vm5768_vm6, %v5767_v40 }
 0x3d6   : > { %5277 = vmatprep.subr.bf16.mxu0 %v5767_v40 }
 0x3d8   : > { %5274 = vmatmul.mubr.msk.bf16.vlgmr.msra.gmra.mrb[16].mxu1 %vm1575_vm7, %v1872_v17 }
 0x3d9   : > { %5285 = vmatprep.mubr.msk.bf16.mxu1 %vm5768_vm6, %v5767_v40 }
 0x3dc   : > { %5268 = vmatmul.mubr.msk.bf16.vlgmr.msra.gmra.mrb[8].mxu0 %vm1575_vm7, %v1819_v14 }
 0x3dd   : > { %5279 = vmatprep.mubr.msk.bf16.mxu0 %vm5768_vm6, %v5767_v40 }
 0x4a3   : > { %v1806_v18 = vpop.f32.mrb[12].mxu1 }
 0x4a4   : > { %1815 = vst.msk [vmem:[#allocation4 + $0x10] sm:$0xff] %vm1575_vm7, %v1806_v18  ;;  %v5263_v19 = vpop.f32.mrb[13].mxu1 }
 0x4a5   : > { %v1809_v20 = vpop.f32.mrb[14].mxu1 }
 0x4a6   : > { %1816 = vst.msk [vmem:[#allocation4 + $0x18] sm:$0xff] %vm1575_vm7, %v1809_v20  ;;  %v5264_v21 = vpop.f32.mrb[15].mxu1 }
 0x4a7   : > { %v1762_v22 = vpop.f32.mrb[4].mxu0 }
 0x4a8   : > { %1813 = vst.msk [vmem:[#allocation4] sm:$0xff] %vm1575_vm7, %v1762_v22  ;;  %v5257_v23 = vpop.f32.mrb[5].mxu0 }
 0x4a9   : > { %v1765_v24 = vpop.f32.mrb[6].mxu0 }
 0x4aa   : > { %1814 = vst.msk [vmem:[#allocation4 + $0x8] sm:$0xff] %vm1575_vm7, %v1765_v24  ;;  %v5258_v25 = vpop.f32.mrb[7].mxu0 }
 0x4ab   : > { %v1916_v26 = vpop.f32.mrb[16].mxu1 }
 0x4ac   : > { %v5275_v27 = vpop.f32.mrb[17].mxu1  ;;  %v1925_v35 = vsel %vm1402_vm8, %v1916_v26, -10000.0 }
 0x4ad   : > { %v1919_v28 = vpop.f32.mrb[18].mxu1  ;;  %v1933_v39 = vsel %vm1678_vm9, %v1925_v35, -inf }
 0x4ae   : > { %v5276_v29 = vpop.f32.mrb[19].mxu1  ;;  %v1926_v41 = vsel %vm1403_vm10, %v1919_v28, -10000.0 }
 0x4af   : > { %v1863_v30 = vpop.f32.mrb[8].mxu0  ;;  %v1936_v42 = vsel %vm1678_vm9, %v1926_v41, -inf }
 0x4b0   : > { %v1923_v31 = vsel %vm1402_vm8, %v1863_v30, -10000.0  ;;  %v5269_v32 = vpop.f32.mrb[9].mxu0 }
 0x4b1   : > { %v1866_v33 = vpop.f32.mrb[10].mxu0  ;;  %v1927_v34 = vsel %vm1678_vm9, %v1923_v31, -inf }
 0x4b2   : > { %v1924_v36 = vsel %vm1403_vm10, %v1866_v33, -10000.0  ;;  %1928 = vmax.xlane.f32.xlu0 %v1927_v34  ;;  %v5270_v37 = vpop.f32.mrb[11].mxu0 }
 0x4b3   : > { %v1930_v38 = vsel %vm1678_vm9, %v1924_v36, -inf }
 0x4b4   : > { %1931 = vmax.xlane.f32.xlu1 %v1930_v38 }
 0x4b6   : > { %1934 = vmax.xlane.f32.xlu0 %v1933_v39 }
 0x4ba   : > { %1937 = vmax.xlane.f32.xlu0 %v1936_v42 }
 0x4c5   : > { %2022 = vrot.lane.b32.xlu1 %v6161_v9, %s5769_s29 }
 0x4c9   : > { %2092 = vrot.lane.b32.xlu1 %v6144_v55, %s5770_s21 }
 0x53f   : > { %v1929_v43 = vpop.xlane.xlu0 %1928 }
 0x540   : > { %v1939_v45 = vsub.f32 %v1923_v31, %v1929_v43 }
 0x541   : > { %v1932_v44 = vpop.xlane.xlu1 %1931 }
 0x542   : > { %v1943_v49 = vmul.f32 1.442695, %v1939_v45  ;;  %v1940_v50 = vsub.f32 %v1924_v36, %v1932_v44 }
 0x543   : > { %v1935_v46 = vpop.xlane.xlu0 %1934 }
 0x544   : > { %v1941_v47 = vsub.f32 %v1925_v35, %v1935_v46  ;;  %v1945_v56 = vmul.f32 1.442695, %v1940_v50 }
 0x545   : > { %v2023_v48 = vpop.permute.xlu1 %2022 }
 0x546   : > { %v1947_v51 = vmul.f32 1.442695, %v1941_v47  ;;  %5284 = vmatpush3.bf16.msra.mxu1 %v2023_v48 }
 0x547   : > { %v1938_v53 = vpop.xlane.xlu0 %1937  ;;  %5295 = vmatprep.subr.bf16.mxu1 %v5767_v40 }
 0x548   : > { %5585 = vpow2.f32 %v1947_v51  ;;  %v1942_v54 = vsub.f32 %v1926_v41, %v1938_v53 }
 0x549   : > { %5587 = vpow2.f32 %v1943_v49  ;;  %v2093_v8 = vpop.permute.xlu1 %2092 }
 0x54a   : > { %v1949_v58 = vmul.f32 1.442695, %v1942_v54  ;;  %v2098_v30 = vsel %vm1575_vm7, %v2093_v8, 0 }
 0x54c   : > { %5589 = vpow2.f32 %v1949_v58 }
 0x54d   : > { %5591 = vpow2.f32 %v1945_v56 }
 0x552   : > { %v5586_v60 = vpop.eup %5585 }
 0x553   : > { %v1957_v61 = vsel %vm1678_vm9, %v5586_v60, 0.0  ;;  %v5588_v62 = vpop.eup %5587 }
 0x554   : > { %1958 = vadd.xlane.f32.xlu0 %v1957_v61  ;;  %v1951_v4 = vsel %vm1678_vm9, %v5588_v62, 0.0 }
 0x556   : > { %v5590_v63 = vpop.eup %5589 }
 0x557   : > { %v1960_v5 = vsel %vm1678_vm9, %v5590_v63, 0.0  ;;  %v5592_v6 = vpop.eup %5591 }
 0x558   : > { %1952 = vadd.xlane.f32.xlu0 %v1951_v4  ;;  %1961 = vadd.xlane.f32.xlu1 %v1960_v5  ;;  %v1954_v7 = vsel %vm1678_vm9, %v5592_v6, 0.0 }
 0x55c   : > { %1955 = vadd.xlane.f32.xlu1 %v1954_v7 }
 0x56d   : > { %2143 = vrot.lane.b32.xlu1 %v6142_v52, %s5770_s21 }
 0x56e   : > { %1974 = vrot.lane.b32.xlu0 %v6163_v10, %s5769_s29 }
 0x571   : > { %2141 = vrot.lane.b32.xlu1 %v6151_v57, %s5770_s21 }
 0x572   : > { %2090 = vrot.lane.b32.xlu0 %v6155_v59, %s5770_s21 }
 0x5e1   : > { %v1959_v13 = vpop.xlane.xlu0 %1958 }
 0x5e2   : > { %5593 = vrcp.f32 %v1959_v13 }
 0x5e5   : > { %v1953_v14 = vpop.xlane.xlu0 %1952  ;;  %v1962_v15 = vpop.xlane.xlu1 %1961 }
 0x5e6   : > { %5595 = vrcp.f32 %v1962_v15 }
 0x5e7   : > { %5597 = vrcp.f32 %v1953_v14 }
 0x5e9   : > { %v1975_v16 = vpop.permute.xlu0 %1974  ;;  %v1956_v17 = vpop.xlane.xlu1 %1955 }
 0x5ea   : > { %5599 = vrcp.f32 %v1956_v17  ;;  %5278 = vmatpush3.bf16.msra.mxu0 %v1975_v16 }
 0x5eb   : > { %5289 = vmatprep.subr.bf16.mxu0 %v5767_v40 }
 0x5ec   : > { %v5594_v18 = vpop.eup %5593 }
 0x5ed   : > { %v1969_v21 = vmul.f32 %v5594_v18, %v5586_v60  ;;  %v2144_v23 = vpop.permute.xlu1 %2143  ;;  %v2091_v32 = vpop.permute.xlu0 %2090 }
 0x5ee   : > { %v2149_v28 = vsel %vm1575_vm7, %v2144_v23, 0 }
 0x5f0   : > { %v5596_v19 = vpop.eup %5595 }
 0x5f1   : > { %v5598_v20 = vpop.eup %5597  ;;  %v1970_v22 = vmul.f32 %v5596_v19, %v5590_v63  ;;  %v2142_v31 = vpop.permute.xlu1 %2141 }
 0x5f2   : > { %v1967_v26 = vmul.f32 %v5598_v20, %v5588_v62 }
 0x5f3   : > { %v1972_v25 = vpack.c.bf16 %v1970_v22, %v1969_v21 }
 0x5f4   : > { %v5600_v24 = vpop.eup %5599 }
 0x5f5   : > { %v1968_v27 = vmul.f32 %v5600_v24, %v5592_v6  ;;  %5286 = vmatmul.mubr.msk.bf16.vlgmr.msra.gmra.mrb[20].mxu1 %vm1678_vm9, %v1972_v25 }
 0x5f6   : > { %5296 = vmatpush3.bf16.xpose.msra.mxu1 %v2149_v28  ;;  %5297 = vmatprep.mubr.msk.bf16.mxu1 %vm5768_vm6, %v5767_v40 }
 0x5f7   : > { %v1971_v29 = vpack.c.bf16 %v1968_v27, %v1967_v26  ;;  %5307 = vmatprep.subr.bf16.mxu1 %v5767_v40 }
 0x5f9   : > { %5280 = vmatmul.mubr.msk.bf16.vlgmr.msra.gmra.mrb[12].mxu0 %vm1678_vm9, %v1971_v29 }
 0x5fa   : > { %5290 = vmatpush3.bf16.xpose.msra.mxu0 %v2098_v30  ;;  %5291 = vmatprep.mubr.msk.bf16.mxu0 %vm5768_vm6, %v5767_v40 }
 0x5fb   : > { %5301 = vmatprep.subr.bf16.mxu0 %v5767_v40 }
 0x5fd   : > { %5298 = vmatmul.mubr.msk.bf16.vlgmr.msra.gmra.mrb[24].mxu1 %vm1575_vm7, %v2142_v31 }
 0x5fe   : > { %5309 = vmatprep.mubr.msk.bf16.mxu1 %vm5768_vm6, %v5767_v40 }
 0x601   : > { %5292 = vmatmul.mubr.msk.bf16.vlgmr.msra.gmra.mrb[16].mxu0 %vm1575_vm7, %v2091_v32 }
 0x602   : > { %5303 = vmatprep.mubr.msk.bf16.mxu0 %vm5768_vm6, %v5767_v40 }
 0x6c8   : > { %v6273_v33 = vpop.f32.mrb[20].mxu1 }
 0x6c9   : > { %v5287_v34 = vpop.f32.mrb[21].mxu1 }
 0x6ca   : > { %v6275_v35 = vpop.f32.mrb[22].mxu1 }
 0x6cb   : > { %v5288_v36 = vpop.f32.mrb[23].mxu1 }
 0x6cc   : > { %v6277_v37 = vpop.f32.mrb[12].mxu0 }
 0x6cd   : > { %v5281_v38 = vpop.f32.mrb[13].mxu0 }
 0x6ce   : > { %v6279_v39 = vpop.f32.mrb[14].mxu0 }
 0x6cf   : > { %v5282_v41 = vpop.f32.mrb[15].mxu0 }
 0x6d0   : > { %v2185_v42 = vpop.f32.mrb[24].mxu1 }
 0x6d1   : > { %v5299_v43 = vpop.f32.mrb[25].mxu1  ;;  %v2194_v51 = vsel %vm1402_vm8, %v2185_v42, -10000.0 }
 0x6d2   : > { %v2188_v44 = vpop.f32.mrb[26].mxu1  ;;  %v2202_v58 = vsel %vm1678_vm9, %v2194_v51, -inf }
 0x6d3   : > { %v5300_v45 = vpop.f32.mrb[27].mxu1  ;;  %v2195_v60 = vsel %vm1403_vm10, %v2188_v44, -10000.0 }
 0x6d4   : > { %v2134_v46 = vpop.f32.mrb[16].mxu0  ;;  %v2205_v61 = vsel %vm1678_vm9, %v2195_v60, -inf }
 0x6d5   : > { %v2192_v47 = vsel %vm1402_vm8, %v2134_v46, -10000.0  ;;  %v5293_v48 = vpop.f32.mrb[17].mxu0 }
 0x6d6   : > { %v2137_v49 = vpop.f32.mrb[18].mxu0  ;;  %v2196_v50 = vsel %vm1678_vm9, %v2192_v47, -inf }
 0x6d7   : > { %v2193_v53 = vsel %vm1403_vm10, %v2137_v49, -10000.0  ;;  %2197 = vmax.xlane.f32.xlu0 %v2196_v50  ;;  %v5294_v54 = vpop.f32.mrb[19].mxu0 }
 0x6d8   : > { %v2199_v56 = vsel %vm1678_vm9, %v2193_v53, -inf }
 0x6d9   : > { %2200 = vmax.xlane.f32.xlu1 %v2199_v56 }
 0x6db   : > { %2203 = vmax.xlane.f32.xlu0 %v2202_v58 }
 0x6df   : > { %2206 = vmax.xlane.f32.xlu0 %v2205_v61 }
 0x6ea   : > { %2289 = vrot.lane.b32.xlu1 %v6161_v9, %s5770_s21 }
 0x6ee   : > { %2359 = vrot.lane.b32.xlu1 %v6144_v55, %s5771_s5 }
 0x764   : > { %v2198_v62 = vpop.xlane.xlu0 %2197 }
 0x765   : > { %v2208_v4 = vsub.f32 %v2192_v47, %v2198_v62 }
 0x766   : > { %v2201_v63 = vpop.xlane.xlu1 %2200 }
 0x767   : > { %v2212_v8 = vmul.f32 1.442695, %v2208_v4  ;;  %v2209_v13 = vsub.f32 %v2193_v53, %v2201_v63 }
 0x768   : > { %v2204_v5 = vpop.xlane.xlu0 %2203 }
 0x769   : > { %v2210_v6 = vsub.f32 %v2194_v51, %v2204_v5  ;;  %v2214_v17 = vmul.f32 1.442695, %v2209_v13 }
 0x76a   : > { %v2290_v7 = vpop.permute.xlu1 %2289 }
 0x76b   : > { %v2216_v14 = vmul.f32 1.442695, %v2210_v6  ;;  %5308 = vmatpush3.bf16.msra.mxu1 %v2290_v7 }
 0x76c   : > { %v2207_v15 = vpop.xlane.xlu0 %2206  ;;  %5319 = vmatprep.subr.bf16.mxu1 %v5767_v40 }
 0x76d   : > { %5601 = vpow2.f32 %v2216_v14  ;;  %v2211_v16 = vsub.f32 %v2195_v60, %v2207_v15 }
 0x76e   : > { %5603 = vpow2.f32 %v2212_v8  ;;  %v2360_v26 = vpop.permute.xlu1 %2359 }
 0x76f   : > { %v2218_v18 = vmul.f32 1.442695, %v2211_v16  ;;  %v2365_v46 = vsel %vm1575_vm7, %v2360_v26, 0 }
 0x771   : > { %5605 = vpow2.f32 %v2218_v18 }
 0x772   : > { %5607 = vpow2.f32 %v2214_v17 }
 0x777   : > { %v5602_v55 = vpop.eup %5601 }
 0x778   : > { %v2226_v19 = vsel %vm1678_vm9, %v5602_v55, 0.0  ;;  %v5604_v20 = vpop.eup %5603 }
 0x779   : > { %2227 = vadd.xlane.f32.xlu0 %v2226_v19  ;;  %v2220_v22 = vsel %vm1678_vm9, %v5604_v20, 0.0 }
 0x77b   : > { %v5606_v21 = vpop.eup %5605 }
 0x77c   : > { %v2229_v23 = vsel %vm1678_vm9, %v5606_v21, 0.0  ;;  %v5608_v24 = vpop.eup %5607 }
 0x77d   : > { %2221 = vadd.xlane.f32.xlu0 %v2220_v22  ;;  %2230 = vadd.xlane.f32.xlu1 %v2229_v23  ;;  %v2223_v25 = vsel %vm1678_vm9, %v5608_v24, 0.0 }
 0x781   : > { %2224 = vadd.xlane.f32.xlu1 %v2223_v25 }
 0x792   : > { %2410 = vrot.lane.b32.xlu1 %v6142_v52, %s5771_s5 }
 0x793   : > { %2242 = vrot.lane.b32.xlu0 %v6163_v10, %s5770_s21 }
 0x796   : > { %2408 = vrot.lane.b32.xlu1 %v6151_v57, %s5771_s5 }
 0x797   : > { %2357 = vrot.lane.b32.xlu0 %v6155_v59, %s5771_s5 }
 0x806   : > { %v2228_v27 = vpop.xlane.xlu0 %2227 }
 0x807   : > { %5609 = vrcp.f32 %v2228_v27 }
 0x80a   : > { %v2222_v28 = vpop.xlane.xlu0 %2221  ;;  %v2231_v29 = vpop.xlane.xlu1 %2230 }
 0x80b   : > { %5611 = vrcp.f32 %v2231_v29 }
 0x80c   : > { %5613 = vrcp.f32 %v2222_v28 }
 0x80e   : > { %v2243_v30 = vpop.permute.xlu0 %2242  ;;  %v2225_v31 = vpop.xlane.xlu1 %2224 }
 0x80f   : > { %5615 = vrcp.f32 %v2225_v31  ;;  %5302 = vmatpush3.bf16.msra.mxu0 %v2243_v30 }
 0x810   : > { %5313 = vmatprep.subr.bf16.mxu0 %v5767_v40 }
 0x811   : > { %v5610_v52 = vpop.eup %5609 }
 0x812   : > { %v2238_v57 = vmul.f32 %v5610_v52, %v5602_v55  ;;  %v2411_v38 = vpop.permute.xlu1 %2410  ;;  %v2358_v48 = vpop.permute.xlu0 %2357 }
 0x813   : > { %v2416_v44 = vsel %vm1575_vm7, %v2411_v38, 0 }
 0x815   : > { %v5612_v32 = vpop.eup %5611 }
 0x816   : > { %v5614_v34 = vpop.eup %5613  ;;  %v2239_v36 = vmul.f32 %v5612_v32, %v5606_v21  ;;  %v2409_v47 = vpop.permute.xlu1 %2408 }
 0x817   : > { %v2236_v42 = vmul.f32 %v5614_v34, %v5604_v20 }
 0x818   : > { %v2241_v41 = vpack.c.bf16 %v2239_v36, %v2238_v57 }
 0x819   : > { %v5616_v59 = vpop.eup %5615 }
 0x81a   : > { %v2237_v43 = vmul.f32 %v5616_v59, %v5608_v24  ;;  %5310 = vmatmul.mubr.msk.bf16.vlgmr.msra.gmra.mrb[28].mxu1 %vm1678_vm9, %v2241_v41 }
 0x81b   : > { %5320 = vmatpush3.bf16.xpose.msra.mxu1 %v2416_v44  ;;  %5321 = vmatprep.mubr.msk.bf16.mxu1 %vm5768_vm6, %v5767_v40 }
 0x81c   : > { %v2240_v45 = vpack.c.bf16 %v2237_v43, %v2236_v42  ;;  %5331 = vmatprep.subr.bf16.mxu1 %v5767_v40 }
 0x81e   : > { %5304 = vmatmul.mubr.msk.bf16.vlgmr.msra.gmra.mrb[20].mxu0 %vm1678_vm9, %v2240_v45 }
 0x81f   : > { %5314 = vmatpush3.bf16.xpose.msra.mxu0 %v2365_v46  ;;  %5315 = vmatprep.mubr.msk.bf16.mxu0 %vm5768_vm6, %v5767_v40 }
 0x820   : > { %5325 = vmatprep.subr.bf16.mxu0 %v5767_v40 }
 0x822   : > { %5322 = vmatmul.mubr.msk.bf16.vlgmr.msra.gmra.mrb[32].mxu1 %vm1575_vm7, %v2409_v47 }
 0x823   : > { %5333 = vmatprep.mubr.msk.bf16.mxu1 %vm5768_vm6, %v5767_v40 }
 0x826   : > { %5316 = vmatmul.mubr.msk.bf16.vlgmr.msra.gmra.mrb[24].mxu0 %vm1575_vm7, %v2358_v48 }
 0x827   : > { %5327 = vmatprep.mubr.msk.bf16.mxu0 %vm5768_vm6, %v5767_v40 }
 0x8ed   : > { %v6327_v49 = vpop.f32.mrb[28].mxu1 }
 0x8ee   : > { %v5311_v50 = vpop.f32.mrb[29].mxu1 }
 0x8ef   : > { %v6329_v51 = vpop.f32.mrb[30].mxu1 }
 0x8f0   : > { %v5312_v53 = vpop.f32.mrb[31].mxu1 }
 0x8f1   : > { %v2282_v54 = vpop.f32.mrb[20].mxu0 }
 0x8f2   : > { %v5305_v56 = vpop.f32.mrb[21].mxu0 }
 0x8f3   : > { %v2285_v58 = vpop.f32.mrb[22].mxu0 }
 0x8f4   : > { %v5306_v60 = vpop.f32.mrb[23].mxu0 }
 0x8f5   : > { %v2452_v61 = vpop.f32.mrb[32].mxu1 }
 0x8f6   : > { %v5323_v62 = vpop.f32.mrb[33].mxu1  ;;  %v2461_v14 = vsel %vm1402_vm8, %v2452_v61, -10000.0 }
 0x8f7   : > { %v2455_v63 = vpop.f32.mrb[34].mxu1  ;;  %v2469_v18 = vsel %vm1678_vm9, %v2461_v14, -inf  ;;  %v5553_v62 = vld [vmem:[%s6011_s24] sm:$0xff]  }
 0x8f8   : > { %v5324_v4 = vpop.f32.mrb[35].mxu1  ;;  %v2462_v55 = vsel %vm1403_vm10, %v2455_v63, -10000.0  ;;  %v5554_v63 = vld [vmem:[%s6011_s24 + $0x8] sm:$0xff]   ;;  %s6988_s24 = sld [smem:[#allocation35_spill]] }
 0x8f9   : > { %v2401_v5 = vpop.f32.mrb[24].mxu0  ;;  %v2472_v19 = vsel %vm1678_vm9, %v2462_v55, -inf }
 0x8fa   : > { %v2459_v6 = vsel %vm1402_vm8, %v2401_v5, -10000.0  ;;  %v5317_v7 = vpop.f32.mrb[25].mxu0 }
 0x8fb   : > { %v2404_v8 = vpop.f32.mrb[26].mxu0  ;;  %v2463_v13 = vsel %vm1678_vm9, %v2459_v6, -inf }
 0x8fc   : > { %v2460_v15 = vsel %vm1403_vm10, %v2404_v8, -10000.0  ;;  %2464 = vmax.xlane.f32.xlu0 %v2463_v13  ;;  %v5318_v16 = vpop.f32.mrb[27].mxu0 }
 0x8fd   : > { %v2466_v17 = vsel %vm1678_vm9, %v2460_v15, -inf }
 0x8fe   : > { %2467 = vmax.xlane.f32.xlu1 %v2466_v17  ;;  %s6989_s18 = scalar_lea.vmem %s6988_s24, %s5985_s30 }
 0x900   : > { %2470 = vmax.xlane.f32.xlu0 %v2469_v18 }
 0x904   : > { %2473 = vmax.xlane.f32.xlu0 %v2472_v19 }
 0x989   : > { %v2465_v20 = vpop.xlane.xlu0 %2464 }
 0x98a   : > { %v2475_v11 = vsub.f32 %v2459_v6, %v2465_v20 }
 0x98b   : > { %v2468_v21 = vpop.xlane.xlu1 %2467 }
 0x98c   : > { %v2479_v24 = vmul.f32 1.442695, %v2475_v11  ;;  %v2476_v25 = vsub.f32 %v2460_v15, %v2468_v21 }
 0x98d   : > { %v2471_v22 = vpop.xlane.xlu0 %2470 }
 0x98e   : > { %v2477_v23 = vsub.f32 %v2461_v14, %v2471_v22  ;;  %v2481_v29 = vmul.f32 1.442695, %v2476_v25 }
 0x990   : > { %v2483_v26 = vmul.f32 1.442695, %v2477_v23 }
 0x991   : > { %v2474_v27 = vpop.xlane.xlu0 %2473 }
 0x992   : > { %5617 = vpow2.f32 %v2483_v26  ;;  %v2478_v28 = vsub.f32 %v2462_v55, %v2474_v27 }
 0x993   : > { %5619 = vpow2.f32 %v2479_v24  ;;  %v5047_v24 = vld [vmem:[%s6973_s0] ss:$0 sm:$0xff] }
 0x994   : > { %v2485_v30 = vmul.f32 1.442695, %v2478_v28 }
 0x996   : > { %5621 = vpow2.f32 %v2485_v30 }
 0x997   : > { %5623 = vpow2.f32 %v2481_v29 }
 0x99c   : > { %v5618_v12 = vpop.eup %5617 }
 0x99d   : > { %v2493_v31 = vsel %vm1678_vm9, %v5618_v12, 0.0  ;;  %v5620_v52 = vpop.eup %5619 }
 0x99e   : > { %2494 = vadd.xlane.f32.xlu0 %v2493_v31  ;;  %v2487_v34 = vsel %vm1678_vm9, %v5620_v52, 0.0  ;;  %v5721_v31 = vld [vmem:[%s6966_s1] sm:$0xff] }
 0x9a0   : > { %v5622_v32 = vpop.eup %5621 }
 0x9a1   : > { %v2496_v57 = vsel %vm1678_vm9, %v5622_v32, 0.0  ;;  %v5624_v36 = vpop.eup %5623 }
 0x9a2   : > { %2488 = vadd.xlane.f32.xlu0 %v2487_v34  ;;  %2497 = vadd.xlane.f32.xlu1 %v2496_v57  ;;  %v2490_v38 = vsel %vm1678_vm9, %v5624_v36, 0.0  ;;  %v5722_v57 = vld [vmem:[%s6966_s1 + $0x8] sm:$0xff] }
 0x9a6   : > { %2491 = vadd.xlane.f32.xlu1 %v2490_v38  ;;  %v5723_v38 = vld [vmem:[%s6966_s1 + $0x10] sm:$0xff] }
 0x9b7   : > { %2556 = vrot.lane.b32.xlu1 %v6161_v9, %s5771_s5 }
 0x9b8   : > { %2509 = vrot.lane.b32.xlu0 %v6163_v10, %s5771_s5 }
 0x9bb   : > { %2073 = vrot.lane.b32.xlu1 %v6277_v37, %s5772_s9 }
 0x9bc   : > { %2077 = vrot.lane.b32.xlu0 %v6273_v33, %s5772_s9 }
 0x9bf   : > { %2075 = vrot.lane.b32.xlu1 %v6279_v39, %s5772_s9 }
 0x9c0   : > { %2340 = vrot.lane.b32.xlu0 %v2282_v54, %s5773_s17 }
 0x9c3   : > { %2079 = vrot.lane.b32.xlu1 %v6275_v35, %s5772_s9 }
 0x9c4   : > { %2344 = vrot.lane.b32.xlu0 %v6327_v49, %s5773_s17 }
 0x9c7   : > { %2342 = vrot.lane.b32.xlu1 %v2285_v58, %s5773_s17 }
 0x9cb   : > { %2346 = vrot.lane.b32.xlu1 %v6329_v51, %s5773_s17 }
 0xa2b   : > { %v2495_v9 = vpop.xlane.xlu0 %2494 }
 0xa2c   : > { %5625 = vrcp.f32 %v2495_v9 }
 0xa2f   : > { %v2489_v10 = vpop.xlane.xlu0 %2488  ;;  %v2498_v33 = vpop.xlane.xlu1 %2497 }
 0xa30   : > { %5627 = vrcp.f32 %v2498_v33 }
 0xa31   : > { %5629 = vrcp.f32 %v2489_v10 }
 0xa33   : > { %v2510_v37 = vpop.permute.xlu0 %2509  ;;  %v2492_v39 = vpop.xlane.xlu1 %2491 }
 0xa34   : > { %5631 = vrcp.f32 %v2492_v39  ;;  %5326 = vmatpush3.bf16.msra.mxu0 %v2510_v37  ;;  %v5724_v37 = vld [vmem:[%s6966_s1 + $0x18] sm:$0xff] }
 0xa35   : > { %5337 = vmatprep.subr.bf16.mxu0 %v5553_v62 }
 0xa36   : > { %v5626_v41 = vpop.eup %5625 }
 0xa37   : > { %v2078_v35 = vpop.permute.xlu0 %2077  ;;  %v2557_v59 = vpop.permute.xlu1 %2556  ;;  %v2505_v46 = vmul.f32 %v5626_v41, %v5618_v12 }
 0xa38   : > { %2088 = vst.msk [vmem:[#allocation4 + $0x10] sm:$0xff] %vm2085_vm11, %v2078_v35  ;;  %5332 = vmatpush3.bf16.msra.mxu1 %v2557_v59 }
 0xa3a   : > { %v5628_v42 = vpop.eup %5627 }
 0xa3b   : > { %v2341_v43 = vpop.permute.xlu0 %2340  ;;  %v2074_v44 = vpop.permute.xlu1 %2073  ;;  %v2506_v47 = vmul.f32 %v5628_v42, %v5622_v32 }
 0xa3c   : > { %v5630_v45 = vpop.eup %5629  ;;  %2086 = vst.msk [vmem:[#allocation4] sm:$0xff] %vm2085_vm11, %v2074_v44 }
 0xa3d   : > { %2353 = vst.msk [vmem:[#allocation4] sm:$0xff] %vm2352_vm12, %v2341_v43  ;;  %v2508_v49 = vpack.c.bf16 %v2506_v47, %v2505_v46  ;;  %v2503_v50 = vmul.f32 %v5630_v45, %v5620_v52 }
 0xa3e   : > { %v5632_v48 = vpop.eup %5631 }
 0xa3f   : > { %v2504_v51 = vmul.f32 %v5632_v48, %v5624_v36  ;;  %v2345_v53 = vpop.permute.xlu0 %2344  ;;  %v2076_v54 = vpop.permute.xlu1 %2075  ;;  %5334 = vmatmul.mubr.msk.bf16.vlgmr.msra.gmra.mrb[36].mxu1 %vm1678_vm9, %v2508_v49 }
 0xa40   : > { %2355 = vst.msk [vmem:[#allocation4 + $0x10] sm:$0xff] %vm2352_vm12, %v2345_v53 }
 0xa41   : > { %2087 = vst.msk [vmem:[#allocation4 + $0x8] sm:$0xff] %vm2085_vm11, %v2076_v54  ;;  %v2507_v56 = vpack.c.bf16 %v2504_v51, %v2503_v50 }
 0xa43   : > { %5328 = vmatmul.mubr.msk.bf16.vlgmr.msra.gmra.mrb[28].mxu0 %vm1678_vm9, %v2507_v56  ;;  %v2080_v58 = vpop.permute.xlu1 %2079 }
 0xa44   : > { %2089 = vst.msk [vmem:[#allocation4 + $0x18] sm:$0xff] %vm2085_vm11, %v2080_v58  ;;  %5338 = vmatpush3.bf16.msra.mxu0 %v5553_v62 }
 0xa45   : > { %5339 = vmatprep.subr.bf16.mxu0 %v5554_v63 }
 0xa47   : > { %v2343_v60 = vpop.permute.xlu1 %2342 }
 0xa48   : > { %2354 = vst.msk [vmem:[#allocation4 + $0x8] sm:$0xff] %vm2352_vm12, %v2343_v60  ;;  %5340 = vmatpush3.bf16.msra.mxu0 %v5554_v63 }
 0xa4b   : > { %v2347_v61 = vpop.permute.xlu1 %2346 }
 0xa4c   : > { %2356 = vst.msk [vmem:[#allocation4 + $0x18] sm:$0xff] %vm2352_vm12, %v2347_v61 }
 0xb12   : > { %v2596_v4 = vpop.f32.mrb[36].mxu1 }
 0xb13   : > { %v5335_v5 = vpop.f32.mrb[37].mxu1 }
 0xb14   : > { %v2599_v6 = vpop.f32.mrb[38].mxu1 }
 0xb15   : > { %v5336_v7 = vpop.f32.mrb[39].mxu1 }
 0xb16   : > { %v2549_v8 = vpop.f32.mrb[28].mxu0  ;;  %v5555_v7 = vld [vmem:[%s6037_s10] sm:$0xff]  }
 0xb17   : > { %2607 = vrot.lane.b32.xlu0 %v2549_v8, %s5774_s14  ;;  %v5329_v13 = vpop.f32.mrb[29].mxu0  ;;  %v5054_v8 = vld.sshfl [vmem:[%s6974_s27] sm:$0x33 pattern:$0x76325410]  ;;  %5353 = vmatprep.subr.bf16.mxu0 %v5555_v7 }
 0xb18   : > { %v2552_v14 = vpop.f32.mrb[30].mxu0  ;;  %v2804_v13 = vcombine.high %v5054_v8, %v5054_v8 }
 0xb19   : > { %2609 = vrot.lane.b32.xlu1 %v2552_v14, %s5774_s14  ;;  %v5330_v15 = vpop.f32.mrb[31].mxu0 }
 0xb1b   : > { %2611 = vrot.lane.b32.xlu0 %v2596_v4, %s5774_s14  ;;  %v5775_v4 = vmov 1983009808  }
 0xb1c   : > { %v2919_v5 = vunpack.c.l.s4 %v5775_v4 }
 0xb1d   : > { %2613 = vrot.lane.b32.xlu1 %v2599_v6, %s5774_s14  ;;  %v2921_v6 = vlaneseq }
 0xb1e   : > { %v2920_v14 = vunpack.c.0.s8 %v2919_v5 }
 0xb1f   : > { %v2922_v15 = vshrl.u32 %v2921_v6, 7 }
 0xb89   : > { %v2608_v16 = vpop.permute.xlu0 %2607 }
 0xb8a   : > { %2620 = vst.msk [vmem:[#allocation4] sm:$0xff] %vm2619_vm13, %v2608_v16  ;;  %v5055_v16 = vld.sshfl [vmem:[%s6974_s27 + $0x4] sm:$0x3 pattern:$0x76325410] }
 0xb8b   : > { %v2610_v17 = vpop.permute.xlu1 %2609 }
 0xb8c   : > { %2621 = vst.msk [vmem:[#allocation4 + $0x8] sm:$0xff] %vm2619_vm13, %v2610_v17  ;;  %v5056_v17 = vld.sshfl [vmem:[%s6974_s27 + $0x8] sm:$0x33 pattern:$0x76325410] }
 0xb8d   : > { %v2612_v18 = vpop.permute.xlu0 %2611 }
 0xb8e   : > { %2622 = vst.msk [vmem:[#allocation4 + $0x10] sm:$0xff] %vm2619_vm13, %v2612_v18  ;;  %v2916_v18 = vcombine.low %v5054_v8, %v2804_v13 }
 0xb8f   : > { %v2614_v55 = vpop.permute.xlu1 %2613 }
 0xb90   : > { %2623 = vst.msk [vmem:[#allocation4 + $0x18] sm:$0xff] %vm2619_vm13, %v2614_v55  ;;  %v2923_v55 = vsub.s32 %v2920_v14, %v2922_v15 }
 0xb91   : > { %v2624_v19 = vld [vmem:[#allocation4] sm:$0xff] }
 0xb93   : > { %v2625_v20 = vld [vmem:[#allocation4 + $0x8] sm:$0xff] }
 0xb94   : > { %v2628_v11 = vpack.c.bf16 %v2625_v20, %v2624_v19  ;;  %v5556_v19 = vld [vmem:[%s6037_s10 + $0x8] sm:$0xff]   ;;  %v2819_v20 = vcombine.high %v5056_v17, %v5056_v17 }
 0xb95   : > { %v2626_v21 = vld [vmem:[#allocation4 + $0x10] sm:$0xff] }
 0xb96   : > { %5341 = vmatprep.mubr.msk.bf16.mxu0 %vm1437_vm5, %v2628_v11  ;;  %v2917_v11 = vcombine.low %v5055_v16, %v5056_v17 }
 0xb97   : > { %v2627_v22 = vld [vmem:[#allocation4 + $0x18] sm:$0xff] }
 0xb98   : > { %v2629_v23 = vpack.c.bf16 %v2627_v22, %v2626_v21  ;;  %v2924_v21 = vrot.slane %v2916_v18, %v2923_v55  ;;  %v5057_v22 = vld.sshfl [vmem:[%s6974_s27 + $0xc] sm:$0x3 pattern:$0x76325410]  ;;  %s6980_s27 = scalar_lea.vmem %s6871_s13, %s5985_s30 }
 0xb9a   : > { %5342 = vmatmul.mubr.msk.bf16.vlgmr.msra.gmra.mrb[32].mxu0 %vm1437_vm5, %v2629_v23  ;;  %v2931_v23 = vrot.slane %v2917_v11, %v2923_v55 }
 0xb9b   : > { %5354 = vmatpush3.bf16.msra.mxu0 %v5555_v7 }
 0xb9c   : > { %5355 = vmatprep.subr.bf16.mxu0 %v5556_v19 }
 0xb9f   : > { %5356 = vmatpush3.bf16.msra.mxu0 %v5556_v19 }
 0xba0   : > { %5369 = vmatprep.subr.bf16.mxu0 %v5767_v40 }
 0xc6d   : > { %v5343_v25 = vpop.f32.mrb[32].mxu0 }
 0xc6e   : > { %v2693_v26 = vpop.f32.mrb[33].mxu0  ;;  %v2702_v27 = vadd.f32 %v5343_v25, %v5047_v24  ;;  %v2932_v25 = vcombine.low %v2924_v21, %v2931_v23  ;;  %v5058_v21 = vld [vmem:[%s6980_s27] ss:$0 sm:$0xff] }
 0xc6f   : > { %v2694_v28 = vadd.f32 %v5047_v24, %v2693_v26  ;;  %v5344_v29 = vpop.f32.mrb[34].mxu0 }
 0xc70   : > { %v2696_v30 = vpop.f32.mrb[35].mxu0  ;;  %v2705_v32 = vadd.f32 %v5344_v29, %v5047_v24  ;;  %v2710_v9 = vadd.f32 %v5723_v38, %v2702_v27  ;;  %5357 = vmatprep.mubr.msk.bf16.mxu0 %vm1437_vm5, %v2932_v25  ;;  %v5557_v27 = vld [vmem:[%s6028_s22] sm:$0xff]  }
 0xc71   : > { %v2697_v12 = vadd.f32 %v5047_v24, %v2696_v30  ;;  %v2708_v52 = vadd.f32 %v5721_v31, %v2694_v28  ;;  %v2933_v24 = vcombine.low %v2819_v20, %v5057_v22  ;;  %5345 = vmatprep.subr.bf16.mxu1 %v5557_v27  ;;  %v5558_v28 = vld [vmem:[%s6028_s22 + $0x8] sm:$0xff]   ;;  %v5559_v29 = vld [vmem:[%s6046_s4] sm:$0xff]  }
 0xc72   : > { %v2720_v33 = vsel %vm1437_vm5, %v2710_v9, 0.0  ;;  %v2711_v39 = vadd.f32 %v5724_v37, %v2705_v32  ;;  %5346 = vmatpush3.bf16.msra.mxu1 %v5557_v27 }
 0xc73   : > { %v2714_v34 = vsel %vm1437_vm5, %v2708_v52, 0.0  ;;  %v2709_v36 = vadd.f32 %v5722_v57, %v2697_v12  ;;  %v2940_v26 = vrot.slane %v2933_v24, %v2923_v55  ;;  %5347 = vmatprep.subr.bf16.mxu1 %v5558_v28 }
 0xc74   : > { %2715 = vadd.xlane.f32.xlu0 %v2714_v34  ;;  %v2723_v35 = vsel %vm1437_vm5, %v2711_v39, 0.0 }
 0xc75   : > { %v2717_v10 = vsel %vm1437_vm5, %v2709_v36, 0.0  ;;  %5358 = vmatmul.mubr.msk.bf16.vlgmr.msra.gmra.mrb[36].mxu0 %vm1437_vm5, %v2940_v26 }
 0xc76   : > { %2718 = vadd.xlane.f32.xlu1 %v2717_v10  ;;  %5371 = vmatprep.mubr.msk.bf16.mxu0 %vm5768_vm6, %v5767_v40 }
 0xc77   : > { %5348 = vmatpush3.bf16.msra.mxu1 %v5558_v28 }
 0xc78   : > { %2721 = vadd.xlane.f32.xlu0 %v2720_v33  ;;  %5361 = vmatprep.subr.bf16.mxu1 %v5559_v29 }
 0xc7c   : > { %2724 = vadd.xlane.f32.xlu0 %v2723_v35 }
 0xd01   : > { %v2716_v59 = vpop.xlane.xlu0 %2715 }
 0xd02   : > { %v2727_v41 = vmul.f32 0.03125, %v2716_v59 }
 0xd03   : > { %v2719_v42 = vpop.xlane.xlu1 %2718 }
 0xd04   : > { %v6400_v43 = vsub.f32 %v2708_v52, %v2727_v41  ;;  %v2728_v44 = vmul.f32 0.03125, %v2719_v42 }
 0xd05   : > { %v2722_v45 = vpop.xlane.xlu0 %2721 }
 0xd06   : > { %v6402_v46 = vsub.f32 %v2709_v36, %v2728_v44  ;;  %v2729_v47 = vmul.f32 0.03125, %v2722_v45  ;;  %v2735_v48 = vmul.f32 %v6400_v43, %v6400_v43  ;;  %v5053_v45 = vld [vmem:[%s6978_s25] ss:$0 sm:$0xff] }
 0xd08   : > { %v6406_v49 = vsub.f32 %v2710_v9, %v2729_v47  ;;  %v2739_v50 = vsel %vm1437_vm5, %v2735_v48, 0.0  ;;  %v2736_v51 = vmul.f32 %v6402_v46, %v6402_v46 }
 0xd09   : > { %2740 = vadd.xlane.f32.xlu0 %v2739_v50  ;;  %v2725_v53 = vpop.xlane.xlu0 %2724 }
 0xd0a   : > { %v2730_v54 = vmul.f32 0.03125, %v2725_v53  ;;  %v2742_v56 = vsel %vm1437_vm5, %v2736_v51, 0.0  ;;  %v2737_v58 = vmul.f32 %v6406_v49, %v6406_v49 }
 0xd0b   : > { %2743 = vadd.xlane.f32.xlu1 %v2742_v56 }
 0xd0c   : > { %v6414_v60 = vsub.f32 %v2711_v39, %v2730_v54  ;;  %v2745_v61 = vsel %vm1437_vm5, %v2737_v58, 0.0  ;;  %v5052_v39 = vld [vmem:[%s6976_s3] ss:$0 sm:$0xff]  ;;  %s6982_s3 = scalar_lea.vmem %s6981_s23, %s5985_s30 }
 0xd0d   : > { %2746 = vadd.xlane.f32.xlu0 %v2745_v61 }
 0xd0e   : > { %v2738_v62 = vmul.f32 %v6414_v60, %v6414_v60 }
 0xd10   : > { %v2748_v63 = vsel %vm1437_vm5, %v2738_v62, 0.0  ;;  %v5560_v62 = vld [vmem:[%s6046_s4 + $0x8] sm:$0xff]  }
 0xd11   : > { %2749 = vadd.xlane.f32.xlu1 %v2748_v63 }
 0xd48   : > { %v5359_v63 = vpop.f32.mrb[36].mxu0 }
 0xd49   : > { %v2993_v4 = vpop.f32.mrb[37].mxu0 }
 0xd4a   : > { %v5360_v7 = vpop.f32.mrb[38].mxu0 }
 0xd4b   : > { %v2996_v8 = vpop.f32.mrb[39].mxu0 }
 0xd96   : > { %v2741_v30 = vpop.xlane.xlu0 %2740 }
 0xd97   : > { %v2751_v12 = vmul.f32 0.03125, %v2741_v30 }
 0xd98   : > { %v2744_v31 = vpop.xlane.xlu1 %2743 }
 0xd99   : > { %v2755_v52 = vadd.f32 1e-05, %v2751_v12  ;;  %v2752_v32 = vmul.f32 0.03125, %v2744_v31 }
 0xd9a   : > { %v2747_v34 = vpop.xlane.xlu0 %2746 }
 0xd9b   : > { %5633 = vrsqrt.f32 %v2755_v52  ;;  %v2756_v57 = vadd.f32 1e-05, %v2752_v32  ;;  %v2753_v36 = vmul.f32 0.03125, %v2747_v34  ;;  %v5068_v34 = vld [vmem:[%s6982_s3] ss:$0 sm:$0xff] }
 0xd9d   : > { %5635 = vrsqrt.f32 %v2756_v57  ;;  %v2757_v38 = vadd.f32 1e-05, %v2753_v36 }
 0xd9e   : > { %v2750_v9 = vpop.xlane.xlu1 %2749 }
 0xd9f   : > { %5637 = vrsqrt.f32 %v2757_v38  ;;  %v2754_v10 = vmul.f32 0.03125, %v2750_v9 }
 0xda1   : > { %v2758_v33 = vadd.f32 1e-05, %v2754_v10 }
 0xda3   : > { %5639 = vrsqrt.f32 %v2758_v33 }
 0xda5   : > { %v5634_v37 = vpop.eup %5633 }
 0xda6   : > { %v2763_v35 = vmul.f32 %v5634_v37, %v6400_v43 }
 0xda7   : > { %v5636_v59 = vpop.eup %5635 }
 0xda8   : > { %v2764_v41 = vmul.f32 %v5636_v59, %v6402_v46  ;;  %v2773_v42 = vmul.f32 %v5052_v39, %v2763_v35 }
 0xda9   : > { %v5638_v44 = vpop.eup %5637 }
 0xdaa   : > { %v2765_v47 = vmul.f32 %v5638_v44, %v6406_v49  ;;  %v2774_v48 = vmul.f32 %v5052_v39, %v2764_v41  ;;  %v6447_v50 = vadd.f32 %v5053_v45, %v2773_v42 }
 0xdac   : > { %v6449_v51 = vadd.f32 %v5053_v45, %v2774_v48  ;;  %v2775_v43 = vmul.f32 %v5052_v39, %v2765_v47 }
 0xdad   : > { %v5640_v53 = vpop.eup %5639 }
 0xdae   : > { %v2766_v54 = vmul.f32 %v5640_v53, %v6414_v60  ;;  %v2787_v46 = vpack.c.bf16 %v6449_v51, %v6447_v50  ;;  %v6455_v58 = vadd.f32 %v5053_v45, %v2775_v43  ;;  %v5063_v60 = vld [vmem:[%s6979_s7] ss:$0 sm:$0xff]  ;;  %v6515_v43 = vld [vmem:[#allocation3] sm:$0xff] }
 0xdaf   : > { %v3002_v5 = vadd.f32 %v5359_v63, %v5063_v60  ;;  %v2994_v6 = vadd.f32 %v5063_v60, %v2993_v4  ;;  %v2997_v14 = vadd.f32 %v5063_v60, %v2996_v8  ;;  %vm1408_vm15 = vcmp.gt.f32.partialorder %v6515_v43, 0.5 }
 0xdb0   : > { %v2776_v56 = vmul.f32 %v5052_v39, %v2766_v54  ;;  %5349 = vmatprep.mubr.msk.bf16.mxu1 %vm1437_vm5, %v2787_v46  ;;  %v6517_v54 = vld [vmem:[#allocation3 + $0x10] sm:$0xff]  ;;  %v6519_v46 = vld [vmem:[#allocation3 + $0x8] sm:$0xff] }
 0xdb1   : > { %v3087_v13 = vcombine.high %v2994_v6, %v2994_v6  ;;  %v3089_v15 = vcombine.high %v3002_v5, %v3002_v5  ;;  %v3088_v17 = vcombine.high %v2997_v14, %v2997_v14  ;;  %vm1410_vm1 = vcmp.gt.f32.partialorder %v6517_v54, 0.5 }
 0xdb2   : > { %v6457_v61 = vadd.f32 %v5053_v45, %v2776_v56  ;;  %vm1409_vm2 = vcmp.gt.f32.partialorder %v6519_v46, 0.5 }
 0xdb3   : > { %v3091_v16 = vcombine.low %v2994_v6, %v3087_v13  ;;  %v3092_v18 = vcombine.low %v3088_v17, %v3002_v5 }
 0xdb4   : > { %v2788_v49 = vpack.c.bf16 %v6457_v61, %v6455_v58 }
 0xdb5   : > { %v6473_v55 = vpack.c.bf16 %v2997_v14, %v3091_v16  ;;  %v6475_v19 = vpack.c.bf16 %v3089_v15, %v3092_v18 }
 0xdb6   : > { %5350 = vmatmul.mubr.msk.bf16.vlgmr.msra.gmra.mrb[40].mxu1 %vm1437_vm5, %v2788_v49  ;;  %v6522_v49 = vld [vmem:[#allocation3 + $0x18] sm:$0xff] }
 0xdb7   : > { %5362 = vmatpush3.bf16.msra.mxu1 %v5559_v29  ;;  %5365 = vmatprep.mubr.msk.bf16.mxu1 %vm1437_vm5, %v2932_v25  ;;  %v3114_v20 = vsel %vm1575_vm7, %v6473_v55, 0  ;;  %v3161_v11 = vsel %vm1575_vm7, %v6475_v19, 0  ;;  %vm1411_vm3 = vcmp.gt.f32.partialorder %v6522_v49, 0.5 }
 0xdb8   : > { %5363 = vmatprep.subr.bf16.mxu1 %v5560_v62  ;;  %5370 = vmatpush3.bf16.xpose.msra.mxu0 %v3114_v20 }
 0xdb9   : > { %5381 = vmatprep.subr.bf16.mxu0 %v5767_v40 }
 0xdbb   : > { %5364 = vmatpush3.bf16.msra.mxu1 %v5560_v62 }
 0xdbc   : > { %5375 = vmatprep.subr.bf16.mxu1 %v5767_v40 }
 0xdbe   : > { %5366 = vmatmul.mubr.msk.bf16.vlgmr.msra.gmra.mrb[44].mxu1 %vm1437_vm5, %v2940_v26 }
 0xdbf   : > { %5377 = vmatprep.mubr.msk.bf16.mxu1 %vm5768_vm6, %v5767_v40 }
 0xdc4   : > { %5376 = vmatpush3.bf16.xpose.msra.mxu1 %v3161_v11 }
 0xdc5   : > { %5387 = vmatprep.subr.bf16.mxu1 %v5767_v40 }
 0xe89   : > { %v5351_v22 = vpop.f32.mrb[40].mxu1 }
 0xe8a   : > { %v2899_v23 = vadd.f32 %v5351_v22, %v5058_v21  ;;  %v2890_v24 = vpop.f32.mrb[41].mxu1 }
 0xe8b   : > { %v2891_v25 = vadd.f32 %v5058_v21, %v2890_v24  ;;  %v5352_v26 = vpop.f32.mrb[42].mxu1 }
 0xe8c   : > { %v2902_v27 = vadd.f32 %v5352_v26, %v5058_v21  ;;  %v2893_v28 = vpop.f32.mrb[43].mxu1  ;;  %v3080_v30 = vmul.f32 0.35355338, %v2899_v23 }
 0xe8d   : > { %v2894_v29 = vadd.f32 %v5058_v21, %v2893_v28  ;;  %v3078_v31 = vmul.f32 0.35355338, %v2891_v25 }
 0xe8e   : > { %v3081_v12 = vmul.f32 0.35355338, %v2902_v27 }
 0xe8f   : > { %v3079_v52 = vmul.f32 0.35355338, %v2894_v29 }
 0xe90   : > { %v6488_v32 = vpack.c.bf16 %v3081_v12, %v3080_v30 }
 0xe91   : > { %v6495_v57 = vpack.c.bf16 %v3079_v52, %v3078_v31  ;;  %v5367_v36 = vpop.f32.mrb[44].mxu1 }
 0xe92   : > { %5378 = vmatmul.mubr.msk.bf16.vlgmr.msra.gmra.mrb[48].mxu1 %vm1575_vm7, %v6488_v32  ;;  %v3064_v38 = vpop.f32.mrb[45].mxu1  ;;  %v3073_v9 = vadd.f32 %v5367_v36, %v5068_v34 }
 0xe93   : > { %5372 = vmatmul.mubr.msk.bf16.vlgmr.msra.gmra.mrb[40].mxu0 %vm1575_vm7, %v6495_v57  ;;  %v3065_v10 = vadd.f32 %v5068_v34, %v3064_v38  ;;  %v5368_v33 = vpop.f32.mrb[46].mxu1  ;;  %5389 = vmatprep.mubr.msk.bf16.mxu1 %vm5768_vm6, %v5767_v40 }
 0xe94   : > { %v3067_v37 = vpop.f32.mrb[47].mxu1  ;;  %5383 = vmatprep.mubr.msk.bf16.mxu0 %vm5768_vm6, %v5767_v40  ;;  %v3102_v59 = vcombine.high %v3073_v9, %v3073_v9 }
 0xe95   : > { %v3100_v39 = vcombine.high %v3065_v10, %v3065_v10  ;;  %v3068_v35 = vadd.f32 %v5068_v34, %v3067_v37 }
 0xe97   : > { %v3104_v41 = vcombine.low %v3065_v10, %v3100_v39  ;;  %v3101_v42 = vcombine.high %v3068_v35, %v3068_v35 }
 0xe99   : > { %v3105_v44 = vcombine.low %v3101_v42, %v3073_v9  ;;  %v6505_v45 = vpack.c.bf16 %v3068_v35, %v3104_v41 }
 0xe9b   : > { %v6507_v47 = vpack.c.bf16 %v3102_v59, %v3105_v44  ;;  %v3260_v48 = vsel %vm3258_vm14, %v6505_v45, 0 }
 0xe9c   : > { %5382 = vmatpush3.bf16.msra.mxu0 %v3260_v48 }
 0xe9d   : > { %v3307_v53 = vsel %vm3258_vm14, %v6507_v47, 0  ;;  %5393 = vmatprep.subr.bf16.mxu0 %v5767_v40 }
 0xe9e   : > { %5388 = vmatpush3.bf16.msra.mxu1 %v3307_v53 }
 0xe9f   : > { %5399 = vmatprep.subr.bf16.mxu1 %v5767_v40 }
 0xf65   : > { %v3197_v56 = vpop.f32.mrb[48].mxu1 }
 0xf66   : > { %v3150_v62 = vpop.f32.mrb[40].mxu0  ;;  %v5379_v60 = vpop.f32.mrb[49].mxu1  ;;  %v3206_v13 = vsel %vm1410_vm1, %v3197_v56, -10000.0 }
 0xf67   : > { %v3204_v63 = vsel %vm1408_vm15, %v3150_v62, -10000.0  ;;  %v5373_v4 = vpop.f32.mrb[41].mxu0  ;;  %v3200_v5 = vpop.f32.mrb[50].mxu1  ;;  %v3215_v18 = vsel %vm3208_vm0, %v3206_v13, -inf }
 0xf68   : > { %v3153_v6 = vpop.f32.mrb[42].mxu0  ;;  %v5380_v7 = vpop.f32.mrb[51].mxu1  ;;  %v3209_v8 = vsel %vm3208_vm0, %v3204_v63, -inf  ;;  %v3207_v17 = vsel %vm1411_vm3, %v3200_v5, -10000.0 }
 0xf69   : > { %v3205_v14 = vsel %vm1409_vm2, %v3153_v6, -10000.0  ;;  %3210 = vmax.xlane.f32.xlu0 %v3209_v8  ;;  %v5374_v15 = vpop.f32.mrb[43].mxu0  ;;  %v3218_v20 = vsel %vm3208_vm0, %v3207_v17, -inf }
 0xf6a   : > { %v3212_v16 = vsel %vm3208_vm0, %v3205_v14, -inf }
 0xf6b   : > { %3213 = vmax.xlane.f32.xlu1 %v3212_v16 }
 0xf6d   : > { %3216 = vmax.xlane.f32.xlu0 %v3215_v18 }
 0xf6f   : > { %3219 = vmax.xlane.f32.xlu1 %v3218_v20 }
 0xf80   : > { %3411 = vrot.lane.b32.xlu1 %v6475_v19, %s5769_s29 }
 0xff6   : > { %v3211_v11 = vpop.xlane.xlu0 %3210 }
 0xff7   : > { %v3221_v21 = vsub.f32 %v3204_v63, %v3211_v11 }
 0xff8   : > { %v3214_v22 = vpop.xlane.xlu1 %3213 }
 0xff9   : > { %v3222_v24 = vsub.f32 %v3205_v14, %v3214_v22  ;;  %v3225_v26 = vmul.f32 1.442695, %v3221_v21 }
 0xffa   : > { %v3217_v23 = vpop.xlane.xlu0 %3216 }
 0xffb   : > { %v3223_v25 = vsub.f32 %v3206_v13, %v3217_v23  ;;  %v3227_v30 = vmul.f32 1.442695, %v3222_v24 }
 0xffc   : > { %v3220_v27 = vpop.xlane.xlu1 %3219 }
 0xffd   : > { %v3229_v28 = vmul.f32 1.442695, %v3223_v25  ;;  %v3224_v29 = vsub.f32 %v3207_v17, %v3220_v27 }
 0xfff   : > { %5641 = vpow2.f32 %v3229_v28  ;;  %v3231_v12 = vmul.f32 1.442695, %v3224_v29 }
0x1000   : > { %5643 = vpow2.f32 %v3225_v26  ;;  %v3412_v37 = vpop.permute.xlu1 %3411 }
0x1001   : > { %5645 = vpow2.f32 %v3231_v12  ;;  %v3417_v63 = vsel %vm1575_vm7, %v3412_v37, 0 }
0x1002   : > { %5647 = vpow2.f32 %v3227_v30 }
0x1009   : > { %v5642_v31 = vpop.eup %5641 }
0x100a   : > { %v5644_v52 = vpop.eup %5643  ;;  %v3239_v34 = vsel %vm3208_vm0, %v5642_v31, 0.0 }
0x100b   : > { %v5646_v36 = vpop.eup %5645  ;;  %3240 = vadd.xlane.f32.xlu0 %v3239_v34  ;;  %v3233_v10 = vsel %vm3208_vm0, %v5644_v52, 0.0 }
0x100c   : > { %v3242_v38 = vsel %vm3208_vm0, %v5646_v36, 0.0  ;;  %v5648_v9 = vpop.eup %5647 }
0x100d   : > { %3243 = vadd.xlane.f32.xlu1 %v3242_v38  ;;  %v3236_v33 = vsel %vm3208_vm0, %v5648_v9, 0.0 }
0x100f   : > { %3234 = vadd.xlane.f32.xlu0 %v3233_v10 }
0x1011   : > { %3237 = vadd.xlane.f32.xlu1 %v3236_v33 }
0x1022   : > { %3355 = vrot.lane.b32.xlu1 %v6495_v57, %s5769_s29 }
0x1025   : > { %3358 = vrot.lane.b32.xlu0 %v6473_v55, %s5769_s29 }
0x1026   : > { %3408 = vrot.lane.b32.xlu1 %v6488_v32, %s5769_s29 }
0x1098   : > { %v3241_v39 = vpop.xlane.xlu0 %3240 }
0x1099   : > { %5649 = vrcp.f32 %v3241_v39 }
0x109a   : > { %v3244_v35 = vpop.xlane.xlu1 %3243 }
0x109b   : > { %5651 = vrcp.f32 %v3244_v35 }
0x109c   : > { %v3235_v59 = vpop.xlane.xlu0 %3234 }
0x109d   : > { %5653 = vrcp.f32 %v3235_v59 }
0x109e   : > { %v3238_v41 = vpop.xlane.xlu1 %3237 }
0x109f   : > { %5655 = vrcp.f32 %v3238_v41 }
0x10a0   : > { %v3359_v6 = vpop.permute.xlu0 %3358 }
0x10a1   : > { %v3364_v13 = vsel %vm1575_vm7, %v3359_v6, 0 }
0x10a2   : > { %v3356_v7 = vpop.permute.xlu1 %3355 }
0x10a3   : > { %v5650_v42 = vpop.eup %5649 }
0x10a4   : > { %v3251_v48 = vmul.f32 %v5650_v42, %v5642_v31 }
0x10a5   : > { %v5652_v44 = vpop.eup %5651 }
0x10a6   : > { %v3252_v53 = vmul.f32 %v5652_v44, %v5646_v36  ;;  %v3409_v14 = vpop.permute.xlu1 %3408 }
0x10a7   : > { %v5654_v56 = vpop.eup %5653 }
0x10a8   : > { %v3254_v62 = vpack.c.bf16 %v3252_v53, %v3251_v48  ;;  %v3249_v4 = vmul.f32 %v5654_v56, %v5644_v52 }
0x10a9   : > { %v5656_v60 = vpop.eup %5655 }
0x10aa   : > { %v3250_v5 = vmul.f32 %v5656_v60, %v5648_v9  ;;  %5390 = vmatmul.mubr.msk.bf16.vlgmr.msra.gmra.mrb[52].mxu1 %vm3208_vm0, %v3254_v62 }
0x10ab   : > { %5400 = vmatpush3.bf16.xpose.msra.mxu1 %v3417_v63  ;;  %5401 = vmatprep.mubr.msk.bf16.mxu1 %vm5768_vm6, %v5767_v40 }
0x10ac   : > { %v3253_v8 = vpack.c.bf16 %v3250_v5, %v3249_v4  ;;  %5411 = vmatprep.subr.bf16.mxu1 %v5767_v40 }
0x10ae   : > { %5384 = vmatmul.mubr.msk.bf16.vlgmr.msra.gmra.mrb[44].mxu0 %vm3208_vm0, %v3253_v8 }
0x10af   : > { %5394 = vmatpush3.bf16.xpose.msra.mxu0 %v3364_v13  ;;  %5395 = vmatprep.mubr.msk.bf16.mxu0 %vm5768_vm6, %v5767_v40 }
0x10b0   : > { %5405 = vmatprep.subr.bf16.mxu0 %v5767_v40 }
0x10b2   : > { %5402 = vmatmul.mubr.msk.bf16.vlgmr.msra.gmra.mrb[56].mxu1 %vm1575_vm7, %v3409_v14 }
0x10b3   : > { %5413 = vmatprep.mubr.msk.bf16.mxu1 %vm5768_vm6, %v5767_v40 }
0x10b6   : > { %5396 = vmatmul.mubr.msk.bf16.vlgmr.msra.gmra.mrb[48].mxu0 %vm1575_vm7, %v3356_v7 }
0x10b7   : > { %5407 = vmatprep.mubr.msk.bf16.mxu0 %vm5768_vm6, %v5767_v40 }
0x117d   : > { %v3343_v15 = vpop.f32.mrb[52].mxu1 }
0x117e   : > { %3352 = vst.msk [vmem:[#allocation4 + $0x10] sm:$0xff] %vm1575_vm7, %v3343_v15  ;;  %v5391_v16 = vpop.f32.mrb[53].mxu1 }
0x117f   : > { %v3346_v17 = vpop.f32.mrb[54].mxu1 }
0x1180   : > { %3353 = vst.msk [vmem:[#allocation4 + $0x18] sm:$0xff] %vm1575_vm7, %v3346_v17  ;;  %v5392_v18 = vpop.f32.mrb[55].mxu1 }
0x1181   : > { %v3296_v20 = vpop.f32.mrb[44].mxu0 }
0x1182   : > { %3350 = vst.msk [vmem:[#allocation4] sm:$0xff] %vm1575_vm7, %v3296_v20  ;;  %v5385_v11 = vpop.f32.mrb[45].mxu0 }
0x1183   : > { %v3299_v21 = vpop.f32.mrb[46].mxu0 }
0x1184   : > { %3351 = vst.msk [vmem:[#allocation4 + $0x8] sm:$0xff] %vm1575_vm7, %v3299_v21  ;;  %v5386_v22 = vpop.f32.mrb[47].mxu0 }
0x1185   : > { %v3453_v23 = vpop.f32.mrb[56].mxu1 }
0x1186   : > { %v5403_v24 = vpop.f32.mrb[57].mxu1  ;;  %v3462_v31 = vsel %vm1410_vm1, %v3453_v23, -10000.0 }
0x1187   : > { %v3456_v25 = vpop.f32.mrb[58].mxu1  ;;  %v3470_v38 = vsel %vm3208_vm0, %v3462_v31, -inf }
0x1188   : > { %v5404_v26 = vpop.f32.mrb[59].mxu1  ;;  %v3463_v9 = vsel %vm1411_vm3, %v3456_v25, -10000.0 }
0x1189   : > { %v3400_v27 = vpop.f32.mrb[48].mxu0  ;;  %v3473_v10 = vsel %vm3208_vm0, %v3463_v9, -inf }
0x118a   : > { %v3460_v28 = vsel %vm1408_vm15, %v3400_v27, -10000.0  ;;  %v5397_v29 = vpop.f32.mrb[49].mxu0 }
0x118b   : > { %v3403_v30 = vpop.f32.mrb[50].mxu0  ;;  %v3464_v12 = vsel %vm3208_vm0, %v3460_v28, -inf }
0x118c   : > { %v3461_v52 = vsel %vm1409_vm2, %v3403_v30, -10000.0  ;;  %3465 = vmax.xlane.f32.xlu0 %v3464_v12  ;;  %v5398_v34 = vpop.f32.mrb[51].mxu0 }
0x118d   : > { %v3467_v36 = vsel %vm3208_vm0, %v3461_v52, -inf }
0x118e   : > { %3468 = vmax.xlane.f32.xlu1 %v3467_v36 }
0x1190   : > { %3471 = vmax.xlane.f32.xlu0 %v3470_v38 }
0x1194   : > { %3474 = vmax.xlane.f32.xlu0 %v3473_v10 }
0x119f   : > { %3561 = vrot.lane.b32.xlu1 %v6507_v47, %s5769_s29 }
0x11a3   : > { %3632 = vrot.lane.b32.xlu1 %v6473_v55, %s5770_s21 }
0x1219   : > { %v3466_v33 = vpop.xlane.xlu0 %3465 }
0x121a   : > { %v3476_v39 = vsub.f32 %v3460_v28, %v3466_v33 }
0x121b   : > { %v3469_v37 = vpop.xlane.xlu1 %3468 }
0x121c   : > { %v3480_v42 = vmul.f32 1.442695, %v3476_v39  ;;  %v3477_v44 = vsub.f32 %v3461_v52, %v3469_v37 }
0x121d   : > { %v3472_v35 = vpop.xlane.xlu0 %3471 }
0x121e   : > { %v3478_v59 = vsub.f32 %v3462_v31, %v3472_v35  ;;  %v3482_v60 = vmul.f32 1.442695, %v3477_v44 }
0x121f   : > { %v3562_v41 = vpop.permute.xlu1 %3561 }
0x1220   : > { %v3484_v48 = vmul.f32 1.442695, %v3478_v59  ;;  %v3567_v53 = vsel %vm3258_vm14, %v3562_v41, 0 }
0x1221   : > { %v3475_v56 = vpop.xlane.xlu0 %3474  ;;  %5412 = vmatpush3.bf16.msra.mxu1 %v3567_v53 }
0x1222   : > { %5657 = vpow2.f32 %v3484_v48  ;;  %v3479_v62 = vsub.f32 %v3463_v9, %v3475_v56  ;;  %5423 = vmatprep.subr.bf16.mxu1 %v5767_v40 }
0x1223   : > { %5659 = vpow2.f32 %v3480_v42  ;;  %v3633_v16 = vpop.permute.xlu1 %3632 }
0x1224   : > { %v3486_v63 = vmul.f32 1.442695, %v3479_v62  ;;  %v3638_v36 = vsel %vm1575_vm7, %v3633_v16, 0 }
0x1226   : > { %5661 = vpow2.f32 %v3486_v63 }
0x1227   : > { %5663 = vpow2.f32 %v3482_v60 }
0x122c   : > { %v5658_v4 = vpop.eup %5657 }
0x122d   : > { %v3494_v5 = vsel %vm3208_vm0, %v5658_v4, 0.0  ;;  %v5660_v6 = vpop.eup %5659 }
0x122e   : > { %3495 = vadd.xlane.f32.xlu0 %v3494_v5  ;;  %v3488_v8 = vsel %vm3208_vm0, %v5660_v6, 0.0 }
0x1230   : > { %v5662_v7 = vpop.eup %5661 }
0x1231   : > { %v3497_v13 = vsel %vm3208_vm0, %v5662_v7, 0.0  ;;  %v5664_v14 = vpop.eup %5663 }
0x1232   : > { %3489 = vadd.xlane.f32.xlu0 %v3488_v8  ;;  %3498 = vadd.xlane.f32.xlu1 %v3497_v13  ;;  %v3491_v15 = vsel %vm3208_vm0, %v5664_v14, 0.0 }
0x1236   : > { %3492 = vadd.xlane.f32.xlu1 %v3491_v15 }
0x1247   : > { %3683 = vrot.lane.b32.xlu1 %v6475_v19, %s5770_s21 }
0x1248   : > { %3511 = vrot.lane.b32.xlu0 %v6505_v45, %s5769_s29  ;;  %s6983_s29 = sld [smem:[#allocation15_spill]] }
0x124b   : > { %3681 = vrot.lane.b32.xlu1 %v6488_v32, %s5770_s21 }
0x124c   : > { %3630 = vrot.lane.b32.xlu0 %v6495_v57, %s5770_s21 }
0x12bb   : > { %v3496_v17 = vpop.xlane.xlu0 %3495 }
0x12bc   : > { %5665 = vrcp.f32 %v3496_v17 }
0x12bf   : > { %v3490_v18 = vpop.xlane.xlu0 %3489  ;;  %v3499_v20 = vpop.xlane.xlu1 %3498 }
0x12c0   : > { %5667 = vrcp.f32 %v3499_v20 }
0x12c1   : > { %5669 = vrcp.f32 %v3490_v18 }
0x12c3   : > { %v3512_v11 = vpop.permute.xlu0 %3511  ;;  %v3493_v21 = vpop.xlane.xlu1 %3492 }
0x12c4   : > { %v3517_v22 = vsel %vm3258_vm14, %v3512_v11, 0  ;;  %5671 = vrcp.f32 %v3493_v21 }
0x12c5   : > { %5406 = vmatpush3.bf16.msra.mxu0 %v3517_v22 }
0x12c6   : > { %5417 = vmatprep.subr.bf16.mxu0 %v5767_v40  ;;  %v5666_v23 = vpop.eup %5665 }
0x12c7   : > { %v3506_v26 = vmul.f32 %v5666_v23, %v5658_v4  ;;  %v3684_v28 = vpop.permute.xlu1 %3683  ;;  %v3631_v9 = vpop.permute.xlu0 %3630 }
0x12c8   : > { %v3689_v52 = vsel %vm1575_vm7, %v3684_v28, 0 }
0x12ca   : > { %v5668_v24 = vpop.eup %5667 }
0x12cb   : > { %v5670_v25 = vpop.eup %5669  ;;  %v3507_v27 = vmul.f32 %v5668_v24, %v5662_v7  ;;  %v3682_v38 = vpop.permute.xlu1 %3681 }
0x12cc   : > { %v3504_v12 = vmul.f32 %v5670_v25, %v5660_v6 }
0x12cd   : > { %v3509_v30 = vpack.c.bf16 %v3507_v27, %v3506_v26 }
0x12ce   : > { %v5672_v29 = vpop.eup %5671 }
0x12cf   : > { %v3505_v31 = vmul.f32 %v5672_v29, %v5664_v14  ;;  %5414 = vmatmul.mubr.msk.bf16.vlgmr.msra.gmra.mrb[60].mxu1 %vm3208_vm0, %v3509_v30 }
0x12d0   : > { %5424 = vmatpush3.bf16.xpose.msra.mxu1 %v3689_v52  ;;  %5425 = vmatprep.mubr.msk.bf16.mxu1 %vm5768_vm6, %v5767_v40 }
0x12d1   : > { %v3508_v34 = vpack.c.bf16 %v3505_v31, %v3504_v12  ;;  %5435 = vmatprep.subr.bf16.mxu1 %v5767_v40 }
0x12d3   : > { %5408 = vmatmul.mubr.msk.bf16.vlgmr.msra.gmra.mrb[52].mxu0 %vm3208_vm0, %v3508_v34 }
0x12d4   : > { %5418 = vmatpush3.bf16.xpose.msra.mxu0 %v3638_v36  ;;  %5419 = vmatprep.mubr.msk.bf16.mxu0 %vm5768_vm6, %v5767_v40 }
0x12d5   : > { %5429 = vmatprep.subr.bf16.mxu0 %v5767_v40 }
0x12d7   : > { %5426 = vmatmul.mubr.msk.bf16.vlgmr.msra.gmra.mrb[64].mxu1 %vm1575_vm7, %v3682_v38 }
0x12d8   : > { %5437 = vmatprep.mubr.msk.bf16.mxu1 %vm5768_vm6, %v5767_v40 }
0x12db   : > { %5420 = vmatmul.mubr.msk.bf16.vlgmr.msra.gmra.mrb[56].mxu0 %vm1575_vm7, %v3631_v9 }
0x12dc   : > { %5431 = vmatprep.mubr.msk.bf16.mxu0 %vm5768_vm6, %v5767_v40 }
0x13a2   : > { %v6619_v10 = vpop.f32.mrb[60].mxu1 }
0x13a3   : > { %v5415_v33 = vpop.f32.mrb[61].mxu1 }
0x13a4   : > { %v6621_v37 = vpop.f32.mrb[62].mxu1 }
0x13a5   : > { %v5416_v39 = vpop.f32.mrb[63].mxu1 }
0x13a6   : > { %v6623_v35 = vpop.f32.mrb[52].mxu0 }
0x13a7   : > { %v5409_v59 = vpop.f32.mrb[53].mxu0 }
0x13a8   : > { %v6625_v41 = vpop.f32.mrb[54].mxu0 }
0x13a9   : > { %v5410_v42 = vpop.f32.mrb[55].mxu0 }
0x13aa   : > { %v3725_v44 = vpop.f32.mrb[64].mxu1 }
0x13ab   : > { %v5427_v48 = vpop.f32.mrb[65].mxu1  ;;  %v3734_v6 = vsel %vm1410_vm1, %v3725_v44, -10000.0 }
0x13ac   : > { %v3728_v53 = vpop.f32.mrb[66].mxu1  ;;  %v3742_v14 = vsel %vm3208_vm0, %v3734_v6, -inf }
0x13ad   : > { %v5428_v56 = vpop.f32.mrb[67].mxu1  ;;  %v3735_v15 = vsel %vm1411_vm3, %v3728_v53, -10000.0 }
0x13ae   : > { %v3674_v62 = vpop.f32.mrb[56].mxu0  ;;  %v3745_v16 = vsel %vm3208_vm0, %v3735_v15, -inf }
0x13af   : > { %v3732_v60 = vsel %vm1408_vm15, %v3674_v62, -10000.0  ;;  %v5421_v63 = vpop.f32.mrb[57].mxu0 }
0x13b0   : > { %v3677_v4 = vpop.f32.mrb[58].mxu0  ;;  %v3736_v5 = vsel %vm3208_vm0, %v3732_v60, -inf }
0x13b1   : > { %v3733_v7 = vsel %vm1409_vm2, %v3677_v4, -10000.0  ;;  %3737 = vmax.xlane.f32.xlu0 %v3736_v5  ;;  %v5422_v8 = vpop.f32.mrb[59].mxu0 }
0x13b2   : > { %v3739_v13 = vsel %vm3208_vm0, %v3733_v7, -inf }
0x13b3   : > { %3740 = vmax.xlane.f32.xlu1 %v3739_v13 }
0x13b5   : > { %3743 = vmax.xlane.f32.xlu0 %v3742_v14 }
0x13b9   : > { %3746 = vmax.xlane.f32.xlu0 %v3745_v16 }
0x13c4   : > { %3831 = vrot.lane.b32.xlu1 %v6507_v47, %s5770_s21 }
0x13c8   : > { %3902 = vrot.lane.b32.xlu1 %v6473_v55, %s5771_s5 }
0x143e   : > { %v3738_v17 = vpop.xlane.xlu0 %3737 }
0x143f   : > { %v3748_v20 = vsub.f32 %v3732_v60, %v3738_v17 }
0x1440   : > { %v3741_v18 = vpop.xlane.xlu1 %3740 }
0x1441   : > { %v3752_v23 = vmul.f32 1.442695, %v3748_v20  ;;  %v3749_v24 = vsub.f32 %v3733_v7, %v3741_v18 }
0x1442   : > { %v3744_v11 = vpop.xlane.xlu0 %3743 }
0x1443   : > { %v3750_v21 = vsub.f32 %v3734_v6, %v3744_v11  ;;  %v3754_v29 = vmul.f32 1.442695, %v3749_v24 }
0x1444   : > { %v3832_v22 = vpop.permute.xlu1 %3831 }
0x1445   : > { %v3756_v25 = vmul.f32 1.442695, %v3750_v21  ;;  %v3837_v26 = vsel %vm3258_vm14, %v3832_v22, 0 }
0x1446   : > { %v3747_v27 = vpop.xlane.xlu0 %3746  ;;  %5436 = vmatpush3.bf16.msra.mxu1 %v3837_v26 }
0x1447   : > { %5673 = vpow2.f32 %v3756_v25  ;;  %v3751_v28 = vsub.f32 %v3735_v15, %v3747_v27  ;;  %5447 = vmatprep.subr.bf16.mxu1 %v5767_v40 }
0x1448   : > { %5675 = vpow2.f32 %v3752_v23  ;;  %v3903_v33 = vpop.permute.xlu1 %3902 }
0x1449   : > { %v3758_v55 = vmul.f32 1.442695, %v3751_v28  ;;  %v3908_v13 = vsel %vm1575_vm7, %v3903_v33, 0 }
0x144b   : > { %5677 = vpow2.f32 %v3758_v55 }
0x144c   : > { %5679 = vpow2.f32 %v3754_v29 }
0x1451   : > { %v5674_v30 = vpop.eup %5673 }
0x1452   : > { %v3766_v12 = vsel %vm3208_vm0, %v5674_v30, 0.0  ;;  %v5676_v31 = vpop.eup %5675 }
0x1453   : > { %3767 = vadd.xlane.f32.xlu0 %v3766_v12  ;;  %v3760_v34 = vsel %vm3208_vm0, %v5676_v31, 0.0 }
0x1455   : > { %v5678_v52 = vpop.eup %5677 }
0x1456   : > { %v3769_v36 = vsel %vm3208_vm0, %v5678_v52, 0.0  ;;  %v5680_v38 = vpop.eup %5679 }
0x1457   : > { %3761 = vadd.xlane.f32.xlu0 %v3760_v34  ;;  %3770 = vadd.xlane.f32.xlu1 %v3769_v36  ;;  %v3763_v9 = vsel %vm3208_vm0, %v5680_v38, 0.0 }
0x145b   : > { %3764 = vadd.xlane.f32.xlu1 %v3763_v9 }
0x146c   : > { %3953 = vrot.lane.b32.xlu1 %v6475_v19, %s5771_s5 }
0x146d   : > { %3782 = vrot.lane.b32.xlu0 %v6505_v45, %s5770_s21 }
0x1470   : > { %3951 = vrot.lane.b32.xlu1 %v6488_v32, %s5771_s5 }
0x1471   : > { %3900 = vrot.lane.b32.xlu0 %v6495_v57, %s5771_s5 }
0x14e0   : > { %v3768_v39 = vpop.xlane.xlu0 %3767 }
0x14e1   : > { %5681 = vrcp.f32 %v3768_v39 }
0x14e4   : > { %v3762_v59 = vpop.xlane.xlu0 %3761  ;;  %v3771_v42 = vpop.xlane.xlu1 %3770 }
0x14e5   : > { %5683 = vrcp.f32 %v3771_v42 }
0x14e6   : > { %5685 = vrcp.f32 %v3762_v59 }
0x14e8   : > { %v3783_v44 = vpop.permute.xlu0 %3782  ;;  %v3765_v48 = vpop.xlane.xlu1 %3764 }
0x14e9   : > { %v3788_v19 = vsel %vm3258_vm14, %v3783_v44, 0  ;;  %5687 = vrcp.f32 %v3765_v48 }
0x14ea   : > { %5430 = vmatpush3.bf16.msra.mxu0 %v3788_v19 }
0x14eb   : > { %5441 = vmatprep.subr.bf16.mxu0 %v5767_v40  ;;  %v5682_v53 = vpop.eup %5681 }
0x14ec   : > { %v3778_v62 = vmul.f32 %v5682_v53, %v5674_v30  ;;  %v3954_v60 = vpop.permute.xlu1 %3953  ;;  %v3901_v15 = vpop.permute.xlu0 %3900 }
0x14ed   : > { %v3959_v7 = vsel %vm1575_vm7, %v3954_v60, 0 }
0x14ef   : > { %v5684_v32 = vpop.eup %5683 }
0x14f0   : > { %v5686_v56 = vpop.eup %5685  ;;  %v3779_v57 = vmul.f32 %v5684_v32, %v5678_v52  ;;  %v3952_v14 = vpop.permute.xlu1 %3951 }
0x14f1   : > { %v3776_v5 = vmul.f32 %v5686_v56, %v5676_v31 }
0x14f2   : > { %v3781_v4 = vpack.c.bf16 %v3779_v57, %v3778_v62 }
0x14f3   : > { %v5688_v63 = vpop.eup %5687 }
0x14f4   : > { %v3777_v6 = vmul.f32 %v5688_v63, %v5680_v38  ;;  %5438 = vmatmul.mubr.msk.bf16.vlgmr.msra.gmra.mrb[68].mxu1 %vm3208_vm0, %v3781_v4 }
0x14f5   : > { %5448 = vmatpush3.bf16.xpose.msra.mxu1 %v3959_v7  ;;  %5449 = vmatprep.mubr.msk.bf16.mxu1 %vm5768_vm6, %v5767_v40 }
0x14f6   : > { %v3780_v8 = vpack.c.bf16 %v3777_v6, %v3776_v5  ;;  %5459 = vmatprep.subr.bf16.mxu1 %v5767_v40 }
0x14f8   : > { %5432 = vmatmul.mubr.msk.bf16.vlgmr.msra.gmra.mrb[60].mxu0 %vm3208_vm0, %v3780_v8 }
0x14f9   : > { %5442 = vmatpush3.bf16.xpose.msra.mxu0 %v3908_v13  ;;  %5443 = vmatprep.mubr.msk.bf16.mxu0 %vm5768_vm6, %v5767_v40 }
0x14fa   : > { %5453 = vmatprep.subr.bf16.mxu0 %v5767_v40 }
0x14fc   : > { %5450 = vmatmul.mubr.msk.bf16.vlgmr.msra.gmra.mrb[72].mxu1 %vm1575_vm7, %v3952_v14 }
0x14fd   : > { %5461 = vmatprep.mubr.msk.bf16.mxu1 %vm5768_vm6, %v5767_v40 }
0x1500   : > { %5444 = vmatmul.mubr.msk.bf16.vlgmr.msra.gmra.mrb[64].mxu0 %vm1575_vm7, %v3901_v15 }
0x1501   : > { %5455 = vmatprep.mubr.msk.bf16.mxu0 %vm5768_vm6, %v5767_v40 }
0x15c7   : > { %v3873_v16 = vpop.f32.mrb[68].mxu1 }
0x15c8   : > { %v5439_v17 = vpop.f32.mrb[69].mxu1 }
0x15c9   : > { %v3876_v18 = vpop.f32.mrb[70].mxu1 }
0x15ca   : > { %v5440_v20 = vpop.f32.mrb[71].mxu1 }
0x15cb   : > { %v3824_v11 = vpop.f32.mrb[60].mxu0 }
0x15cc   : > { %v5433_v21 = vpop.f32.mrb[61].mxu0 }
0x15cd   : > { %v3827_v22 = vpop.f32.mrb[62].mxu0 }
0x15ce   : > { %v5434_v23 = vpop.f32.mrb[63].mxu0 }
0x15cf   : > { %v3995_v24 = vpop.f32.mrb[72].mxu1 }
0x15d0   : > { %v5451_v25 = vpop.f32.mrb[73].mxu1  ;;  %v4004_v12 = vsel %vm1410_vm1, %v3995_v24, -10000.0 }
0x15d1   : > { %v3998_v26 = vpop.f32.mrb[74].mxu1  ;;  %v4012_v36 = vsel %vm3208_vm0, %v4004_v12, -inf }
0x15d2   : > { %v5452_v27 = vpop.f32.mrb[75].mxu1  ;;  %v4005_v43 = vsel %vm1411_vm3, %v3998_v26, -10000.0 }
0x15d3   : > { %v3944_v28 = vpop.f32.mrb[64].mxu0  ;;  %v4015_v38 = vsel %vm3208_vm0, %v4005_v43, -inf }
0x15d4   : > { %v4002_v29 = vsel %vm1408_vm15, %v3944_v28, -10000.0  ;;  %v5445_v55 = vpop.f32.mrb[65].mxu0 }
0x15d5   : > { %v4006_v30 = vsel %vm3208_vm0, %v4002_v29, -inf  ;;  %v3947_v40 = vpop.f32.mrb[66].mxu0  ;;  %v5561_v55 = vld [vmem:[%s6983_s29] sm:$0xff]  }
0x15d6   : > { %v4003_v31 = vsel %vm1409_vm2, %v3947_v40, -10000.0  ;;  %4007 = vmax.xlane.f32.xlu0 %v4006_v30  ;;  %v5446_v52 = vpop.f32.mrb[67].mxu0  ;;  %v5562_v30 = vld [vmem:[%s6983_s29 + $0x8] sm:$0xff]  }
0x15d7   : > { %v4009_v34 = vsel %vm3208_vm0, %v4003_v31, -inf }
0x15d8   : > { %4010 = vmax.xlane.f32.xlu1 %v4009_v34 }
0x15da   : > { %4013 = vmax.xlane.f32.xlu0 %v4012_v36 }
0x15de   : > { %4016 = vmax.xlane.f32.xlu0 %v4015_v38 }
0x1663   : > { %v4008_v9 = vpop.xlane.xlu0 %4007 }
0x1664   : > { %v4018_v54 = vsub.f32 %v4002_v29, %v4008_v9 }
0x1665   : > { %v4011_v33 = vpop.xlane.xlu1 %4010 }
0x1666   : > { %v4022_v59 = vmul.f32 1.442695, %v4018_v54  ;;  %v4019_v42 = vsub.f32 %v4003_v31, %v4011_v33 }
0x1667   : > { %v4014_v39 = vpop.xlane.xlu0 %4013 }
0x1668   : > { %v4020_v46 = vsub.f32 %v4004_v12, %v4014_v39  ;;  %v4024_v53 = vmul.f32 1.442695, %v4019_v42 }
0x166a   : > { %v4026_v44 = vmul.f32 1.442695, %v4020_v46 }
0x166b   : > { %v4017_v48 = vpop.xlane.xlu0 %4016 }
0x166c   : > { %5689 = vpow2.f32 %v4026_v44  ;;  %v4021_v19 = vsub.f32 %v4005_v43, %v4017_v48 }
0x166d   : > { %5691 = vpow2.f32 %v4022_v59 }
0x166e   : > { %v4028_v32 = vmul.f32 1.442695, %v4021_v19 }
0x1670   : > { %5693 = vpow2.f32 %v4028_v32 }
0x1671   : > { %5695 = vpow2.f32 %v4024_v53  ;;  %v5776_v53 = vmov 0  }
0x1672   : > { %5548 = vset.pattern.permute.xlu1 %v5776_v53  ;;  %5547 = vset.pattern.permute.xlu0 %v5776_v53 }
0x1676   : > { %v5690_v49 = vpop.eup %5689 }
0x1677   : > { %v4036_v56 = vsel %vm3208_vm0, %v5690_v49, 0.0  ;;  %v5692_v62 = vpop.eup %5691 }
0x1678   : > { %4037 = vadd.xlane.f32.xlu0 %v4036_v56  ;;  %v4030_v60 = vsel %vm3208_vm0, %v5692_v62, 0.0 }
0x167a   : > { %v5694_v57 = vpop.eup %5693 }
0x167b   : > { %v4039_v63 = vsel %vm3208_vm0, %v5694_v57, 0.0  ;;  %v5696_v4 = vpop.eup %5695 }
0x167c   : > { %4031 = vadd.xlane.f32.xlu0 %v4030_v60  ;;  %4040 = vadd.xlane.f32.xlu1 %v4039_v63  ;;  %v4033_v5 = vsel %vm3208_vm0, %v5696_v4, 0.0 }
0x1680   : > { %4034 = vadd.xlane.f32.xlu1 %v4033_v5 }
0x1691   : > { %4101 = vrot.lane.b32.xlu1 %v6507_v47, %s5771_s5 }
0x1692   : > { %4052 = vrot.lane.b32.xlu0 %v6505_v45, %s5771_s5 }
0x1695   : > { %3614 = vrot.lane.b32.xlu1 %v6623_v35, %s5772_s9 }
0x1696   : > { %3618 = vrot.lane.b32.xlu0 %v6619_v10, %s5772_s9 }
0x1699   : > { %3616 = vrot.lane.b32.xlu1 %v6625_v41, %s5772_s9 }
0x169a   : > { %3884 = vrot.lane.b32.xlu0 %v3824_v11, %s5773_s17 }
0x169d   : > { %3620 = vrot.lane.b32.xlu1 %v6621_v37, %s5772_s9  ;;  %s6984_s9 = sld [smem:[#allocation33_spill]] }
0x169e   : > { %3888 = vrot.lane.b32.xlu0 %v3873_v16, %s5773_s17 }
0x16a1   : > { %3886 = vrot.lane.b32.xlu1 %v3827_v22, %s5773_s17 }
0x16a5   : > { %3890 = vrot.lane.b32.xlu1 %v3876_v18, %s5773_s17  ;;  %s6985_s17 = scalar_lea.vmem %s6984_s9, %s5985_s30 }
0x16a6   : > { %v5089_v32 = vld [vmem:[%s6985_s17] ss:$0 sm:$0xff] }
0x1705   : > { %v4038_v45 = vpop.xlane.xlu0 %4037 }
0x1706   : > { %5697 = vrcp.f32 %v4038_v45 }
0x1709   : > { %v4032_v47 = vpop.xlane.xlu0 %4031  ;;  %v4041_v35 = vpop.xlane.xlu1 %4040 }
0x170a   : > { %5699 = vrcp.f32 %v4041_v35 }
0x170b   : > { %5701 = vrcp.f32 %v4032_v47 }
0x170d   : > { %v4053_v10 = vpop.permute.xlu0 %4052  ;;  %v4035_v6 = vpop.xlane.xlu1 %4034 }
0x170e   : > { %v4058_v41 = vsel %vm3258_vm14, %v4053_v10, 0  ;;  %5703 = vrcp.f32 %v4035_v6 }
0x170f   : > { %5454 = vmatpush3.bf16.msra.mxu0 %v4058_v41 }
0x1710   : > { %v5698_v13 = vpop.eup %5697  ;;  %5465 = vmatprep.subr.bf16.mxu0 %v5561_v55 }
0x1711   : > { %v3619_v7 = vpop.permute.xlu0 %3618  ;;  %v4102_v37 = vpop.permute.xlu1 %4101  ;;  %v4048_v18 = vmul.f32 %v5698_v13, %v5690_v49 }
0x1712   : > { %3628 = vst.msk [vmem:[#allocation4 + $0x10] sm:$0xff] %vm2085_vm11, %v3619_v7  ;;  %v4107_v8 = vsel %vm3258_vm14, %v4102_v37, 0 }
0x1713   : > { %5460 = vmatpush3.bf16.msra.mxu1 %v4107_v8 }
0x1714   : > { %v5700_v14 = vpop.eup %5699 }
0x1715   : > { %v3885_v15 = vpop.permute.xlu0 %3884  ;;  %v3615_v16 = vpop.permute.xlu1 %3614  ;;  %v4049_v20 = vmul.f32 %v5700_v14, %v5694_v57 }
0x1716   : > { %v5702_v17 = vpop.eup %5701  ;;  %3626 = vst.msk [vmem:[#allocation4] sm:$0xff] %vm2085_vm11, %v3615_v16 }
0x1717   : > { %3896 = vst.msk [vmem:[#allocation4] sm:$0xff] %vm2352_vm12, %v3885_v15  ;;  %v4051_v21 = vpack.c.bf16 %v4049_v20, %v4048_v18  ;;  %v4046_v22 = vmul.f32 %v5702_v17, %v5692_v62 }
0x1718   : > { %v5704_v11 = vpop.eup %5703 }
0x1719   : > { %v4047_v23 = vmul.f32 %v5704_v11, %v5696_v4  ;;  %v3889_v24 = vpop.permute.xlu0 %3888  ;;  %v3617_v25 = vpop.permute.xlu1 %3616  ;;  %5462 = vmatmul.mubr.msk.bf16.vlgmr.msra.gmra.mrb[76].mxu1 %vm3208_vm0, %v4051_v21 }
0x171a   : > { %3898 = vst.msk [vmem:[#allocation4 + $0x10] sm:$0xff] %vm2352_vm12, %v3889_v24 }
0x171b   : > { %3627 = vst.msk [vmem:[#allocation4 + $0x8] sm:$0xff] %vm2085_vm11, %v3617_v25  ;;  %v4050_v26 = vpack.c.bf16 %v4047_v23, %v4046_v22 }
0x171d   : > { %5456 = vmatmul.mubr.msk.bf16.vlgmr.msra.gmra.mrb[68].mxu0 %vm3208_vm0, %v4050_v26  ;;  %v3621_v27 = vpop.permute.xlu1 %3620  ;;  %v5563_v26 = vld [vmem:[%s6072_s28] sm:$0xff]  }
0x171e   : > { %3629 = vst.msk [vmem:[#allocation4 + $0x18] sm:$0xff] %vm2085_vm11, %v3621_v27  ;;  %5466 = vmatpush3.bf16.msra.mxu0 %v5561_v55  ;;  %5473 = vmatprep.subr.bf16.mxu1 %v5563_v26  ;;  %v5564_v27 = vld [vmem:[%s6072_s28 + $0x8] sm:$0xff]  }
0x171f   : > { %5467 = vmatprep.subr.bf16.mxu0 %v5562_v30  ;;  %5474 = vmatpush3.bf16.msra.mxu1 %v5563_v26 }
0x1720   : > { %5475 = vmatprep.subr.bf16.mxu1 %v5564_v27 }
0x1721   : > { %v3887_v28 = vpop.permute.xlu1 %3886 }
0x1722   : > { %3897 = vst.msk [vmem:[#allocation4 + $0x8] sm:$0xff] %vm2352_vm12, %v3887_v28  ;;  %5468 = vmatpush3.bf16.msra.mxu0 %v5562_v30  ;;  %v5565_v28 = vld [vmem:[%s6082_s19] sm:$0xff]  }
0x1723   : > { %5476 = vmatpush3.bf16.msra.mxu1 %v5564_v27  ;;  %5481 = vmatprep.subr.bf16.mxu0 %v5565_v28  ;;  %v5101_v27 = vld [vmem:[%s1304_s12] ss:$0 sm:$0xff] }
0x1725   : > { %v3891_v29 = vpop.permute.xlu1 %3890 }
0x1726   : > { %3899 = vst.msk [vmem:[#allocation4 + $0x18] sm:$0xff] %vm2352_vm12, %v3891_v29 }
0x17ec   : > { %v4143_v40 = vpop.f32.mrb[76].mxu1 }
0x17ed   : > { %v5463_v12 = vpop.f32.mrb[77].mxu1 }
0x17ee   : > { %v4146_v31 = vpop.f32.mrb[78].mxu1 }
0x17ef   : > { %v5464_v52 = vpop.f32.mrb[79].mxu1 }
0x17f0   : > { %v4094_v34 = vpop.f32.mrb[68].mxu0 }
0x17f1   : > { %4154 = vrot.lane.b32.xlu0 %v4094_v34, %s5774_s14  ;;  %v5457_v36 = vpop.f32.mrb[69].mxu0 }
0x17f2   : > { %v4097_v43 = vpop.f32.mrb[70].mxu0 }
0x17f3   : > { %4156 = vrot.lane.b32.xlu1 %v4097_v43, %s5774_s14  ;;  %v5458_v38 = vpop.f32.mrb[71].mxu0 }
0x17f5   : > { %4158 = vrot.lane.b32.xlu0 %v4143_v40, %s5774_s14 }
0x17f7   : > { %4160 = vrot.lane.b32.xlu1 %v4146_v31, %s5774_s14 }
0x1863   : > { %v4155_v9 = vpop.permute.xlu0 %4154 }
0x1864   : > { %4166 = vst.msk [vmem:[#allocation4] sm:$0xff] %vm2619_vm13, %v4155_v9 }
0x1865   : > { %v4157_v54 = vpop.permute.xlu1 %4156 }
0x1866   : > { %4167 = vst.msk [vmem:[#allocation4 + $0x8] sm:$0xff] %vm2619_vm13, %v4157_v54 }
0x1867   : > { %v4159_v33 = vpop.permute.xlu0 %4158 }
0x1868   : > { %4168 = vst.msk [vmem:[#allocation4 + $0x10] sm:$0xff] %vm2619_vm13, %v4159_v33 }
0x1869   : > { %v4161_v39 = vpop.permute.xlu1 %4160 }
0x186a   : > { %4169 = vst.msk [vmem:[#allocation4 + $0x18] sm:$0xff] %vm2619_vm13, %v4161_v39 }
0x186b   : > { %v4170_v46 = vld [vmem:[#allocation4] sm:$0xff] }
0x186d   : > { %v4171_v59 = vld [vmem:[#allocation4 + $0x8] sm:$0xff] }
0x186e   : > { %v4174_v42 = vpack.c.bf16 %v4171_v59, %v4170_v46  ;;  %v5094_v59 = vld [vmem:[%s6987_s11] ss:$0 sm:$0xff] }
0x186f   : > { %v4172_v44 = vld [vmem:[#allocation4 + $0x10] sm:$0xff] }
0x1870   : > { %5469 = vmatprep.mubr.msk.bf16.mxu0 %vm1437_vm5, %v4174_v42 }
0x1871   : > { %v4173_v48 = vld [vmem:[#allocation4 + $0x18] sm:$0xff] }
0x1872   : > { %v4175_v19 = vpack.c.bf16 %v4173_v48, %v4172_v44 }
0x1874   : > { %5470 = vmatmul.mubr.msk.bf16.vlgmr.msra.gmra.mrb[72].mxu0 %vm1437_vm5, %v4175_v19 }
0x1875   : > { %5482 = vmatpush3.bf16.msra.mxu0 %v5565_v28 }
0x1947   : > { %v5471_v49 = vpop.f32.mrb[72].mxu0 }
0x1948   : > { %v4239_v56 = vpop.f32.mrb[73].mxu0  ;;  %v4248_v62 = vadd.f32 %v5471_v49, %v5089_v32 }
0x1949   : > { %v4240_v57 = vadd.f32 %v5089_v32, %v4239_v56  ;;  %v5472_v60 = vpop.f32.mrb[74].mxu0  ;;  %v5095_v56 = vld [vmem:[%s6989_s18] ss:$0 sm:$0xff] }
0x194a   : > { %v4242_v63 = vpop.f32.mrb[75].mxu0  ;;  %v4256_v45 = vadd.f32 %v4248_v62, %v6455_v58  ;;  %v4251_v47 = vadd.f32 %v5472_v60, %v5089_v32 }
0x194b   : > { %v4254_v4 = vadd.f32 %v4240_v57, %v6447_v50  ;;  %v4243_v5 = vadd.f32 %v5089_v32, %v4242_v63 }
0x194c   : > { %v4257_v41 = vadd.f32 %v4251_v47, %v6457_v61  ;;  %v4266_v7 = vsel %vm1437_vm5, %v4256_v45, 0.0 }
0x194d   : > { %v4255_v35 = vadd.f32 %v4243_v5, %v6449_v51  ;;  %v4260_v10 = vsel %vm1437_vm5, %v4254_v4, 0.0 }
0x194e   : > { %4261 = vadd.xlane.f32.xlu0 %v4260_v10  ;;  %v4269_v37 = vsel %vm1437_vm5, %v4257_v41, 0.0 }
0x194f   : > { %v4263_v6 = vsel %vm1437_vm5, %v4255_v35, 0.0 }
0x1950   : > { %4264 = vadd.xlane.f32.xlu1 %v4263_v6 }
0x1952   : > { %4267 = vadd.xlane.f32.xlu0 %v4266_v7 }
0x1956   : > { %4270 = vadd.xlane.f32.xlu0 %v4269_v37  ;;  %v5566_v37 = vld [vmem:[%s6082_s19 + $0x8] sm:$0xff]  }
0x1957   : > { %5483 = vmatprep.subr.bf16.mxu0 %v5566_v37 }
0x1958   : > { %5484 = vmatpush3.bf16.msra.mxu0 %v5566_v37 }
0x1961   : > { %4339 = vperm.xlu1 %5548, %v5980_v1  }
0x1965   : > { %4344 = vperm.xlu1 %5548, %v5982_v2  }
0x19db   : > { %v4262_v50 = vpop.xlane.xlu0 %4261 }
0x19dc   : > { %v4272_v51 = vmul.f32 0.03125, %v4262_v50  ;;  %v5567_v50 = vld [vmem:[%s6082_s19 + $0x10] sm:$0xff]  }
0x19dd   : > { %v4265_v58 = vpop.xlane.xlu1 %4264  ;;  %5485 = vmatprep.subr.bf16.mxu0 %v5567_v50 }
0x19de   : > { %v4276_v14 = vsub.f32 %v4254_v4, %v4272_v51  ;;  %v4273_v15 = vmul.f32 0.03125, %v4265_v58  ;;  %5486 = vmatpush3.bf16.msra.mxu0 %v5567_v50  ;;  %v5568_v51 = vld [vmem:[%s6082_s19 + $0x18] sm:$0xff]   ;;  %v5096_v58 = vld [vmem:[%s1296_s26] ss:$0 sm:$0xff] }
0x19df   : > { %v4268_v8 = vpop.xlane.xlu0 %4267  ;;  %5487 = vmatprep.subr.bf16.mxu0 %v5568_v51 }
0x19e0   : > { %v4274_v13 = vmul.f32 0.03125, %v4268_v8  ;;  %v4277_v20 = vsub.f32 %v4255_v35, %v4273_v15  ;;  %v4280_v1 = vmul.f32 %v4276_v14, %v4276_v14 }
0x19e1   : > { %v6755_v29 = vpop.permute.xlu1 %4339 }
0x19e2   : > { %v4278_v16 = vsub.f32 %v4256_v45, %v4274_v13  ;;  %v4284_v22 = vsel %vm1437_vm5, %v4280_v1, 0.0  ;;  %v4281_v24 = vmul.f32 %v4277_v20, %v4277_v20  ;;  %5488 = vmatpush3.bf16.msra.mxu0 %v5568_v51 }
0x19e3   : > { %v4271_v17 = vpop.xlane.xlu0 %4270 }
0x19e4   : > { %v4275_v61 = vmul.f32 0.03125, %v4271_v17  ;;  %v4282_v18 = vmul.f32 %v4278_v16, %v4278_v16  ;;  %v4287_v25 = vsel %vm1437_vm5, %v4281_v24, 0.0 }
0x19e5   : > { %v6757_v55 = vpop.permute.xlu1 %4344 }
0x19e6   : > { %v4279_v11 = vsub.f32 %v4257_v41, %v4275_v61  ;;  %v4290_v21 = vsel %vm1437_vm5, %v4282_v18, 0.0 }
0x19e7   : > { %4291 = vadd.xlane.f32.xlu0 %v4290_v21 }
0x19e8   : > { %v4283_v2 = vmul.f32 %v4279_v11, %v4279_v11 }
0x19ea   : > { %v4293_v23 = vsel %vm1437_vm5, %v4283_v2, 0.0 }
0x19eb   : > { %4285 = vadd.xlane.f32.xlu0 %v4284_v22  ;;  %4294 = vadd.xlane.f32.xlu1 %v4293_v23 }
0x19ef   : > { %4288 = vadd.xlane.f32.xlu1 %v4287_v25 }
0x1a00   : > { %4349 = vperm.xlu1 %5548, %v5987_v3  }
0x1a01   : > { %4334 = vperm.xlu0 %5547, %v5978_v0  }
0x1a74   : > { %v4292_v30 = vpop.xlane.xlu0 %4291 }
0x1a75   : > { %v4298_v40 = vmul.f32 0.03125, %v4292_v30 }
0x1a77   : > { %v4302_v12 = vadd.f32 1e-05, %v4298_v40 }
0x1a78   : > { %v4295_v31 = vpop.xlane.xlu1 %4294  ;;  %v4286_v3 = vpop.xlane.xlu0 %4285 }
0x1a79   : > { %v4299_v0 = vmul.f32 0.03125, %v4295_v31  ;;  %v4296_v52 = vmul.f32 0.03125, %v4286_v3  ;;  %5705 = vrsqrt.f32 %v4302_v12 }
0x1a7b   : > { %v4303_v34 = vadd.f32 1e-05, %v4299_v0  ;;  %v4300_v36 = vadd.f32 1e-05, %v4296_v52 }
0x1a7c   : > { %v4289_v43 = vpop.xlane.xlu1 %4288 }
0x1a7d   : > { %5707 = vrsqrt.f32 %v4303_v34  ;;  %v4297_v38 = vmul.f32 0.03125, %v4289_v43 }
0x1a7e   : > { %5709 = vrsqrt.f32 %v4300_v36 }
0x1a7f   : > { %v4301_v9 = vadd.f32 1e-05, %v4297_v38 }
0x1a80   : > { %v6771_v4 = vpop.permute.xlu0 %4334  ;;  %v6773_v5 = vpop.permute.xlu1 %4349 }
0x1a81   : > { %5711 = vrsqrt.f32 %v4301_v9 }
0x1a83   : > { %v5706_v54 = vpop.eup %5705 }
0x1a84   : > { %v4310_v39 = vmul.f32 %v5706_v54, %v4278_v16 }
0x1a86   : > { %v4320_v53 = vmul.f32 %v5094_v59, %v4310_v39 }
0x1a87   : > { %v5708_v33 = vpop.eup %5707 }
0x1a88   : > { %v5710_v46 = vpop.eup %5709  ;;  %v4311_v42 = vmul.f32 %v5708_v33, %v4279_v11  ;;  %v4330_v63 = vadd.f32 %v5095_v56, %v4320_v53 }
0x1a89   : > { %v4308_v44 = vmul.f32 %v5710_v46, %v4276_v14 }
0x1a8a   : > { %v4321_v48 = vmul.f32 %v5094_v59, %v4311_v42  ;;  %v4354_v6 = vmul.f32 %v6757_v55, %v4330_v63 }
0x1a8b   : > { %v5712_v19 = vpop.eup %5711  ;;  %v4318_v32 = vmul.f32 %v5094_v59, %v4308_v44 }
0x1a8c   : > { %v4309_v49 = vmul.f32 %v5712_v19, %v4277_v20  ;;  %v6769_v62 = vadd.f32 %v5095_v56, %v4321_v48 }
0x1a8d   : > { %v4328_v60 = vadd.f32 %v5095_v56, %v4318_v32 }
0x1a8e   : > { %v4319_v57 = vmul.f32 %v5094_v59, %v4309_v49  ;;  %v4355_v47 = vmul.f32 %v6773_v5, %v6769_v62 }
0x1a8f   : > { %v4352_v10 = vmul.f32 %v6771_v4, %v4328_v60 }
0x1a90   : > { %v4329_v45 = vadd.f32 %v5095_v56, %v4319_v57  ;;  %v4357_v7 = vpack.c.bf16 %v4355_v47, %v4354_v6 }
0x1a92   : > { %v4353_v35 = vmul.f32 %v6755_v29, %v4329_v45 }
0x1a94   : > { %v4356_v41 = vpack.c.bf16 %v4353_v35, %v4352_v10 }
0x1a96   : > { %5477 = vmatprep.mubr.msk.bf16.mxu1 %vm1437_vm5, %v4356_v41 }
0x1a97   : > { %5478 = vmatmul.mubr.msk.bf16.vlgmr.msra.gmra.mrb[80].mxu1 %vm1437_vm5, %v4357_v7 }
0x1b6a   : > { %v5479_v8 = vpop.f32.mrb[80].mxu1 }
0x1b6b   : > { %v4430_v13 = vadd.f32 %v5479_v8, %v5096_v58  ;;  %v4421_v14 = vpop.f32.mrb[81].mxu1 }
0x1b6c   : > { %v4422_v15 = vadd.f32 %v5096_v58, %v4421_v14  ;;  %v5480_v16 = vpop.f32.mrb[82].mxu1 }
0x1b6d   : > { %v4438_v17 = vmax.f32 %v4430_v13, 0.0  ;;  %v4433_v61 = vadd.f32 %v5480_v16, %v5096_v58  ;;  %v4424_v18 = vpop.f32.mrb[83].mxu1 }
0x1b6e   : > { %v4436_v20 = vmax.f32 %v4422_v15, 0.0  ;;  %v4425_v11 = vadd.f32 %v5096_v58, %v4424_v18 }
0x1b6f   : > { %v4439_v21 = vmax.f32 %v4433_v61, 0.0  ;;  %v4442_v2 = vmul.f32 %v4438_v17, %v6757_v55 }
0x1b70   : > { %v4437_v1 = vmax.f32 %v4425_v11, 0.0  ;;  %v4440_v23 = vmul.f32 %v4436_v20, %v6771_v4 }
0x1b71   : > { %v4443_v22 = vmul.f32 %v4439_v21, %v6773_v5 }
0x1b72   : > { %v4441_v24 = vmul.f32 %v4437_v1, %v6755_v29 }
0x1b73   : > { %v4445_v25 = vpack.c.bf16 %v4443_v22, %v4442_v2  ;;  %v5108_v2 = vld [vmem:[%s1307_s16] ss:$0 sm:$0xff] }
0x1b74   : > { %v4444_v26 = vpack.c.bf16 %v4441_v24, %v4440_v23  ;;  %v5109_v23 = vld [vmem:[%s1310_s20] ss:$0 sm:$0xff]  ;;  %s6994_s20 = sld [smem:[#allocation12_spill]] (!%p5110_p9) }
0x1b76   : > { %5489 = vmatprep.mubr.msk.bf16.mxu0 %vm4485_vm4, %v4444_v26 }
0x1b77   : > { %5490 = vmatmul.mubr.msk.bf16.vlgmr.msra.gmra.mrb[76].mxu0 %vm4485_vm4, %v4445_v25 }
0x1c4a   : > { %v5491_v28 = vpop.f32.mrb[76].mxu0 }
0x1c4b   : > { %v4535_v30 = vadd.f32 %v5491_v28, %v5101_v27  ;;  %v4526_v40 = vpop.f32.mrb[77].mxu0 }
0x1c4c   : > { %v4527_v12 = vadd.f32 %v5101_v27, %v4526_v40  ;;  %v5492_v31 = vpop.f32.mrb[78].mxu0 }
0x1c4d   : > { %v4529_v3 = vpop.f32.mrb[79].mxu0  ;;  %v4543_v0 = vmul.f32 %v4535_v30, %v6757_v55  ;;  %v4538_v34 = vadd.f32 %v5492_v31, %v5101_v27 }
0x1c4e   : > { %v4541_v52 = vmul.f32 %v4527_v12, %v6771_v4  ;;  %v4530_v36 = vadd.f32 %v5101_v27, %v4529_v3 }
0x1c4f   : > { %v4544_v9 = vmul.f32 %v4538_v34, %v6773_v5  ;;  %v4547_v39 = vadd.f32 %v4543_v0, %v4330_v63 }
0x1c50   : > { %v4542_v43 = vmul.f32 %v4530_v36, %v6755_v29  ;;  %v4545_v38 = vadd.f32 %v4541_v52, %v4328_v60 }
0x1c51   : > { %v4557_v59 = vsel %vm1437_vm5, %v4547_v39, 0.0  ;;  %v4548_v42 = vadd.f32 %v4544_v9, %v6769_v62 }
0x1c52   : > { %v4551_v54 = vsel %vm1437_vm5, %v4545_v38, 0.0  ;;  %v4546_v33 = vadd.f32 %v4542_v43, %v4329_v45 }
0x1c53   : > { %4552 = vadd.xlane.f32.xlu1 %v4551_v54  ;;  %v4560_v44 = vsel %vm1437_vm5, %v4548_v42, 0.0 }
0x1c54   : > { %v4554_v46 = vsel %vm1437_vm5, %v4546_v33, 0.0 }
0x1c55   : > { %4555 = vadd.xlane.f32.xlu0 %v4554_v46 }
0x1c57   : > { %4558 = vadd.xlane.f32.xlu1 %v4557_v59 }
0x1c5b   : > { %4561 = vadd.xlane.f32.xlu1 %v4560_v44 }
0x1ce0   : > { %v4553_v48 = vpop.xlane.xlu1 %4552 }
0x1ce1   : > { %v4563_v19 = vmul.f32 0.03125, %v4553_v48 }
0x1ce2   : > { %v4556_v53 = vpop.xlane.xlu0 %4555 }
0x1ce3   : > { %v4567_v32 = vsub.f32 %v4545_v38, %v4563_v19  ;;  %v4564_v49 = vmul.f32 0.03125, %v4556_v53 }
0x1ce4   : > { %v4559_v56 = vpop.xlane.xlu1 %4558 }
0x1ce5   : > { %v4568_v57 = vsub.f32 %v4546_v33, %v4564_v49  ;;  %v4565_v60 = vmul.f32 0.03125, %v4559_v56  ;;  %v4571_v63 = vmul.f32 %v4567_v32, %v4567_v32 }
0x1ce7   : > { %v4569_v45 = vsub.f32 %v4547_v39, %v4565_v60  ;;  %v4575_v47 = vsel %vm1437_vm5, %v4571_v63, 0.0  ;;  %v4572_v35 = vmul.f32 %v4568_v57, %v4568_v57 }
0x1ce8   : > { %4576 = vadd.xlane.f32.xlu1 %v4575_v47  ;;  %v4562_v10 = vpop.xlane.xlu1 %4561 }
0x1ce9   : > { %v4566_v62 = vmul.f32 0.03125, %v4562_v10  ;;  %v4573_v6 = vmul.f32 %v4569_v45, %v4569_v45  ;;  %v4578_v7 = vsel %vm1437_vm5, %v4572_v35, 0.0 }
0x1ceb   : > { %v4570_v41 = vsub.f32 %v4548_v42, %v4566_v62  ;;  %v4581_v37 = vsel %vm1437_vm5, %v4573_v6, 0.0 }
0x1cec   : > { %4579 = vadd.xlane.f32.xlu1 %v4578_v7  ;;  %4582 = vadd.xlane.f32.xlu0 %v4581_v37 }
0x1ced   : > { %v4574_v50 = vmul.f32 %v4570_v41, %v4570_v41 }
0x1cef   : > { %v4584_v51 = vsel %vm1437_vm5, %v4574_v50, 0.0 }
0x1cf0   : > { %4585 = vadd.xlane.f32.xlu1 %v4584_v51 }
0x1d75   : > { %v4577_v58 = vpop.xlane.xlu1 %4576 }
0x1d76   : > { %v4587_v8 = vmul.f32 0.03125, %v4577_v58 }
0x1d78   : > { %v4591_v13 = vadd.f32 1e-05, %v4587_v8 }
0x1d79   : > { %v4583_v14 = vpop.xlane.xlu0 %4582  ;;  %v4580_v15 = vpop.xlane.xlu1 %4579 }
0x1d7a   : > { %5713 = vrsqrt.f32 %v4591_v13  ;;  %v4589_v16 = vmul.f32 0.03125, %v4583_v14  ;;  %v4588_v17 = vmul.f32 0.03125, %v4580_v15 }
0x1d7c   : > { %v4593_v61 = vadd.f32 1e-05, %v4589_v16  ;;  %v4592_v18 = vadd.f32 1e-05, %v4588_v17 }
0x1d7d   : > { %v4586_v20 = vpop.xlane.xlu1 %4585 }
0x1d7e   : > { %5715 = vrsqrt.f32 %v4593_v61  ;;  %v4590_v11 = vmul.f32 0.03125, %v4586_v20 }
0x1d7f   : > { %5717 = vrsqrt.f32 %v4592_v18 }
0x1d80   : > { %v4594_v21 = vadd.f32 1e-05, %v4590_v11 }
0x1d82   : > { %5719 = vrsqrt.f32 %v4594_v21 }
0x1d84   : > { %v5714_v1 = vpop.eup %5713 }
0x1d85   : > { %v4599_v22 = vmul.f32 %v5714_v1, %v4567_v32 }
0x1d87   : > { %v4609_v24 = vmul.f32 %v5108_v2, %v4599_v22 }
0x1d88   : > { %v5716_v25 = vpop.eup %5715 }
0x1d89   : > { %v5718_v26 = vpop.eup %5717  ;;  %v4619_v27 = vadd.f32 %v5109_v23, %v4609_v24  ;;  %v4601_v28 = vmul.f32 %v5716_v25, %v4569_v45 }
0x1d8a   : > { %v4600_v30 = vmul.f32 %v5718_v26, %v4568_v57 }
0x1d8b   : > { %4623 = vst.msk [vmem:[%s6966_s1] sm:$0xff] %vm1437_vm5, %v4619_v27  ;;  %v4611_v40 = vmul.f32 %v5108_v2, %v4601_v28  ;;  %v4631_v43 = vmul.f32 (!%p5110_p9), %v4619_v27, %v6771_v4 }
0x1d8c   : > { %v5720_v12 = vpop.eup %5719  ;;  %v4610_v31 = vmul.f32 %v5108_v2, %v4600_v30 }
0x1d8d   : > { %v4621_v3 = vadd.f32 %v5109_v23, %v4611_v40  ;;  %v4602_v0 = vmul.f32 %v5720_v12, %v4570_v41  ;;  %4630 = sbr.rel (%p5110_p9) target bundleno = 7574 (0x1d96), region = 140 }
0x1d8e   : > { %v4620_v52 = vadd.f32 %v5109_v23, %v4610_v31 }
0x1d8f   : > { %v4612_v34 = vmul.f32 %v5108_v2, %v4602_v0  ;;  %4625 = vst.msk [vmem:[%s6966_s1 + $0x10] sm:$0xff] %vm1437_vm5, %v4621_v3  ;;  %v4633_v9 = vmul.f32 (!%p5110_p9), %v4621_v3, %v6757_v55 }
0x1d90   : > { %4624 = vst.msk [vmem:[%s6966_s1 + $0x8] sm:$0xff] %vm1437_vm5, %v4620_v52  ;;  %v4632_v38 = vmul.f32 (!%p5110_p9), %v4620_v52, %v6755_v29 }
0x1d91   : > { %v4622_v36 = vadd.f32 %v5109_v23, %v4612_v34 }
0x1d93   : > { %4626 = vst.msk [vmem:[%s6966_s1 + $0x18] sm:$0xff] %vm1437_vm5, %v4622_v36  ;;  %v4634_v54 = vmul.f32 (!%p5110_p9), %v4622_v36, %v6773_v5 }
0x1d94   : > { %4635 = vst.msk [vmem:[%s6994_s20] sm:$0xff] %vm1437_vm5, %v4631_v43  ;;  %4636 = vst.msk [vmem:[%s6994_s20 + $0x8] sm:$0xff] %vm1437_vm5, %v4632_v38 }
0x1d95   : > { %4637 = vst.msk [vmem:[%s6994_s20 + $0x10] sm:$0xff] %vm1437_vm5, %v4633_v9  ;;  %4638 = vst.msk [vmem:[%s6994_s20 + $0x18] sm:$0xff] %vm1437_vm5, %v4634_v54 }
0x1d96 PF: > { %s6995_s8 = sld [smem:[#allocation7_spill]]  ;;  %s6997_s5 = sld [smem:[#allocation6_spill]] }
0x1d97   : > { %s6998_s9 = sld [smem:[#allocation8_spill]]  ;;  %s6999_s30 = sld [smem:[#allocation9_spill]] }
0x1d9c   : > { %s38_s3 = sadd.s32 1, %s6995_s8   ;;  %s6996_s8 = sld [smem:[#allocation5_spill]] }
0x1d9d   : > { %p35_p10 = scmp.ge.s32.totalorder %s38_s3, 6  }
0x1d9f   :  { %37 = sbr.rel (!%p35_p10) target bundleno = 28 (0x1c), region = 251 }

</bundles_post_ra>
